<compile_context>
chip_gen: v7x
topology: tpu7x:2x2x1
jax: 0.10.0
libtpu: 0.0.40
codegen_flags: <defaults>
</compile_context>

<pallas_src>
import functools

import jax
import jax.numpy as jnp
from jax.experimental import pallas as pl
from jax.experimental.pallas import tpu as pltpu


def _round_up(x, m):
    return ((x + m - 1) // m) * m


def _full_spec(shape):
    nd = len(shape)
    return pl.BlockSpec(shape, lambda i: (0,) * nd)


# ----------------------------------------------------------------------------
# Fused kernel: all GRU layers + final Linear in one invocation.
#
# PyTorch gate order (r, z, n):
#   r = sigmoid(x W_ir + b_ir + h W_hr + b_hr)
#   z = sigmoid(x W_iz + b_iz + h W_hz + b_hz)
#   n = tanh   (x W_in + b_in + r * (h W_hn + b_hn))
#   h' = (1 - z) * n + z * h   ==  n + z * (h - n)
# b_hr, b_hz are pre-folded into b_ih; b_hn is added inside the r*(...) term.
# ----------------------------------------------------------------------------
def char_rnn_fused_kernel(emb_ref, h0_ref, w_ih_hbm, w_hh_hbm, b_ih_ref,
                          b_hn_ref, w_proj_ref, b_proj_ref,
                          logits_ref, hfin_ref,
                          act_ref, gi_ref, wih_buf, whh_buf, dma_sem,
                          *, num_layers, seq, batch_p, hidden_p,
                          time_chunk, full_unroll, time_unroll):
    Bp, Hp = batch_p, hidden_p
    Cp = w_proj_ref.shape[-1]
    in_max = emb_ref.shape[-1]

    # Static time-chunk schedule: gi is hoisted per chunk (not whole-seq) so
    # its f32 scratch is capped at time_chunk*Bp rows regardless of seq.
    chunks = []
    t_start = 0
    while t_start < seq:
        c_len = min(time_chunk, seq - t_start)
        chunks.append((t_start, c_len))
        t_start += c_len

    # ---- Layer-weight streaming: HBM -> VMEM 2-slot ping-pong ------------
    def weight_copies(layer, slot):
        return (
            pltpu.make_async_copy(w_ih_hbm.at[layer], wih_buf.at[slot],
                                  dma_sem.at[0, slot]),
            pltpu.make_async_copy(w_hh_hbm.at[layer], whh_buf.at[slot],
                                  dma_sem.at[1, slot]),
        )

    for c in weight_copies(0, 0):          # prime layer 0
        c.start()

    # If the padded embedding width exceeds the hidden width, zero the extra
    # act columns once: hidden states are only ever written to [:Hp].
    if in_max > Hp:
        act_ref[:, Hp:] = jnp.zeros((seq * Bp, in_max - Hp), act_ref.dtype)

    for l in range(num_layers):
        slot = l & 1
        for c in weight_copies(l, slot):
            c.wait()
        # Prefetch next layer's weights behind this layer's recurrence.
        if l + 1 < num_layers:
            for c in weight_copies(l + 1, 1 - slot):
                c.start()

        b_ih_l = b_ih_ref[l]                               # (1, 3*Hp) f32 (folded)
        b_hn_l = jnp.broadcast_to(b_hn_ref[l], (Bp, Hp))   # hoisted broadcast

        def step(gi_row, act_row, h_prev):
            gi_t = gi_ref[pl.ds(gi_row, Bp), :]                   # (Bp, 3*Hp) f32
            gh = jnp.dot(h_prev.astype(jnp.bfloat16), whh_buf[slot],
                         preferred_element_type=jnp.float32)      # (Bp, 3*Hp) f32
            # Gate slices at 128-aligned lane offsets 0 / Hp / 2*Hp -> free.
            r = jax.nn.sigmoid(gi_t[:, 0:Hp] + gh[:, 0:Hp])
            z = jax.nn.sigmoid(gi_t[:, Hp:2 * Hp] + gh[:, Hp:2 * Hp])
            n = jnp.tanh(gi_t[:, 2 * Hp:3 * Hp]
                         + r * (gh[:, 2 * Hp:3 * Hp] + b_hn_l))
            h_new = n + z * (h_prev - n)                          # (1-z)n + z h
            # Bp is a multiple of 16 -> full unmasked bf16 (16,128) tile store.
            act_ref[pl.ds(act_row, Bp), 0:Hp] = h_new.astype(act_ref.dtype)
            return h_new

        h = h0_ref[l]                                             # (Bp, Hp) f32
        for (c_t0, c_len) in chunks:
            row0 = c_t0 * Bp
            rows = c_len * Bp
            # Hoisted input->hidden matmul for this chunk.  For l > 0 the
            # chunk's input rows are fully consumed into gi_ref here, before
            # the recurrence overwrites them (same-ref program order).
            x_chunk = (emb_ref[row0:row0 + rows, :] if l == 0
                       else act_ref[row0:row0 + rows, :])
            gi_ref[0:rows, :] = (
                jnp.dot(x_chunk, wih_buf[slot],
                        preferred_element_type=jnp.float32) + b_ih_l)
            if c_len <= full_unroll:
                # Short chunk: straight-line recurrence.
                for t in range(c_len):
                    h = step(t * Bp, row0 + t * Bp, h)
            else:
                # Long chunk: rolled loop with partial unroll, h carried as
                # the loop value (final state written once per layer below).
                def body(t, hh):
                    gi_row = pl.multiple_of(t * Bp, Bp)
                    act_row = pl.multiple_of(row0 + t * Bp, Bp)
                    return step(gi_row, act_row, hh)
                h = jax.lax.fori_loop(0, c_len, body, h, unroll=time_unroll)
        hfin_ref[l] = h                                           # once per layer

    # ---- Final projection, chunked over time ------------------------------
    # logits are written batch-major and lane-dense as (Bp, seq*Cp): row b
    # holds [t0 | t1 | ...] logits, so the wrapper needs no transpose.
    for (c_t0, c_len) in chunks:
        row0 = c_t0 * Bp
        rows = c_len * Bp
        proj = (jnp.dot(act_ref[row0:row0 + rows, :], w_proj_ref[...],
                        preferred_element_type=jnp.float32)
                + b_proj_ref[...])                                # (rows, Cp) f32
        for t in range(c_len):
            logits_ref[:, (c_t0 + t) * Cp:(c_t0 + t + 1) * Cp] = (
                proj[t * Bp:(t + 1) * Bp, :])


def char_rnn_pallas(emb_p, h0_p, w_ih_all, w_hh_all, b_ih_all, b_hn_all,
                    w_proj_p, b_proj_p, *, seq, batch_p, hidden_p, classes_p,
                    num_layers, time_chunk=32, full_unroll=16, time_unroll=4):
    Bp, Hp, Cp = batch_p, hidden_p, classes_p
    in_max = emb_p.shape[-1]
    gi_rows = min(seq, time_chunk) * Bp

    kernel = functools.partial(
        char_rnn_fused_kernel, num_layers=num_layers, seq=seq, batch_p=Bp,
        hidden_p=Hp, time_chunk=time_chunk, full_unroll=full_unroll,
        time_unroll=time_unroll)

    def nbytes(a):
        return int(a.size) * a.dtype.itemsize

    # Explicit scoped-VMEM budget: (possibly double-buffered) BlockSpec
    # inputs/outputs + scratch + headroom.  Layer weights are streamed from
    # HBM so they are NOT in the BlockSpec-resident set.
    io_bytes = 2 * (nbytes(emb_p) + nbytes(h0_p) + nbytes(b_ih_all)
                    + nbytes(b_hn_all) + nbytes(w_proj_p) + nbytes(b_proj_p)
                    + Bp * seq * Cp * 4 + num_layers * Bp * Hp * 4)
    scratch_bytes = (seq * Bp * in_max * 2          # act (bf16)
                     + gi_rows * 3 * Hp * 4         # gi chunk (f32)
                     + 2 * in_max * 3 * Hp * 2      # w_ih ping-pong (bf16)
                     + 2 * Hp * 3 * Hp * 2)         # w_hh ping-pong (bf16)
    vmem_limit = int(min(100 * 1024 * 1024,
                         max(32 * 1024 * 1024,
                             io_bytes + scratch_bytes + (4 << 20))))

    # TODO(synk): pipeline_mode=pl.Buffered(1) on the full-array BlockSpecs
    # would drop the x2 input double-buffering at grid=(1,); left off to keep
    # lowering maximally portable.
    logits, hfin = pl.pallas_call(
        kernel,
        out_shape=(
            jax.ShapeDtypeStruct((Bp, seq * Cp), jnp.float32),
            jax.ShapeDtypeStruct((num_layers, Bp, Hp), jnp.float32),
        ),
        grid_spec=pltpu.PrefetchScalarGridSpec(
            num_scalar_prefetch=0,
            grid=(1,),
            in_specs=[
                _full_spec(emb_p.shape),              # embeddings (VMEM)
                _full_spec(h0_p.shape),               # h0 (VMEM)
                pl.BlockSpec(memory_space=pl.ANY),    # W_ih stack (HBM, streamed)
                pl.BlockSpec(memory_space=pl.ANY),    # W_hh stack (HBM, streamed)
                _full_spec(b_ih_all.shape),           # folded b_ih (VMEM)
                _full_spec(b_hn_all.shape),           # b_hn (VMEM)
                _full_spec(w_proj_p.shape),           # W_proj (VMEM)
                _full_spec(b_proj_p.shape),           # b_proj (VMEM)
            ],
            out_specs=(
                _full_spec((Bp, seq * Cp)),
                _full_spec((num_layers, Bp, Hp)),
            ),
            scratch_shapes=[
                pltpu.VMEM((seq * Bp, in_max), jnp.bfloat16),    # inter-layer act
                pltpu.VMEM((gi_rows, 3 * Hp), jnp.float32),      # gi (per chunk)
                pltpu.VMEM((2, in_max, 3 * Hp), jnp.bfloat16),   # W_ih ping-pong
                pltpu.VMEM((2, Hp, 3 * Hp), jnp.bfloat16),       # W_hh ping-pong
                pltpu.SemaphoreType.DMA((2, 2)),                 # [which, slot]
            ],
        ),
        compiler_params=pltpu.CompilerParams(
            dimension_semantics=("arbitrary",),
            vmem_limit_bytes=vmem_limit),
    )(emb_p, h0_p, w_ih_all, w_hh_all, b_ih_all, b_hn_all, w_proj_p, b_proj_p)
    return logits, hfin


# ----------------------------------------------------------------------------
# Parameter init (logical, PyTorch-equivalent layout; weights pre-transposed
# to (in, out) and stored in bf16, biases f32).
# ----------------------------------------------------------------------------
def init_params(key, num_classes, embed_dim, hidden_size, num_layers):
    keys = jax.random.split(key, 3 + 4 * num_layers)
    k = 1.0 / float(hidden_size) ** 0.5
    params = {
        "num_classes": num_classes,
        "embed_dim": embed_dim,
        "hidden_size": hidden_size,
        "num_layers": num_layers,
        "embedding": jax.random.normal(
            keys[0], (num_classes, embed_dim), jnp.float32).astype(jnp.bfloat16),
        "w_proj_t": jax.random.uniform(
            keys[1], (hidden_size, num_classes), jnp.float32, -k, k
        ).astype(jnp.bfloat16),
        "b_proj": jax.random.uniform(keys[2], (1, num_classes),
                                     jnp.float32, -k, k),
    }
    layers = []
    for l in range(num_layers):
        in_dim = embed_dim if l == 0 else hidden_size
        kw = keys[3 + 4 * l:3 + 4 * (l + 1)]
        layers.append({
            # gate order r, z, n along the output axis
            "w_ih_t": jax.random.uniform(kw[0], (in_dim, 3 * hidden_size),
                                         jnp.float32, -k, k).astype(jnp.bfloat16),
            "w_hh_t": jax.random.uniform(kw[1], (hidden_size, 3 * hidden_size),
                                         jnp.float32, -k, k).astype(jnp.bfloat16),
            "b_ih": jax.random.uniform(kw[2], (1, 3 * hidden_size),
                                       jnp.float32, -k, k),
            "b_hh": jax.random.uniform(kw[3], (1, 3 * hidden_size),
                                       jnp.float32, -k, k),
        })
    params["gru_layers"] = layers
    return params


# ----------------------------------------------------------------------------
# One-time padding/layout/folding of the parameters for the kernel.
# Zero padding keeps the math on the real rows/columns exact; each gate block
# is re-based so it starts at a 128-aligned lane offset (0, Hp, 2*Hp).
# Per-layer weights are stacked so the kernel can stream them from HBM.
# ----------------------------------------------------------------------------
def prepare_kernel_params(params):
    C = params["num_classes"]
    E = params["embed_dim"]
    H = params["hidden_size"]
    L = params["num_layers"]
    Ep = _round_up(E, 128)
    Hp = _round_up(H, 128)
    Cp = _round_up(C, 128)
    in_max = max(Ep, Hp)   # uniform input width so all layers share one buffer

    def pad2(a, rows, cols):
        return jnp.pad(a, ((0, rows - a.shape[0]), (0, cols - a.shape[1])))

    def pad_gates(w, rows_p):
        # (rows, 3H) -> (rows_p, 3*Hp), each gate 128-lane aligned.
        parts = [pad2(w[:, g * H:(g + 1) * H], rows_p, Hp) for g in range(3)]
        return jnp.concatenate(parts, axis=1)

    w_ih_list, w_hh_list, b_ih_list, b_hn_list = [], [], [], []
    for p in params["gru_layers"]:
        w_ih_list.append(pad_gates(p["w_ih_t"], in_max))
        w_hh_list.append(pad_gates(p["w_hh_t"], Hp))
        # Fold b_hr / b_hz into b_ih (exact for the summed r,z gates).
        # Do NOT fold b_hn: it must stay inside r * (W_hn h + b_hn).
        b_folded = jnp.concatenate(
            [p["b_ih"][:, :2 * H] + p["b_hh"][:, :2 * H],
             p["b_ih"][:, 2 * H:]], axis=1)
        b_ih_list.append(pad_gates(b_folded, 1))
        b_hn_list.append(pad2(p["b_hh"][:, 2 * H:], 1, Hp))

    return {
        "num_layers": L,
        "hidden_size": H,
        "num_classes": C,
        "Hp": Hp, "Cp": Cp, "in_max": in_max,
        "embedding": pad2(params["embedding"], C, in_max),   # (C, in_max) bf16
        "w_ih_all": jnp.stack(w_ih_list, axis=0),            # (L, in_max, 3Hp) bf16
        "w_hh_all": jnp.stack(w_hh_list, axis=0),            # (L, Hp, 3Hp)     bf16
        "b_ih_all": jnp.stack(b_ih_list, axis=0),            # (L, 1, 3Hp)      f32
        "b_hn_all": jnp.stack(b_hn_list, axis=0),            # (L, 1, Hp)       f32
        "w_proj_t": pad2(params["w_proj_t"], in_max, Cp),    # (in_max, Cp)     bf16
        "b_proj": pad2(params["b_proj"], 1, Cp),             # (1, Cp)          f32
    }


# ----------------------------------------------------------------------------
# Full CharRNN forward (kernel-facing wrapper).
# ----------------------------------------------------------------------------
def char_rnn_forward(kparams, x, hs=None, *, time_chunk=32):
    batch, seq = x.shape
    L = kparams["num_layers"]
    H = kparams["hidden_size"]
    C = kparams["num_classes"]
    Hp, Cp, in_max = kparams["Hp"], kparams["Cp"], kparams["in_max"]
    # Batch padded to 16: the bf16 activation tile is (16,128), so every
    # per-step store on the serial path is a full unmasked packed tile.
    Bp = _round_up(max(batch, 1), 16)

    # TODO(synk): the nn.Embedding gather (data-dependent row lookup) stays in
    # plain JAX; only the tiny int32 id array is transposed/padded.  For very
    # large embed_dim / seq this could move in-kernel (scalar-prefetch ids +
    # per-row DMA) to avoid one HBM round trip of the layer-0 activation.
    ids = jnp.zeros((seq, Bp), jnp.int32).at[:, :batch].set(x.T)
    emb = jnp.take(kparams["embedding"], ids, axis=0)     # (seq, Bp, in_max) bf16
    emb = emb.reshape(seq * Bp, in_max)

    h0 = jnp.zeros((L, Bp, Hp), jnp.float32)
    if hs is not None:
        h0 = h0.at[:, :batch, :H].set(hs.astype(jnp.float32))

    logits_p, hfin_p = char_rnn_pallas(
        emb, h0, kparams["w_ih_all"], kparams["w_hh_all"],
        kparams["b_ih_all"], kparams["b_hn_all"],
        kparams["w_proj_t"], kparams["b_proj"],
        seq=seq, batch_p=Bp, hidden_p=Hp, classes_p=Cp, num_layers=L,
        time_chunk=time_chunk)

    # (Bp, seq*Cp) is already batch-major; just slice off the padding.
    logits = logits_p.reshape(Bp, seq, Cp)[:batch, :, :C]
    logits = logits.reshape(batch * seq, C)
    h_n = hfin_p[:, :batch, :H]
    return logits, h_n


# ----------------------------------------------------------------------------
# Pure-JAX f32 reference (same math, unpadded, unfolded biases).
# ----------------------------------------------------------------------------
def char_rnn_reference(params, x, hs=None):
    batch, seq = x.shape
    H = params["hidden_size"]
    L = params["num_layers"]
    C = params["num_classes"]
    if hs is None:
        hs = jnp.zeros((L, batch, H), jnp.float32)
    emb = jnp.take(params["embedding"].astype(jnp.float32), x, axis=0)
    layer_in = jnp.transpose(emb, (1, 0, 2))              # (seq, batch, E)
    h_finals = []
    for l in range(L):
        p = params["gru_layers"][l]
        w_ih = p["w_ih_t"].astype(jnp.float32)
        w_hh = p["w_hh_t"].astype(jnp.float32)
        h = hs[l]
        outs = []
        for t in range(seq):
            gi = layer_in[t] @ w_ih + p["b_ih"]
            gh = h @ w_hh + p["b_hh"]
            r = jax.nn.sigmoid(gi[:, :H] + gh[:, :H])
            z = jax.nn.sigmoid(gi[:, H:2 * H] + gh[:, H:2 * H])
            n = jnp.tanh(gi[:, 2 * H:] + r * gh[:, 2 * H:])
            h = (1.0 - z) * n + z * h
            outs.append(h)
        layer_in = jnp.stack(outs, axis=0)
        h_finals.append(h)
    h_n = jnp.stack(h_finals, axis=0)
    logits = (layer_in.reshape(seq * batch, H)
              @ params["w_proj_t"].astype(jnp.float32) + params["b_proj"])
    logits = logits.reshape(seq, batch, C)
    logits = jnp.transpose(logits, (1, 0, 2)).reshape(-1, C)
    return logits, h_n


if __name__ == "__main__":
    num_classes = 16
    embed_dim = 16
    hidden_size = 32
    num_layers = 2
    batch = 2
    seq = 8

    key = jax.random.PRNGKey(0)
    pkey, xkey = jax.random.split(key)
    params = init_params(pkey, num_classes, embed_dim, hidden_size, num_layers)
    kparams = prepare_kernel_params(params)
    x = jax.random.randint(xkey, (batch, seq), 0, num_classes, dtype=jnp.int32)

    logits, h_n = char_rnn_forward(kparams, x)
    jax.block_until_ready((logits, h_n))

    assert logits.shape == (batch * seq, num_classes), logits.shape
    assert h_n.shape == (num_layers, batch, hidden_size), h_n.shape

    # Kernel does bf16 MXU matmuls with f32 accumulation; reference is pure
    # f32, hence the slightly relaxed tolerance.
    ref_logits, ref_h = char_rnn_reference(params, x)
    assert jnp.allclose(logits, ref_logits, rtol=2e-2, atol=2e-2), \
        float(jnp.max(jnp.abs(logits - ref_logits)))
    assert jnp.allclose(h_n, ref_h, rtol=2e-2, atol=2e-2), \
        float(jnp.max(jnp.abs(h_n - ref_h)))

    print("KERNEL_OK")
</pallas_src>

<mosaic_0001>
module attributes {stable_mosaic.version = 11 : i64} {
  func.func @char_rnn_fused_kernel(%arg0: i32, %arg1: memref<128x128xbf16, #tpu.memory_space<vmem>>, %arg2: memref<2x16x128xf32, #tpu.memory_space<vmem>>, %arg3: memref<2x128x384xbf16, #tpu.memory_space<any>>, %arg4: memref<2x128x384xbf16, #tpu.memory_space<any>>, %arg5: memref<2x1x384xf32, #tpu.memory_space<vmem>>, %arg6: memref<2x1x128xf32, #tpu.memory_space<vmem>>, %arg7: memref<128x128xbf16, #tpu.memory_space<vmem>>, %arg8: memref<1x128xf32, #tpu.memory_space<vmem>>, %arg9: memref<16x1024xf32, #tpu.memory_space<vmem>>, %arg10: memref<2x16x128xf32, #tpu.memory_space<vmem>>, %arg11: memref<128x128xbf16, #tpu.memory_space<vmem>>, %arg12: memref<128x384xf32, #tpu.memory_space<vmem>>, %arg13: memref<2x128x384xbf16, #tpu.memory_space<vmem>>, %arg14: memref<2x128x384xbf16, #tpu.memory_space<vmem>>, %arg15: memref<2x2x!tpu.dma_semaphore, #tpu.memory_space<semaphore_mem>>) attributes {dimension_semantics = [#tpu.dimension_semantics<arbitrary>], iteration_bounds = array<i64: 1>, scalar_prefetch = 0 : i64, scratch_operands = 5 : i64, tpu.core_type = #tpu.core_type<tc>, window_params = [{pipeline_mode = #tpu.pipeline_mode<synchronous>, transform_indices = @transform_0, window_bounds = array<i64: 128, 128>}, {pipeline_mode = #tpu.pipeline_mode<synchronous>, transform_indices = @transform_1, window_bounds = array<i64: 2, 16, 128>}, {}, {}, {pipeline_mode = #tpu.pipeline_mode<synchronous>, transform_indices = @transform_4, window_bounds = array<i64: 2, 1, 384>}, {pipeline_mode = #tpu.pipeline_mode<synchronous>, transform_indices = @transform_5, window_bounds = array<i64: 2, 1, 128>}, {pipeline_mode = #tpu.pipeline_mode<synchronous>, transform_indices = @transform_6, window_bounds = array<i64: 128, 128>}, {pipeline_mode = #tpu.pipeline_mode<synchronous>, transform_indices = @transform_7, window_bounds = array<i64: 1, 128>}, {pipeline_mode = #tpu.pipeline_mode<synchronous>, transform_indices = @transform_8, window_bounds = array<i64: 16, 1024>}, {pipeline_mode = #tpu.pipeline_mode<synchronous>, transform_indices = @transform_9, window_bounds = array<i64: 2, 16, 128>}]} {
    %c0_i32 = arith.constant 0 : i32
    %c0_i32_0 = arith.constant 0 : i32
    %c0_i32_1 = arith.constant 0 : i32
    %c0_i32_2 = arith.constant 0 : i32
    %c0_i32_3 = arith.constant 0 : i32
    %c0_i32_4 = arith.constant 0 : i32
    %0 = tpu.memref_slice %arg3[%c0_i32, %c0_i32_3, %c0_i32_4] : memref<2x128x384xbf16, #tpu.memory_space<any>> -> memref<1x128x384xbf16, #tpu.memory_space<any>>
    %1 = tpu.memref_squeeze %0 : memref<1x128x384xbf16, #tpu.memory_space<any>> -> memref<128x384xbf16, #tpu.memory_space<any>>
    %c0_i32_5 = arith.constant 0 : i32
    %c0_i32_6 = arith.constant 0 : i32
    %2 = tpu.memref_slice %arg13[%c0_i32_0, %c0_i32_5, %c0_i32_6] : memref<2x128x384xbf16, #tpu.memory_space<vmem>> -> memref<1x128x384xbf16, #tpu.memory_space<vmem>>
    %3 = tpu.memref_squeeze %2 : memref<1x128x384xbf16, #tpu.memory_space<vmem>> -> memref<128x384xbf16, #tpu.memory_space<vmem>>
    %4 = tpu.memref_slice %arg15[%c0_i32_1, %c0_i32_2] : memref<2x2x!tpu.dma_semaphore, #tpu.memory_space<semaphore_mem>> -> memref<1x1x!tpu.dma_semaphore, #tpu.memory_space<semaphore_mem>>
    %5 = tpu.memref_squeeze %4 : memref<1x1x!tpu.dma_semaphore, #tpu.memory_space<semaphore_mem>> -> memref<!tpu.dma_semaphore, #tpu.memory_space<semaphore_mem>>
    tpu.enqueue_dma source(%1 : memref<128x384xbf16, #tpu.memory_space<any>>) target(%3 : memref<128x384xbf16, #tpu.memory_space<vmem>>) target_semaphore(%5 : memref<!tpu.dma_semaphore, #tpu.memory_space<semaphore_mem>>)
    %c0_i32_7 = arith.constant 0 : i32
    %c0_i32_8 = arith.constant 0 : i32
    %c1_i32 = arith.constant 1 : i32
    %c0_i32_9 = arith.constant 0 : i32
    %c0_i32_10 = arith.constant 0 : i32
    %c0_i32_11 = arith.constant 0 : i32
    %6 = tpu.memref_slice %arg4[%c0_i32_7, %c0_i32_10, %c0_i32_11] : memref<2x128x384xbf16, #tpu.memory_space<any>> -> memref<1x128x384xbf16, #tpu.memory_space<any>>
    %7 = tpu.memref_squeeze %6 : memref<1x128x384xbf16, #tpu.memory_space<any>> -> memref<128x384xbf16, #tpu.memory_space<any>>
    %c0_i32_12 = arith.constant 0 : i32
    %c0_i32_13 = arith.constant 0 : i32
    %8 = tpu.memref_slice %arg14[%c0_i32_8, %c0_i32_12, %c0_i32_13] : memref<2x128x384xbf16, #tpu.memory_space<vmem>> -> memref<1x128x384xbf16, #tpu.memory_space<vmem>>
    %9 = tpu.memref_squeeze %8 : memref<1x128x384xbf16, #tpu.memory_space<vmem>> -> memref<128x384xbf16, #tpu.memory_space<vmem>>
    %10 = tpu.memref_slice %arg15[%c1_i32, %c0_i32_9] : memref<2x2x!tpu.dma_semaphore, #tpu.memory_space<semaphore_mem>> -> memref<1x1x!tpu.dma_semaphore, #tpu.memory_space<semaphore_mem>>
    %11 = tpu.memref_squeeze %10 : memref<1x1x!tpu.dma_semaphore, #tpu.memory_space<semaphore_mem>> -> memref<!tpu.dma_semaphore, #tpu.memory_space<semaphore_mem>>
    tpu.enqueue_dma source(%7 : memref<128x384xbf16, #tpu.memory_space<any>>) target(%9 : memref<128x384xbf16, #tpu.memory_space<vmem>>) target_semaphore(%11 : memref<!tpu.dma_semaphore, #tpu.memory_space<semaphore_mem>>)
    %c0_i32_14 = arith.constant 0 : i32
    %c0_i32_15 = arith.constant 0 : i32
    %c0_i32_16 = arith.constant 0 : i32
    %c0_i32_17 = arith.constant 0 : i32
    %c0_i32_18 = arith.constant 0 : i32
    %c0_i32_19 = arith.constant 0 : i32
    %12 = tpu.memref_slice %arg3[%c0_i32_14, %c0_i32_18, %c0_i32_19] : memref<2x128x384xbf16, #tpu.memory_space<any>> -> memref<1x128x384xbf16, #tpu.memory_space<any>>
    %13 = tpu.memref_squeeze %12 : memref<1x128x384xbf16, #tpu.memory_space<any>> -> memref<128x384xbf16, #tpu.memory_space<any>>
    %c0_i32_20 = arith.constant 0 : i32
    %c0_i32_21 = arith.constant 0 : i32
    %14 = tpu.memref_slice %arg13[%c0_i32_15, %c0_i32_20, %c0_i32_21] : memref<2x128x384xbf16, #tpu.memory_space<vmem>> -> memref<1x128x384xbf16, #tpu.memory_space<vmem>>
    %15 = tpu.memref_squeeze %14 : memref<1x128x384xbf16, #tpu.memory_space<vmem>> -> memref<128x384xbf16, #tpu.memory_space<vmem>>
    %16 = tpu.memref_slice %arg15[%c0_i32_16, %c0_i32_17] : memref<2x2x!tpu.dma_semaphore, #tpu.memory_space<semaphore_mem>> -> memref<1x1x!tpu.dma_semaphore, #tpu.memory_space<semaphore_mem>>
    %17 = tpu.memref_squeeze %16 : memref<1x1x!tpu.dma_semaphore, #tpu.memory_space<semaphore_mem>> -> memref<!tpu.dma_semaphore, #tpu.memory_space<semaphore_mem>>
    tpu.wait_dma2 semaphore(%17 : memref<!tpu.dma_semaphore, #tpu.memory_space<semaphore_mem>>) src(%13 : memref<128x384xbf16, #tpu.memory_space<any>>) dst(%15 : memref<128x384xbf16, #tpu.memory_space<vmem>>)
    %c0_i32_22 = arith.constant 0 : i32
    %c0_i32_23 = arith.constant 0 : i32
    %c1_i32_24 = arith.constant 1 : i32
    %c0_i32_25 = arith.constant 0 : i32
    %c0_i32_26 = arith.constant 0 : i32
    %c0_i32_27 = arith.constant 0 : i32
    %18 = tpu.memref_slice %arg4[%c0_i32_22, %c0_i32_26, %c0_i32_27] : memref<2x128x384xbf16, #tpu.memory_space<any>> -> memref<1x128x384xbf16, #tpu.memory_space<any>>
    %19 = tpu.memref_squeeze %18 : memref<1x128x384xbf16, #tpu.memory_space<any>> -> memref<128x384xbf16, #tpu.memory_space<any>>
    %c0_i32_28 = arith.constant 0 : i32
    %c0_i32_29 = arith.constant 0 : i32
    %20 = tpu.memref_slice %arg14[%c0_i32_23, %c0_i32_28, %c0_i32_29] : memref<2x128x384xbf16, #tpu.memory_space<vmem>> -> memref<1x128x384xbf16, #tpu.memory_space<vmem>>
    %21 = tpu.memref_squeeze %20 : memref<1x128x384xbf16, #tpu.memory_space<vmem>> -> memref<128x384xbf16, #tpu.memory_space<vmem>>
    %22 = tpu.memref_slice %arg15[%c1_i32_24, %c0_i32_25] : memref<2x2x!tpu.dma_semaphore, #tpu.memory_space<semaphore_mem>> -> memref<1x1x!tpu.dma_semaphore, #tpu.memory_space<semaphore_mem>>
    %23 = tpu.memref_squeeze %22 : memref<1x1x!tpu.dma_semaphore, #tpu.memory_space<semaphore_mem>> -> memref<!tpu.dma_semaphore, #tpu.memory_space<semaphore_mem>>
    tpu.wait_dma2 semaphore(%23 : memref<!tpu.dma_semaphore, #tpu.memory_space<semaphore_mem>>) src(%19 : memref<128x384xbf16, #tpu.memory_space<any>>) dst(%21 : memref<128x384xbf16, #tpu.memory_space<vmem>>)
    %c1_i32_30 = arith.constant 1 : i32
    %c1_i32_31 = arith.constant 1 : i32
    %c0_i32_32 = arith.constant 0 : i32
    %c1_i32_33 = arith.constant 1 : i32
    %c0_i32_34 = arith.constant 0 : i32
    %c0_i32_35 = arith.constant 0 : i32
    %24 = tpu.memref_slice %arg3[%c1_i32_30, %c0_i32_34, %c0_i32_35] : memref<2x128x384xbf16, #tpu.memory_space<any>> -> memref<1x128x384xbf16, #tpu.memory_space<any>>
    %25 = tpu.memref_squeeze %24 : memref<1x128x384xbf16, #tpu.memory_space<any>> -> memref<128x384xbf16, #tpu.memory_space<any>>
    %c0_i32_36 = arith.constant 0 : i32
    %c0_i32_37 = arith.constant 0 : i32
    %26 = tpu.memref_slice %arg13[%c1_i32_31, %c0_i32_36, %c0_i32_37] : memref<2x128x384xbf16, #tpu.memory_space<vmem>> -> memref<1x128x384xbf16, #tpu.memory_space<vmem>>
    %27 = tpu.memref_squeeze %26 : memref<1x128x384xbf16, #tpu.memory_space<vmem>> -> memref<128x384xbf16, #tpu.memory_space<vmem>>
    %28 = tpu.memref_slice %arg15[%c0_i32_32, %c1_i32_33] : memref<2x2x!tpu.dma_semaphore, #tpu.memory_space<semaphore_mem>> -> memref<1x1x!tpu.dma_semaphore, #tpu.memory_space<semaphore_mem>>
    %29 = tpu.memref_squeeze %28 : memref<1x1x!tpu.dma_semaphore, #tpu.memory_space<semaphore_mem>> -> memref<!tpu.dma_semaphore, #tpu.memory_space<semaphore_mem>>
    tpu.enqueue_dma source(%25 : memref<128x384xbf16, #tpu.memory_space<any>>) target(%27 : memref<128x384xbf16, #tpu.memory_space<vmem>>) target_semaphore(%29 : memref<!tpu.dma_semaphore, #tpu.memory_space<semaphore_mem>>)
    %c1_i32_38 = arith.constant 1 : i32
    %c1_i32_39 = arith.constant 1 : i32
    %c1_i32_40 = arith.constant 1 : i32
    %c1_i32_41 = arith.constant 1 : i32
    %c0_i32_42 = arith.constant 0 : i32
    %c0_i32_43 = arith.constant 0 : i32
    %30 = tpu.memref_slice %arg4[%c1_i32_38, %c0_i32_42, %c0_i32_43] : memref<2x128x384xbf16, #tpu.memory_space<any>> -> memref<1x128x384xbf16, #tpu.memory_space<any>>
    %31 = tpu.memref_squeeze %30 : memref<1x128x384xbf16, #tpu.memory_space<any>> -> memref<128x384xbf16, #tpu.memory_space<any>>
    %c0_i32_44 = arith.constant 0 : i32
    %c0_i32_45 = arith.constant 0 : i32
    %32 = tpu.memref_slice %arg14[%c1_i32_39, %c0_i32_44, %c0_i32_45] : memref<2x128x384xbf16, #tpu.memory_space<vmem>> -> memref<1x128x384xbf16, #tpu.memory_space<vmem>>
    %33 = tpu.memref_squeeze %32 : memref<1x128x384xbf16, #tpu.memory_space<vmem>> -> memref<128x384xbf16, #tpu.memory_space<vmem>>
    %34 = tpu.memref_slice %arg15[%c1_i32_40, %c1_i32_41] : memref<2x2x!tpu.dma_semaphore, #tpu.memory_space<semaphore_mem>> -> memref<1x1x!tpu.dma_semaphore, #tpu.memory_space<semaphore_mem>>
    %35 = tpu.memref_squeeze %34 : memref<1x1x!tpu.dma_semaphore, #tpu.memory_space<semaphore_mem>> -> memref<!tpu.dma_semaphore, #tpu.memory_space<semaphore_mem>>
    tpu.enqueue_dma source(%31 : memref<128x384xbf16, #tpu.memory_space<any>>) target(%33 : memref<128x384xbf16, #tpu.memory_space<vmem>>) target_semaphore(%35 : memref<!tpu.dma_semaphore, #tpu.memory_space<semaphore_mem>>)
    %c0 = arith.constant 0 : index
    %c0_46 = arith.constant 0 : index
    %c0_47 = arith.constant 0 : index
    %36 = vector.load %arg5[%c0, %c0_46, %c0_47] : memref<2x1x384xf32, #tpu.memory_space<vmem>>, vector<1x1x384xf32>
    %37 = vector.shape_cast %36 : vector<1x1x384xf32> to vector<1x384xf32>
    %c0_48 = arith.constant 0 : index
    %c0_49 = arith.constant 0 : index
    %c0_50 = arith.constant 0 : index
    %38 = vector.load %arg6[%c0_48, %c0_49, %c0_50] : memref<2x1x128xf32, #tpu.memory_space<vmem>>, vector<1x1x128xf32>
    %39 = vector.shape_cast %38 : vector<1x1x128xf32> to vector<1x128xf32>
    %40 = vector.shape_cast %39 : vector<1x128xf32> to vector<1x128xf32>
    %41 = vector.broadcast %40 : vector<1x128xf32> to vector<16x128xf32>
    %c0_51 = arith.constant 0 : index
    %c0_52 = arith.constant 0 : index
    %c0_53 = arith.constant 0 : index
    %42 = vector.load %arg2[%c0_51, %c0_52, %c0_53] : memref<2x16x128xf32, #tpu.memory_space<vmem>>, vector<1x16x128xf32>
    %43 = vector.shape_cast %42 : vector<1x16x128xf32> to vector<16x128xf32>
    %c0_54 = arith.constant 0 : index
    %c0_55 = arith.constant 0 : index
    %44 = vector.load %arg1[%c0_54, %c0_55] : memref<128x128xbf16, #tpu.memory_space<vmem>>, vector<128x128xbf16>
    %c0_56 = arith.constant 0 : index
    %c0_57 = arith.constant 0 : index
    %c0_58 = arith.constant 0 : index
    %45 = vector.load %arg13[%c0_56, %c0_57, %c0_58] : memref<2x128x384xbf16, #tpu.memory_space<vmem>>, vector<1x128x384xbf16>
    %46 = vector.shape_cast %45 : vector<1x128x384xbf16> to vector<128x384xbf16>
    %cst = arith.constant dense<0.000000e+00> : vector<128x384xf32>
    %47 = tpu.matmul %44, %46, %cst {dimension_numbers = #tpu.dot_dimension_numbers<[1], [0], [0], [1], [0, 0, 1, 1], [], []>} : vector<128x128xbf16>, vector<128x384xbf16>, vector<128x384xf32> -> vector<128x384xf32>
    %48 = vector.broadcast %37 : vector<1x384xf32> to vector<128x384xf32>
    %49 = arith.addf %47, %48 : vector<128x384xf32>
    %c0_59 = arith.constant 0 : index
    %c0_60 = arith.constant 0 : index
    %50 = vector.load %arg12[%c0_59, %c0_60] : memref<128x384xf32, #tpu.memory_space<vmem>>, vector<128x384xf32>
    tpu.vector_store %arg12[%c0_59, %c0_60], %49 {strides = array<i32>} : memref<128x384xf32, #tpu.memory_space<vmem>>, vector<128x384xf32>,
    %c0_61 = arith.constant 0 : index
    %c0_62 = arith.constant 0 : index
    %51 = vector.load %arg12[%c0_61, %c0_62] : memref<128x384xf32, #tpu.memory_space<vmem>>, vector<16x384xf32>
    %52 = arith.truncf %43 : vector<16x128xf32> to vector<16x128xbf16>
    %c0_63 = arith.constant 0 : index
    %c0_64 = arith.constant 0 : index
    %c0_65 = arith.constant 0 : index
    %53 = vector.load %arg14[%c0_63, %c0_64, %c0_65] : memref<2x128x384xbf16, #tpu.memory_space<vmem>>, vector<1x128x384xbf16>
    %54 = vector.shape_cast %53 : vector<1x128x384xbf16> to vector<128x384xbf16>
    %cst_66 = arith.constant dense<0.000000e+00> : vector<16x384xf32>
    %55 = tpu.matmul %52, %54, %cst_66 {dimension_numbers = #tpu.dot_dimension_numbers<[1], [0], [0], [1], [0, 0, 1, 1], [], []>} : vector<16x128xbf16>, vector<128x384xbf16>, vector<16x384xf32> -> vector<16x384xf32>
    %56 = vector.extract_strided_slice %51 {offsets = [0, 0], sizes = [16, 128], strides = [1, 1]} : vector<16x384xf32> to vector<16x128xf32>
    %57 = vector.extract_strided_slice %55 {offsets = [0, 0], sizes = [16, 128], strides = [1, 1]} : vector<16x384xf32> to vector<16x128xf32>
    %58 = arith.addf %56, %57 : vector<16x128xf32>
    %59 = arith.negf %58 : vector<16x128xf32>
    %60 = math.exp %59 : vector<16x128xf32>
    %cst_67 = arith.constant 1.000000e+00 : f32
    %61 = vector.broadcast %cst_67 : f32 to vector<16x128xf32>
    %62 = arith.addf %61, %60 : vector<16x128xf32>
    %63 = arith.divf %61, %62 : vector<16x128xf32>
    %64 = vector.extract_strided_slice %51 {offsets = [0, 128], sizes = [16, 128], strides = [1, 1]} : vector<16x384xf32> to vector<16x128xf32>
    %65 = vector.extract_strided_slice %55 {offsets = [0, 128], sizes = [16, 128], strides = [1, 1]} : vector<16x384xf32> to vector<16x128xf32>
    %66 = arith.addf %64, %65 : vector<16x128xf32>
    %67 = arith.negf %66 : vector<16x128xf32>
    %68 = math.exp %67 : vector<16x128xf32>
    %cst_68 = arith.constant 1.000000e+00 : f32
    %69 = vector.broadcast %cst_68 : f32 to vector<16x128xf32>
    %70 = arith.addf %69, %68 : vector<16x128xf32>
    %71 = arith.divf %69, %70 : vector<16x128xf32>
    %72 = vector.extract_strided_slice %51 {offsets = [0, 256], sizes = [16, 128], strides = [1, 1]} : vector<16x384xf32> to vector<16x128xf32>
    %73 = vector.extract_strided_slice %55 {offsets = [0, 256], sizes = [16, 128], strides = [1, 1]} : vector<16x384xf32> to vector<16x128xf32>
    %74 = arith.addf %73, %41 : vector<16x128xf32>
    %75 = arith.mulf %63, %74 : vector<16x128xf32>
    %76 = arith.addf %72, %75 : vector<16x128xf32>
    %77 = math.tanh %76 : vector<16x128xf32>
    %78 = arith.subf %43, %77 : vector<16x128xf32>
    %79 = arith.mulf %71, %78 : vector<16x128xf32>
    %80 = arith.addf %77, %79 : vector<16x128xf32>
    %81 = arith.truncf %80 : vector<16x128xf32> to vector<16x128xbf16>
    %c0_69 = arith.constant 0 : index
    %c0_70 = arith.constant 0 : index
    %82 = vector.load %arg11[%c0_69, %c0_70] : memref<128x128xbf16, #tpu.memory_space<vmem>>, vector<16x128xbf16>
    tpu.vector_store %arg11[%c0_69, %c0_70], %81 {strides = array<i32>} : memref<128x128xbf16, #tpu.memory_space<vmem>>, vector<16x128xbf16>,
    %c16 = arith.constant 16 : index
    %c0_71 = arith.constant 0 : index
    %83 = vector.load %arg12[%c16, %c0_71] : memref<128x384xf32, #tpu.memory_space<vmem>>, vector<16x384xf32>
    %84 = arith.truncf %80 : vector<16x128xf32> to vector<16x128xbf16>
    %c0_72 = arith.constant 0 : index
    %c0_73 = arith.constant 0 : index
    %c0_74 = arith.constant 0 : index
    %85 = vector.load %arg14[%c0_72, %c0_73, %c0_74] : memref<2x128x384xbf16, #tpu.memory_space<vmem>>, vector<1x128x384xbf16>
    %86 = vector.shape_cast %85 : vector<1x128x384xbf16> to vector<128x384xbf16>
    %cst_75 = arith.constant dense<0.000000e+00> : vector<16x384xf32>
    %87 = tpu.matmul %84, %86, %cst_75 {dimension_numbers = #tpu.dot_dimension_numbers<[1], [0], [0], [1], [0, 0, 1, 1], [], []>} : vector<16x128xbf16>, vector<128x384xbf16>, vector<16x384xf32> -> vector<16x384xf32>
    %88 = vector.extract_strided_slice %83 {offsets = [0, 0], sizes = [16, 128], strides = [1, 1]} : vector<16x384xf32> to vector<16x128xf32>
    %89 = vector.extract_strided_slice %87 {offsets = [0, 0], sizes = [16, 128], strides = [1, 1]} : vector<16x384xf32> to vector<16x128xf32>
    %90 = arith.addf %88, %89 : vector<16x128xf32>
    %91 = arith.negf %90 : vector<16x128xf32>
    %92 = math.exp %91 : vector<16x128xf32>
    %cst_76 = arith.constant 1.000000e+00 : f32
    %93 = vector.broadcast %cst_76 : f32 to vector<16x128xf32>
    %94 = arith.addf %93, %92 : vector<16x128xf32>
    %95 = arith.divf %93, %94 : vector<16x128xf32>
    %96 = vector.extract_strided_slice %83 {offsets = [0, 128], sizes = [16, 128], strides = [1, 1]} : vector<16x384xf32> to vector<16x128xf32>
    %97 = vector.extract_strided_slice %87 {offsets = [0, 128], sizes = [16, 128], strides = [1, 1]} : vector<16x384xf32> to vector<16x128xf32>
    %98 = arith.addf %96, %97 : vector<16x128xf32>
    %99 = arith.negf %98 : vector<16x128xf32>
    %100 = math.exp %99 : vector<16x128xf32>
    %cst_77 = arith.constant 1.000000e+00 : f32
    %101 = vector.broadcast %cst_77 : f32 to vector<16x128xf32>
    %102 = arith.addf %101, %100 : vector<16x128xf32>
    %103 = arith.divf %101, %102 : vector<16x128xf32>
    %104 = vector.extract_strided_slice %83 {offsets = [0, 256], sizes = [16, 128], strides = [1, 1]} : vector<16x384xf32> to vector<16x128xf32>
    %105 = vector.extract_strided_slice %87 {offsets = [0, 256], sizes = [16, 128], strides = [1, 1]} : vector<16x384xf32> to vector<16x128xf32>
    %106 = arith.addf %105, %41 : vector<16x128xf32>
    %107 = arith.mulf %95, %106 : vector<16x128xf32>
    %108 = arith.addf %104, %107 : vector<16x128xf32>
    %109 = math.tanh %108 : vector<16x128xf32>
    %110 = arith.subf %80, %109 : vector<16x128xf32>
    %111 = arith.mulf %103, %110 : vector<16x128xf32>
    %112 = arith.addf %109, %111 : vector<16x128xf32>
    %113 = arith.truncf %112 : vector<16x128xf32> to vector<16x128xbf16>
    %c16_78 = arith.constant 16 : index
    %c0_79 = arith.constant 0 : index
    %114 = vector.load %arg11[%c16_78, %c0_79] : memref<128x128xbf16, #tpu.memory_space<vmem>>, vector<16x128xbf16>
    tpu.vector_store %arg11[%c16_78, %c0_79], %113 {strides = array<i32>} : memref<128x128xbf16, #tpu.memory_space<vmem>>, vector<16x128xbf16>,
    %c32 = arith.constant 32 : index
    %c0_80 = arith.constant 0 : index
    %115 = vector.load %arg12[%c32, %c0_80] : memref<128x384xf32, #tpu.memory_space<vmem>>, vector<16x384xf32>
    %116 = arith.truncf %112 : vector<16x128xf32> to vector<16x128xbf16>
    %c0_81 = arith.constant 0 : index
    %c0_82 = arith.constant 0 : index
    %c0_83 = arith.constant 0 : index
    %117 = vector.load %arg14[%c0_81, %c0_82, %c0_83] : memref<2x128x384xbf16, #tpu.memory_space<vmem>>, vector<1x128x384xbf16>
    %118 = vector.shape_cast %117 : vector<1x128x384xbf16> to vector<128x384xbf16>
    %cst_84 = arith.constant dense<0.000000e+00> : vector<16x384xf32>
    %119 = tpu.matmul %116, %118, %cst_84 {dimension_numbers = #tpu.dot_dimension_numbers<[1], [0], [0], [1], [0, 0, 1, 1], [], []>} : vector<16x128xbf16>, vector<128x384xbf16>, vector<16x384xf32> -> vector<16x384xf32>
    %120 = vector.extract_strided_slice %115 {offsets = [0, 0], sizes = [16, 128], strides = [1, 1]} : vector<16x384xf32> to vector<16x128xf32>
    %121 = vector.extract_strided_slice %119 {offsets = [0, 0], sizes = [16, 128], strides = [1, 1]} : vector<16x384xf32> to vector<16x128xf32>
    %122 = arith.addf %120, %121 : vector<16x128xf32>
    %123 = arith.negf %122 : vector<16x128xf32>
    %124 = math.exp %123 : vector<16x128xf32>
    %cst_85 = arith.constant 1.000000e+00 : f32
    %125 = vector.broadcast %cst_85 : f32 to vector<16x128xf32>
    %126 = arith.addf %125, %124 : vector<16x128xf32>
    %127 = arith.divf %125, %126 : vector<16x128xf32>
    %128 = vector.extract_strided_slice %115 {offsets = [0, 128], sizes = [16, 128], strides = [1, 1]} : vector<16x384xf32> to vector<16x128xf32>
    %129 = vector.extract_strided_slice %119 {offsets = [0, 128], sizes = [16, 128], strides = [1, 1]} : vector<16x384xf32> to vector<16x128xf32>
    %130 = arith.addf %128, %129 : vector<16x128xf32>
    %131 = arith.negf %130 : vector<16x128xf32>
    %132 = math.exp %131 : vector<16x128xf32>
    %cst_86 = arith.constant 1.000000e+00 : f32
    %133 = vector.broadcast %cst_86 : f32 to vector<16x128xf32>
    %134 = arith.addf %133, %132 : vector<16x128xf32>
    %135 = arith.divf %133, %134 : vector<16x128xf32>
    %136 = vector.extract_strided_slice %115 {offsets = [0, 256], sizes = [16, 128], strides = [1, 1]} : vector<16x384xf32> to vector<16x128xf32>
    %137 = vector.extract_strided_slice %119 {offsets = [0, 256], sizes = [16, 128], strides = [1, 1]} : vector<16x384xf32> to vector<16x128xf32>
    %138 = arith.addf %137, %41 : vector<16x128xf32>
    %139 = arith.mulf %127, %138 : vector<16x128xf32>
    %140 = arith.addf %136, %139 : vector<16x128xf32>
    %141 = math.tanh %140 : vector<16x128xf32>
    %142 = arith.subf %112, %141 : vector<16x128xf32>
    %143 = arith.mulf %135, %142 : vector<16x128xf32>
    %144 = arith.addf %141, %143 : vector<16x128xf32>
    %145 = arith.truncf %144 : vector<16x128xf32> to vector<16x128xbf16>
    %c32_87 = arith.constant 32 : index
    %c0_88 = arith.constant 0 : index
    %146 = vector.load %arg11[%c32_87, %c0_88] : memref<128x128xbf16, #tpu.memory_space<vmem>>, vector<16x128xbf16>
    tpu.vector_store %arg11[%c32_87, %c0_88], %145 {strides = array<i32>} : memref<128x128xbf16, #tpu.memory_space<vmem>>, vector<16x128xbf16>,
    %c48 = arith.constant 48 : index
    %c0_89 = arith.constant 0 : index
    %147 = vector.load %arg12[%c48, %c0_89] : memref<128x384xf32, #tpu.memory_space<vmem>>, vector<16x384xf32>
    %148 = arith.truncf %144 : vector<16x128xf32> to vector<16x128xbf16>
    %c0_90 = arith.constant 0 : index
    %c0_91 = arith.constant 0 : index
    %c0_92 = arith.constant 0 : index
    %149 = vector.load %arg14[%c0_90, %c0_91, %c0_92] : memref<2x128x384xbf16, #tpu.memory_space<vmem>>, vector<1x128x384xbf16>
    %150 = vector.shape_cast %149 : vector<1x128x384xbf16> to vector<128x384xbf16>
    %cst_93 = arith.constant dense<0.000000e+00> : vector<16x384xf32>
    %151 = tpu.matmul %148, %150, %cst_93 {dimension_numbers = #tpu.dot_dimension_numbers<[1], [0], [0], [1], [0, 0, 1, 1], [], []>} : vector<16x128xbf16>, vector<128x384xbf16>, vector<16x384xf32> -> vector<16x384xf32>
    %152 = vector.extract_strided_slice %147 {offsets = [0, 0], sizes = [16, 128], strides = [1, 1]} : vector<16x384xf32> to vector<16x128xf32>
    %153 = vector.extract_strided_slice %151 {offsets = [0, 0], sizes = [16, 128], strides = [1, 1]} : vector<16x384xf32> to vector<16x128xf32>
    %154 = arith.addf %152, %153 : vector<16x128xf32>
    %155 = arith.negf %154 : vector<16x128xf32>
    %156 = math.exp %155 : vector<16x128xf32>
    %cst_94 = arith.constant 1.000000e+00 : f32
    %157 = vector.broadcast %cst_94 : f32 to vector<16x128xf32>
    %158 = arith.addf %157, %156 : vector<16x128xf32>
    %159 = arith.divf %157, %158 : vector<16x128xf32>
    %160 = vector.extract_strided_slice %147 {offsets = [0, 128], sizes = [16, 128], strides = [1, 1]} : vector<16x384xf32> to vector<16x128xf32>
    %161 = vector.extract_strided_slice %151 {offsets = [0, 128], sizes = [16, 128], strides = [1, 1]} : vector<16x384xf32> to vector<16x128xf32>
    %162 = arith.addf %160, %161 : vector<16x128xf32>
    %163 = arith.negf %162 : vector<16x128xf32>
    %164 = math.exp %163 : vector<16x128xf32>
    %cst_95 = arith.constant 1.000000e+00 : f32
    %165 = vector.broadcast %cst_95 : f32 to vector<16x128xf32>
    %166 = arith.addf %165, %164 : vector<16x128xf32>
    %167 = arith.divf %165, %166 : vector<16x128xf32>
    %168 = vector.extract_strided_slice %147 {offsets = [0, 256], sizes = [16, 128], strides = [1, 1]} : vector<16x384xf32> to vector<16x128xf32>
    %169 = vector.extract_strided_slice %151 {offsets = [0, 256], sizes = [16, 128], strides = [1, 1]} : vector<16x384xf32> to vector<16x128xf32>
    %170 = arith.addf %169, %41 : vector<16x128xf32>
    %171 = arith.mulf %159, %170 : vector<16x128xf32>
    %172 = arith.addf %168, %171 : vector<16x128xf32>
    %173 = math.tanh %172 : vector<16x128xf32>
    %174 = arith.subf %144, %173 : vector<16x128xf32>
    %175 = arith.mulf %167, %174 : vector<16x128xf32>
    %176 = arith.addf %173, %175 : vector<16x128xf32>
    %177 = arith.truncf %176 : vector<16x128xf32> to vector<16x128xbf16>
    %c48_96 = arith.constant 48 : index
    %c0_97 = arith.constant 0 : index
    %178 = vector.load %arg11[%c48_96, %c0_97] : memref<128x128xbf16, #tpu.memory_space<vmem>>, vector<16x128xbf16>
    tpu.vector_store %arg11[%c48_96, %c0_97], %177 {strides = array<i32>} : memref<128x128xbf16, #tpu.memory_space<vmem>>, vector<16x128xbf16>,
    %c64 = arith.constant 64 : index
    %c0_98 = arith.constant 0 : index
    %179 = vector.load %arg12[%c64, %c0_98] : memref<128x384xf32, #tpu.memory_space<vmem>>, vector<16x384xf32>
    %180 = arith.truncf %176 : vector<16x128xf32> to vector<16x128xbf16>
    %c0_99 = arith.constant 0 : index
    %c0_100 = arith.constant 0 : index
    %c0_101 = arith.constant 0 : index
    %181 = vector.load %arg14[%c0_99, %c0_100, %c0_101] : memref<2x128x384xbf16, #tpu.memory_space<vmem>>, vector<1x128x384xbf16>
    %182 = vector.shape_cast %181 : vector<1x128x384xbf16> to vector<128x384xbf16>
    %cst_102 = arith.constant dense<0.000000e+00> : vector<16x384xf32>
    %183 = tpu.matmul %180, %182, %cst_102 {dimension_numbers = #tpu.dot_dimension_numbers<[1], [0], [0], [1], [0, 0, 1, 1], [], []>} : vector<16x128xbf16>, vector<128x384xbf16>, vector<16x384xf32> -> vector<16x384xf32>
    %184 = vector.extract_strided_slice %179 {offsets = [0, 0], sizes = [16, 128], strides = [1, 1]} : vector<16x384xf32> to vector<16x128xf32>
    %185 = vector.extract_strided_slice %183 {offsets = [0, 0], sizes = [16, 128], strides = [1, 1]} : vector<16x384xf32> to vector<16x128xf32>
    %186 = arith.addf %184, %185 : vector<16x128xf32>
    %187 = arith.negf %186 : vector<16x128xf32>
    %188 = math.exp %187 : vector<16x128xf32>
    %cst_103 = arith.constant 1.000000e+00 : f32
    %189 = vector.broadcast %cst_103 : f32 to vector<16x128xf32>
    %190 = arith.addf %189, %188 : vector<16x128xf32>
    %191 = arith.divf %189, %190 : vector<16x128xf32>
    %192 = vector.extract_strided_slice %179 {offsets = [0, 128], sizes = [16, 128], strides = [1, 1]} : vector<16x384xf32> to vector<16x128xf32>
    %193 = vector.extract_strided_slice %183 {offsets = [0, 128], sizes = [16, 128], strides = [1, 1]} : vector<16x384xf32> to vector<16x128xf32>
    %194 = arith.addf %192, %193 : vector<16x128xf32>
    %195 = arith.negf %194 : vector<16x128xf32>
    %196 = math.exp %195 : vector<16x128xf32>
    %cst_104 = arith.constant 1.000000e+00 : f32
    %197 = vector.broadcast %cst_104 : f32 to vector<16x128xf32>
    %198 = arith.addf %197, %196 : vector<16x128xf32>
    %199 = arith.divf %197, %198 : vector<16x128xf32>
    %200 = vector.extract_strided_slice %179 {offsets = [0, 256], sizes = [16, 128], strides = [1, 1]} : vector<16x384xf32> to vector<16x128xf32>
    %201 = vector.extract_strided_slice %183 {offsets = [0, 256], sizes = [16, 128], strides = [1, 1]} : vector<16x384xf32> to vector<16x128xf32>
    %202 = arith.addf %201, %41 : vector<16x128xf32>
    %203 = arith.mulf %191, %202 : vector<16x128xf32>
    %204 = arith.addf %200, %203 : vector<16x128xf32>
    %205 = math.tanh %204 : vector<16x128xf32>
    %206 = arith.subf %176, %205 : vector<16x128xf32>
    %207 = arith.mulf %199, %206 : vector<16x128xf32>
    %208 = arith.addf %205, %207 : vector<16x128xf32>
    %209 = arith.truncf %208 : vector<16x128xf32> to vector<16x128xbf16>
    %c64_105 = arith.constant 64 : index
    %c0_106 = arith.constant 0 : index
    %210 = vector.load %arg11[%c64_105, %c0_106] : memref<128x128xbf16, #tpu.memory_space<vmem>>, vector<16x128xbf16>
    tpu.vector_store %arg11[%c64_105, %c0_106], %209 {strides = array<i32>} : memref<128x128xbf16, #tpu.memory_space<vmem>>, vector<16x128xbf16>,
    %c80 = arith.constant 80 : index
    %c0_107 = arith.constant 0 : index
    %211 = vector.load %arg12[%c80, %c0_107] : memref<128x384xf32, #tpu.memory_space<vmem>>, vector<16x384xf32>
    %212 = arith.truncf %208 : vector<16x128xf32> to vector<16x128xbf16>
    %c0_108 = arith.constant 0 : index
    %c0_109 = arith.constant 0 : index
    %c0_110 = arith.constant 0 : index
    %213 = vector.load %arg14[%c0_108, %c0_109, %c0_110] : memref<2x128x384xbf16, #tpu.memory_space<vmem>>, vector<1x128x384xbf16>
    %214 = vector.shape_cast %213 : vector<1x128x384xbf16> to vector<128x384xbf16>
    %cst_111 = arith.constant dense<0.000000e+00> : vector<16x384xf32>
    %215 = tpu.matmul %212, %214, %cst_111 {dimension_numbers = #tpu.dot_dimension_numbers<[1], [0], [0], [1], [0, 0, 1, 1], [], []>} : vector<16x128xbf16>, vector<128x384xbf16>, vector<16x384xf32> -> vector<16x384xf32>
    %216 = vector.extract_strided_slice %211 {offsets = [0, 0], sizes = [16, 128], strides = [1, 1]} : vector<16x384xf32> to vector<16x128xf32>
    %217 = vector.extract_strided_slice %215 {offsets = [0, 0], sizes = [16, 128], strides = [1, 1]} : vector<16x384xf32> to vector<16x128xf32>
    %218 = arith.addf %216, %217 : vector<16x128xf32>
    %219 = arith.negf %218 : vector<16x128xf32>
    %220 = math.exp %219 : vector<16x128xf32>
    %cst_112 = arith.constant 1.000000e+00 : f32
    %221 = vector.broadcast %cst_112 : f32 to vector<16x128xf32>
    %222 = arith.addf %221, %220 : vector<16x128xf32>
    %223 = arith.divf %221, %222 : vector<16x128xf32>
    %224 = vector.extract_strided_slice %211 {offsets = [0, 128], sizes = [16, 128], strides = [1, 1]} : vector<16x384xf32> to vector<16x128xf32>
    %225 = vector.extract_strided_slice %215 {offsets = [0, 128], sizes = [16, 128], strides = [1, 1]} : vector<16x384xf32> to vector<16x128xf32>
    %226 = arith.addf %224, %225 : vector<16x128xf32>
    %227 = arith.negf %226 : vector<16x128xf32>
    %228 = math.exp %227 : vector<16x128xf32>
    %cst_113 = arith.constant 1.000000e+00 : f32
    %229 = vector.broadcast %cst_113 : f32 to vector<16x128xf32>
    %230 = arith.addf %229, %228 : vector<16x128xf32>
    %231 = arith.divf %229, %230 : vector<16x128xf32>
    %232 = vector.extract_strided_slice %211 {offsets = [0, 256], sizes = [16, 128], strides = [1, 1]} : vector<16x384xf32> to vector<16x128xf32>
    %233 = vector.extract_strided_slice %215 {offsets = [0, 256], sizes = [16, 128], strides = [1, 1]} : vector<16x384xf32> to vector<16x128xf32>
    %234 = arith.addf %233, %41 : vector<16x128xf32>
    %235 = arith.mulf %223, %234 : vector<16x128xf32>
    %236 = arith.addf %232, %235 : vector<16x128xf32>
    %237 = math.tanh %236 : vector<16x128xf32>
    %238 = arith.subf %208, %237 : vector<16x128xf32>
    %239 = arith.mulf %231, %238 : vector<16x128xf32>
    %240 = arith.addf %237, %239 : vector<16x128xf32>
    %241 = arith.truncf %240 : vector<16x128xf32> to vector<16x128xbf16>
    %c80_114 = arith.constant 80 : index
    %c0_115 = arith.constant 0 : index
    %242 = vector.load %arg11[%c80_114, %c0_115] : memref<128x128xbf16, #tpu.memory_space<vmem>>, vector<16x128xbf16>
    tpu.vector_store %arg11[%c80_114, %c0_115], %241 {strides = array<i32>} : memref<128x128xbf16, #tpu.memory_space<vmem>>, vector<16x128xbf16>,
    %c96 = arith.constant 96 : index
    %c0_116 = arith.constant 0 : index
    %243 = vector.load %arg12[%c96, %c0_116] : memref<128x384xf32, #tpu.memory_space<vmem>>, vector<16x384xf32>
    %244 = arith.truncf %240 : vector<16x128xf32> to vector<16x128xbf16>
    %c0_117 = arith.constant 0 : index
    %c0_118 = arith.constant 0 : index
    %c0_119 = arith.constant 0 : index
    %245 = vector.load %arg14[%c0_117, %c0_118, %c0_119] : memref<2x128x384xbf16, #tpu.memory_space<vmem>>, vector<1x128x384xbf16>
    %246 = vector.shape_cast %245 : vector<1x128x384xbf16> to vector<128x384xbf16>
    %cst_120 = arith.constant dense<0.000000e+00> : vector<16x384xf32>
    %247 = tpu.matmul %244, %246, %cst_120 {dimension_numbers = #tpu.dot_dimension_numbers<[1], [0], [0], [1], [0, 0, 1, 1], [], []>} : vector<16x128xbf16>, vector<128x384xbf16>, vector<16x384xf32> -> vector<16x384xf32>
    %248 = vector.extract_strided_slice %243 {offsets = [0, 0], sizes = [16, 128], strides = [1, 1]} : vector<16x384xf32> to vector<16x128xf32>
    %249 = vector.extract_strided_slice %247 {offsets = [0, 0], sizes = [16, 128], strides = [1, 1]} : vector<16x384xf32> to vector<16x128xf32>
    %250 = arith.addf %248, %249 : vector<16x128xf32>
    %251 = arith.negf %250 : vector<16x128xf32>
    %252 = math.exp %251 : vector<16x128xf32>
    %cst_121 = arith.constant 1.000000e+00 : f32
    %253 = vector.broadcast %cst_121 : f32 to vector<16x128xf32>
    %254 = arith.addf %253, %252 : vector<16x128xf32>
    %255 = arith.divf %253, %254 : vector<16x128xf32>
    %256 = vector.extract_strided_slice %243 {offsets = [0, 128], sizes = [16, 128], strides = [1, 1]} : vector<16x384xf32> to vector<16x128xf32>
    %257 = vector.extract_strided_slice %247 {offsets = [0, 128], sizes = [16, 128], strides = [1, 1]} : vector<16x384xf32> to vector<16x128xf32>
    %258 = arith.addf %256, %257 : vector<16x128xf32>
    %259 = arith.negf %258 : vector<16x128xf32>
    %260 = math.exp %259 : vector<16x128xf32>
    %cst_122 = arith.constant 1.000000e+00 : f32
    %261 = vector.broadcast %cst_122 : f32 to vector<16x128xf32>
    %262 = arith.addf %261, %260 : vector<16x128xf32>
    %263 = arith.divf %261, %262 : vector<16x128xf32>
    %264 = vector.extract_strided_slice %243 {offsets = [0, 256], sizes = [16, 128], strides = [1, 1]} : vector<16x384xf32> to vector<16x128xf32>
    %265 = vector.extract_strided_slice %247 {offsets = [0, 256], sizes = [16, 128], strides = [1, 1]} : vector<16x384xf32> to vector<16x128xf32>
    %266 = arith.addf %265, %41 : vector<16x128xf32>
    %267 = arith.mulf %255, %266 : vector<16x128xf32>
    %268 = arith.addf %264, %267 : vector<16x128xf32>
    %269 = math.tanh %268 : vector<16x128xf32>
    %270 = arith.subf %240, %269 : vector<16x128xf32>
    %271 = arith.mulf %263, %270 : vector<16x128xf32>
    %272 = arith.addf %269, %271 : vector<16x128xf32>
    %273 = arith.truncf %272 : vector<16x128xf32> to vector<16x128xbf16>
    %c96_123 = arith.constant 96 : index
    %c0_124 = arith.constant 0 : index
    %274 = vector.load %arg11[%c96_123, %c0_124] : memref<128x128xbf16, #tpu.memory_space<vmem>>, vector<16x128xbf16>
    tpu.vector_store %arg11[%c96_123, %c0_124], %273 {strides = array<i32>} : memref<128x128xbf16, #tpu.memory_space<vmem>>, vector<16x128xbf16>,
    %c112 = arith.constant 112 : index
    %c0_125 = arith.constant 0 : index
    %275 = vector.load %arg12[%c112, %c0_125] : memref<128x384xf32, #tpu.memory_space<vmem>>, vector<16x384xf32>
    %276 = arith.truncf %272 : vector<16x128xf32> to vector<16x128xbf16>
    %c0_126 = arith.constant 0 : index
    %c0_127 = arith.constant 0 : index
    %c0_128 = arith.constant 0 : index
    %277 = vector.load %arg14[%c0_126, %c0_127, %c0_128] : memref<2x128x384xbf16, #tpu.memory_space<vmem>>, vector<1x128x384xbf16>
    %278 = vector.shape_cast %277 : vector<1x128x384xbf16> to vector<128x384xbf16>
    %cst_129 = arith.constant dense<0.000000e+00> : vector<16x384xf32>
    %279 = tpu.matmul %276, %278, %cst_129 {dimension_numbers = #tpu.dot_dimension_numbers<[1], [0], [0], [1], [0, 0, 1, 1], [], []>} : vector<16x128xbf16>, vector<128x384xbf16>, vector<16x384xf32> -> vector<16x384xf32>
    %280 = vector.extract_strided_slice %275 {offsets = [0, 0], sizes = [16, 128], strides = [1, 1]} : vector<16x384xf32> to vector<16x128xf32>
    %281 = vector.extract_strided_slice %279 {offsets = [0, 0], sizes = [16, 128], strides = [1, 1]} : vector<16x384xf32> to vector<16x128xf32>
    %282 = arith.addf %280, %281 : vector<16x128xf32>
    %283 = arith.negf %282 : vector<16x128xf32>
    %284 = math.exp %283 : vector<16x128xf32>
    %cst_130 = arith.constant 1.000000e+00 : f32
    %285 = vector.broadcast %cst_130 : f32 to vector<16x128xf32>
    %286 = arith.addf %285, %284 : vector<16x128xf32>
    %287 = arith.divf %285, %286 : vector<16x128xf32>
    %288 = vector.extract_strided_slice %275 {offsets = [0, 128], sizes = [16, 128], strides = [1, 1]} : vector<16x384xf32> to vector<16x128xf32>
    %289 = vector.extract_strided_slice %279 {offsets = [0, 128], sizes = [16, 128], strides = [1, 1]} : vector<16x384xf32> to vector<16x128xf32>
    %290 = arith.addf %288, %289 : vector<16x128xf32>
    %291 = arith.negf %290 : vector<16x128xf32>
    %292 = math.exp %291 : vector<16x128xf32>
    %cst_131 = arith.constant 1.000000e+00 : f32
    %293 = vector.broadcast %cst_131 : f32 to vector<16x128xf32>
    %294 = arith.addf %293, %292 : vector<16x128xf32>
    %295 = arith.divf %293, %294 : vector<16x128xf32>
    %296 = vector.extract_strided_slice %275 {offsets = [0, 256], sizes = [16, 128], strides = [1, 1]} : vector<16x384xf32> to vector<16x128xf32>
    %297 = vector.extract_strided_slice %279 {offsets = [0, 256], sizes = [16, 128], strides = [1, 1]} : vector<16x384xf32> to vector<16x128xf32>
    %298 = arith.addf %297, %41 : vector<16x128xf32>
    %299 = arith.mulf %287, %298 : vector<16x128xf32>
    %300 = arith.addf %296, %299 : vector<16x128xf32>
    %301 = math.tanh %300 : vector<16x128xf32>
    %302 = arith.subf %272, %301 : vector<16x128xf32>
    %303 = arith.mulf %295, %302 : vector<16x128xf32>
    %304 = arith.addf %301, %303 : vector<16x128xf32>
    %305 = arith.truncf %304 : vector<16x128xf32> to vector<16x128xbf16>
    %c112_132 = arith.constant 112 : index
    %c0_133 = arith.constant 0 : index
    %306 = vector.load %arg11[%c112_132, %c0_133] : memref<128x128xbf16, #tpu.memory_space<vmem>>, vector<16x128xbf16>
    tpu.vector_store %arg11[%c112_132, %c0_133], %305 {strides = array<i32>} : memref<128x128xbf16, #tpu.memory_space<vmem>>, vector<16x128xbf16>,
    %c0_134 = arith.constant 0 : index
    %c0_135 = arith.constant 0 : index
    %c0_136 = arith.constant 0 : index
    %307 = vector.load %arg10[%c0_134, %c0_135, %c0_136] : memref<2x16x128xf32, #tpu.memory_space<vmem>>, vector<1x16x128xf32>
    %308 = vector.shape_cast %307 : vector<1x16x128xf32> to vector<16x128xf32>
    %309 = vector.shape_cast %304 : vector<16x128xf32> to vector<1x16x128xf32>
    tpu.vector_store %arg10[%c0_134, %c0_135, %c0_136], %309 {strides = array<i32>} : memref<2x16x128xf32, #tpu.memory_space<vmem>>, vector<1x16x128xf32>,
    %c1_i32_137 = arith.constant 1 : i32
    %c1_i32_138 = arith.constant 1 : i32
    %c0_i32_139 = arith.constant 0 : i32
    %c1_i32_140 = arith.constant 1 : i32
    %c0_i32_141 = arith.constant 0 : i32
    %c0_i32_142 = arith.constant 0 : i32
    %310 = tpu.memref_slice %arg3[%c1_i32_137, %c0_i32_141, %c0_i32_142] : memref<2x128x384xbf16, #tpu.memory_space<any>> -> memref<1x128x384xbf16, #tpu.memory_space<any>>
    %311 = tpu.memref_squeeze %310 : memref<1x128x384xbf16, #tpu.memory_space<any>> -> memref<128x384xbf16, #tpu.memory_space<any>>
    %c0_i32_143 = arith.constant 0 : i32
    %c0_i32_144 = arith.constant 0 : i32
    %312 = tpu.memref_slice %arg13[%c1_i32_138, %c0_i32_143, %c0_i32_144] : memref<2x128x384xbf16, #tpu.memory_space<vmem>> -> memref<1x128x384xbf16, #tpu.memory_space<vmem>>
    %313 = tpu.memref_squeeze %312 : memref<1x128x384xbf16, #tpu.memory_space<vmem>> -> memref<128x384xbf16, #tpu.memory_space<vmem>>
    %314 = tpu.memref_slice %arg15[%c0_i32_139, %c1_i32_140] : memref<2x2x!tpu.dma_semaphore, #tpu.memory_space<semaphore_mem>> -> memref<1x1x!tpu.dma_semaphore, #tpu.memory_space<semaphore_mem>>
    %315 = tpu.memref_squeeze %314 : memref<1x1x!tpu.dma_semaphore, #tpu.memory_space<semaphore_mem>> -> memref<!tpu.dma_semaphore, #tpu.memory_space<semaphore_mem>>
    tpu.wait_dma2 semaphore(%315 : memref<!tpu.dma_semaphore, #tpu.memory_space<semaphore_mem>>) src(%311 : memref<128x384xbf16, #tpu.memory_space<any>>) dst(%313 : memref<128x384xbf16, #tpu.memory_space<vmem>>)
    %c1_i32_145 = arith.constant 1 : i32
    %c1_i32_146 = arith.constant 1 : i32
    %c1_i32_147 = arith.constant 1 : i32
    %c1_i32_148 = arith.constant 1 : i32
    %c0_i32_149 = arith.constant 0 : i32
    %c0_i32_150 = arith.constant 0 : i32
    %316 = tpu.memref_slice %arg4[%c1_i32_145, %c0_i32_149, %c0_i32_150] : memref<2x128x384xbf16, #tpu.memory_space<any>> -> memref<1x128x384xbf16, #tpu.memory_space<any>>
    %317 = tpu.memref_squeeze %316 : memref<1x128x384xbf16, #tpu.memory_space<any>> -> memref<128x384xbf16, #tpu.memory_space<any>>
    %c0_i32_151 = arith.constant 0 : i32
    %c0_i32_152 = arith.constant 0 : i32
    %318 = tpu.memref_slice %arg14[%c1_i32_146, %c0_i32_151, %c0_i32_152] : memref<2x128x384xbf16, #tpu.memory_space<vmem>> -> memref<1x128x384xbf16, #tpu.memory_space<vmem>>
    %319 = tpu.memref_squeeze %318 : memref<1x128x384xbf16, #tpu.memory_space<vmem>> -> memref<128x384xbf16, #tpu.memory_space<vmem>>
    %320 = tpu.memref_slice %arg15[%c1_i32_147, %c1_i32_148] : memref<2x2x!tpu.dma_semaphore, #tpu.memory_space<semaphore_mem>> -> memref<1x1x!tpu.dma_semaphore, #tpu.memory_space<semaphore_mem>>
    %321 = tpu.memref_squeeze %320 : memref<1x1x!tpu.dma_semaphore, #tpu.memory_space<semaphore_mem>> -> memref<!tpu.dma_semaphore, #tpu.memory_space<semaphore_mem>>
    tpu.wait_dma2 semaphore(%321 : memref<!tpu.dma_semaphore, #tpu.memory_space<semaphore_mem>>) src(%317 : memref<128x384xbf16, #tpu.memory_space<any>>) dst(%319 : memref<128x384xbf16, #tpu.memory_space<vmem>>)
    %c1 = arith.constant 1 : index
    %c0_153 = arith.constant 0 : index
    %c0_154 = arith.constant 0 : index
    %322 = vector.load %arg5[%c1, %c0_153, %c0_154] : memref<2x1x384xf32, #tpu.memory_space<vmem>>, vector<1x1x384xf32>
    %323 = vector.shape_cast %322 : vector<1x1x384xf32> to vector<1x384xf32>
    %c1_155 = arith.constant 1 : index
    %c0_156 = arith.constant 0 : index
    %c0_157 = arith.constant 0 : index
    %324 = vector.load %arg6[%c1_155, %c0_156, %c0_157] : memref<2x1x128xf32, #tpu.memory_space<vmem>>, vector<1x1x128xf32>
    %325 = vector.shape_cast %324 : vector<1x1x128xf32> to vector<1x128xf32>
    %326 = vector.shape_cast %325 : vector<1x128xf32> to vector<1x128xf32>
    %327 = vector.broadcast %326 : vector<1x128xf32> to vector<16x128xf32>
    %c1_158 = arith.constant 1 : index
    %c0_159 = arith.constant 0 : index
    %c0_160 = arith.constant 0 : index
    %328 = vector.load %arg2[%c1_158, %c0_159, %c0_160] : memref<2x16x128xf32, #tpu.memory_space<vmem>>, vector<1x16x128xf32>
    %329 = vector.shape_cast %328 : vector<1x16x128xf32> to vector<16x128xf32>
    %c0_161 = arith.constant 0 : index
    %c0_162 = arith.constant 0 : index
    %330 = vector.load %arg11[%c0_161, %c0_162] : memref<128x128xbf16, #tpu.memory_space<vmem>>, vector<128x128xbf16>
    %c1_163 = arith.constant 1 : index
    %c0_164 = arith.constant 0 : index
    %c0_165 = arith.constant 0 : index
    %331 = vector.load %arg13[%c1_163, %c0_164, %c0_165] : memref<2x128x384xbf16, #tpu.memory_space<vmem>>, vector<1x128x384xbf16>
    %332 = vector.shape_cast %331 : vector<1x128x384xbf16> to vector<128x384xbf16>
    %cst_166 = arith.constant dense<0.000000e+00> : vector<128x384xf32>
    %333 = tpu.matmul %330, %332, %cst_166 {dimension_numbers = #tpu.dot_dimension_numbers<[1], [0], [0], [1], [0, 0, 1, 1], [], []>} : vector<128x128xbf16>, vector<128x384xbf16>, vector<128x384xf32> -> vector<128x384xf32>
    %334 = vector.broadcast %323 : vector<1x384xf32> to vector<128x384xf32>
    %335 = arith.addf %333, %334 : vector<128x384xf32>
    %c0_167 = arith.constant 0 : index
    %c0_168 = arith.constant 0 : index
    %336 = vector.load %arg12[%c0_167, %c0_168] : memref<128x384xf32, #tpu.memory_space<vmem>>, vector<128x384xf32>
    tpu.vector_store %arg12[%c0_167, %c0_168], %335 {strides = array<i32>} : memref<128x384xf32, #tpu.memory_space<vmem>>, vector<128x384xf32>,
    %c0_169 = arith.constant 0 : index
    %c0_170 = arith.constant 0 : index
    %337 = vector.load %arg12[%c0_169, %c0_170] : memref<128x384xf32, #tpu.memory_space<vmem>>, vector<16x384xf32>
    %338 = arith.truncf %329 : vector<16x128xf32> to vector<16x128xbf16>
    %c1_171 = arith.constant 1 : index
    %c0_172 = arith.constant 0 : index
    %c0_173 = arith.constant 0 : index
    %339 = vector.load %arg14[%c1_171, %c0_172, %c0_173] : memref<2x128x384xbf16, #tpu.memory_space<vmem>>, vector<1x128x384xbf16>
    %340 = vector.shape_cast %339 : vector<1x128x384xbf16> to vector<128x384xbf16>
    %cst_174 = arith.constant dense<0.000000e+00> : vector<16x384xf32>
    %341 = tpu.matmul %338, %340, %cst_174 {dimension_numbers = #tpu.dot_dimension_numbers<[1], [0], [0], [1], [0, 0, 1, 1], [], []>} : vector<16x128xbf16>, vector<128x384xbf16>, vector<16x384xf32> -> vector<16x384xf32>
    %342 = vector.extract_strided_slice %337 {offsets = [0, 0], sizes = [16, 128], strides = [1, 1]} : vector<16x384xf32> to vector<16x128xf32>
    %343 = vector.extract_strided_slice %341 {offsets = [0, 0], sizes = [16, 128], strides = [1, 1]} : vector<16x384xf32> to vector<16x128xf32>
    %344 = arith.addf %342, %343 : vector<16x128xf32>
    %345 = arith.negf %344 : vector<16x128xf32>
    %346 = math.exp %345 : vector<16x128xf32>
    %cst_175 = arith.constant 1.000000e+00 : f32
    %347 = vector.broadcast %cst_175 : f32 to vector<16x128xf32>
    %348 = arith.addf %347, %346 : vector<16x128xf32>
    %349 = arith.divf %347, %348 : vector<16x128xf32>
    %350 = vector.extract_strided_slice %337 {offsets = [0, 128], sizes = [16, 128], strides = [1, 1]} : vector<16x384xf32> to vector<16x128xf32>
    %351 = vector.extract_strided_slice %341 {offsets = [0, 128], sizes = [16, 128], strides = [1, 1]} : vector<16x384xf32> to vector<16x128xf32>
    %352 = arith.addf %350, %351 : vector<16x128xf32>
    %353 = arith.negf %352 : vector<16x128xf32>
    %354 = math.exp %353 : vector<16x128xf32>
    %cst_176 = arith.constant 1.000000e+00 : f32
    %355 = vector.broadcast %cst_176 : f32 to vector<16x128xf32>
    %356 = arith.addf %355, %354 : vector<16x128xf32>
    %357 = arith.divf %355, %356 : vector<16x128xf32>
    %358 = vector.extract_strided_slice %337 {offsets = [0, 256], sizes = [16, 128], strides = [1, 1]} : vector<16x384xf32> to vector<16x128xf32>
    %359 = vector.extract_strided_slice %341 {offsets = [0, 256], sizes = [16, 128], strides = [1, 1]} : vector<16x384xf32> to vector<16x128xf32>
    %360 = arith.addf %359, %327 : vector<16x128xf32>
    %361 = arith.mulf %349, %360 : vector<16x128xf32>
    %362 = arith.addf %358, %361 : vector<16x128xf32>
    %363 = math.tanh %362 : vector<16x128xf32>
    %364 = arith.subf %329, %363 : vector<16x128xf32>
    %365 = arith.mulf %357, %364 : vector<16x128xf32>
    %366 = arith.addf %363, %365 : vector<16x128xf32>
    %367 = arith.truncf %366 : vector<16x128xf32> to vector<16x128xbf16>
    %c0_177 = arith.constant 0 : index
    %c0_178 = arith.constant 0 : index
    %368 = vector.load %arg11[%c0_177, %c0_178] : memref<128x128xbf16, #tpu.memory_space<vmem>>, vector<16x128xbf16>
    tpu.vector_store %arg11[%c0_177, %c0_178], %367 {strides = array<i32>} : memref<128x128xbf16, #tpu.memory_space<vmem>>, vector<16x128xbf16>,
    %c16_179 = arith.constant 16 : index
    %c0_180 = arith.constant 0 : index
    %369 = vector.load %arg12[%c16_179, %c0_180] : memref<128x384xf32, #tpu.memory_space<vmem>>, vector<16x384xf32>
    %370 = arith.truncf %366 : vector<16x128xf32> to vector<16x128xbf16>
    %c1_181 = arith.constant 1 : index
    %c0_182 = arith.constant 0 : index
    %c0_183 = arith.constant 0 : index
    %371 = vector.load %arg14[%c1_181, %c0_182, %c0_183] : memref<2x128x384xbf16, #tpu.memory_space<vmem>>, vector<1x128x384xbf16>
    %372 = vector.shape_cast %371 : vector<1x128x384xbf16> to vector<128x384xbf16>
    %cst_184 = arith.constant dense<0.000000e+00> : vector<16x384xf32>
    %373 = tpu.matmul %370, %372, %cst_184 {dimension_numbers = #tpu.dot_dimension_numbers<[1], [0], [0], [1], [0, 0, 1, 1], [], []>} : vector<16x128xbf16>, vector<128x384xbf16>, vector<16x384xf32> -> vector<16x384xf32>
    %374 = vector.extract_strided_slice %369 {offsets = [0, 0], sizes = [16, 128], strides = [1, 1]} : vector<16x384xf32> to vector<16x128xf32>
    %375 = vector.extract_strided_slice %373 {offsets = [0, 0], sizes = [16, 128], strides = [1, 1]} : vector<16x384xf32> to vector<16x128xf32>
    %376 = arith.addf %374, %375 : vector<16x128xf32>
    %377 = arith.negf %376 : vector<16x128xf32>
    %378 = math.exp %377 : vector<16x128xf32>
    %cst_185 = arith.constant 1.000000e+00 : f32
    %379 = vector.broadcast %cst_185 : f32 to vector<16x128xf32>
    %380 = arith.addf %379, %378 : vector<16x128xf32>
    %381 = arith.divf %379, %380 : vector<16x128xf32>
    %382 = vector.extract_strided_slice %369 {offsets = [0, 128], sizes = [16, 128], strides = [1, 1]} : vector<16x384xf32> to vector<16x128xf32>
    %383 = vector.extract_strided_slice %373 {offsets = [0, 128], sizes = [16, 128], strides = [1, 1]} : vector<16x384xf32> to vector<16x128xf32>
    %384 = arith.addf %382, %383 : vector<16x128xf32>
    %385 = arith.negf %384 : vector<16x128xf32>
    %386 = math.exp %385 : vector<16x128xf32>
    %cst_186 = arith.constant 1.000000e+00 : f32
    %387 = vector.broadcast %cst_186 : f32 to vector<16x128xf32>
    %388 = arith.addf %387, %386 : vector<16x128xf32>
    %389 = arith.divf %387, %388 : vector<16x128xf32>
    %390 = vector.extract_strided_slice %369 {offsets = [0, 256], sizes = [16, 128], strides = [1, 1]} : vector<16x384xf32> to vector<16x128xf32>
    %391 = vector.extract_strided_slice %373 {offsets = [0, 256], sizes = [16, 128], strides = [1, 1]} : vector<16x384xf32> to vector<16x128xf32>
    %392 = arith.addf %391, %327 : vector<16x128xf32>
    %393 = arith.mulf %381, %392 : vector<16x128xf32>
    %394 = arith.addf %390, %393 : vector<16x128xf32>
    %395 = math.tanh %394 : vector<16x128xf32>
    %396 = arith.subf %366, %395 : vector<16x128xf32>
    %397 = arith.mulf %389, %396 : vector<16x128xf32>
    %398 = arith.addf %395, %397 : vector<16x128xf32>
    %399 = arith.truncf %398 : vector<16x128xf32> to vector<16x128xbf16>
    %c16_187 = arith.constant 16 : index
    %c0_188 = arith.constant 0 : index
    %400 = vector.load %arg11[%c16_187, %c0_188] : memref<128x128xbf16, #tpu.memory_space<vmem>>, vector<16x128xbf16>
    tpu.vector_store %arg11[%c16_187, %c0_188], %399 {strides = array<i32>} : memref<128x128xbf16, #tpu.memory_space<vmem>>, vector<16x128xbf16>,
    %c32_189 = arith.constant 32 : index
    %c0_190 = arith.constant 0 : index
    %401 = vector.load %arg12[%c32_189, %c0_190] : memref<128x384xf32, #tpu.memory_space<vmem>>, vector<16x384xf32>
    %402 = arith.truncf %398 : vector<16x128xf32> to vector<16x128xbf16>
    %c1_191 = arith.constant 1 : index
    %c0_192 = arith.constant 0 : index
    %c0_193 = arith.constant 0 : index
    %403 = vector.load %arg14[%c1_191, %c0_192, %c0_193] : memref<2x128x384xbf16, #tpu.memory_space<vmem>>, vector<1x128x384xbf16>
    %404 = vector.shape_cast %403 : vector<1x128x384xbf16> to vector<128x384xbf16>
    %cst_194 = arith.constant dense<0.000000e+00> : vector<16x384xf32>
    %405 = tpu.matmul %402, %404, %cst_194 {dimension_numbers = #tpu.dot_dimension_numbers<[1], [0], [0], [1], [0, 0, 1, 1], [], []>} : vector<16x128xbf16>, vector<128x384xbf16>, vector<16x384xf32> -> vector<16x384xf32>
    %406 = vector.extract_strided_slice %401 {offsets = [0, 0], sizes = [16, 128], strides = [1, 1]} : vector<16x384xf32> to vector<16x128xf32>
    %407 = vector.extract_strided_slice %405 {offsets = [0, 0], sizes = [16, 128], strides = [1, 1]} : vector<16x384xf32> to vector<16x128xf32>
    %408 = arith.addf %406, %407 : vector<16x128xf32>
    %409 = arith.negf %408 : vector<16x128xf32>
    %410 = math.exp %409 : vector<16x128xf32>
    %cst_195 = arith.constant 1.000000e+00 : f32
    %411 = vector.broadcast %cst_195 : f32 to vector<16x128xf32>
    %412 = arith.addf %411, %410 : vector<16x128xf32>
    %413 = arith.divf %411, %412 : vector<16x128xf32>
    %414 = vector.extract_strided_slice %401 {offsets = [0, 128], sizes = [16, 128], strides = [1, 1]} : vector<16x384xf32> to vector<16x128xf32>
    %415 = vector.extract_strided_slice %405 {offsets = [0, 128], sizes = [16, 128], strides = [1, 1]} : vector<16x384xf32> to vector<16x128xf32>
    %416 = arith.addf %414, %415 : vector<16x128xf32>
    %417 = arith.negf %416 : vector<16x128xf32>
    %418 = math.exp %417 : vector<16x128xf32>
    %cst_196 = arith.constant 1.000000e+00 : f32
    %419 = vector.broadcast %cst_196 : f32 to vector<16x128xf32>
    %420 = arith.addf %419, %418 : vector<16x128xf32>
    %421 = arith.divf %419, %420 : vector<16x128xf32>
    %422 = vector.extract_strided_slice %401 {offsets = [0, 256], sizes = [16, 128], strides = [1, 1]} : vector<16x384xf32> to vector<16x128xf32>
    %423 = vector.extract_strided_slice %405 {offsets = [0, 256], sizes = [16, 128], strides = [1, 1]} : vector<16x384xf32> to vector<16x128xf32>
    %424 = arith.addf %423, %327 : vector<16x128xf32>
    %425 = arith.mulf %413, %424 : vector<16x128xf32>
    %426 = arith.addf %422, %425 : vector<16x128xf32>
    %427 = math.tanh %426 : vector<16x128xf32>
    %428 = arith.subf %398, %427 : vector<16x128xf32>
    %429 = arith.mulf %421, %428 : vector<16x128xf32>
    %430 = arith.addf %427, %429 : vector<16x128xf32>
    %431 = arith.truncf %430 : vector<16x128xf32> to vector<16x128xbf16>
    %c32_197 = arith.constant 32 : index
    %c0_198 = arith.constant 0 : index
    %432 = vector.load %arg11[%c32_197, %c0_198] : memref<128x128xbf16, #tpu.memory_space<vmem>>, vector<16x128xbf16>
    tpu.vector_store %arg11[%c32_197, %c0_198], %431 {strides = array<i32>} : memref<128x128xbf16, #tpu.memory_space<vmem>>, vector<16x128xbf16>,
    %c48_199 = arith.constant 48 : index
    %c0_200 = arith.constant 0 : index
    %433 = vector.load %arg12[%c48_199, %c0_200] : memref<128x384xf32, #tpu.memory_space<vmem>>, vector<16x384xf32>
    %434 = arith.truncf %430 : vector<16x128xf32> to vector<16x128xbf16>
    %c1_201 = arith.constant 1 : index
    %c0_202 = arith.constant 0 : index
    %c0_203 = arith.constant 0 : index
    %435 = vector.load %arg14[%c1_201, %c0_202, %c0_203] : memref<2x128x384xbf16, #tpu.memory_space<vmem>>, vector<1x128x384xbf16>
    %436 = vector.shape_cast %435 : vector<1x128x384xbf16> to vector<128x384xbf16>
    %cst_204 = arith.constant dense<0.000000e+00> : vector<16x384xf32>
    %437 = tpu.matmul %434, %436, %cst_204 {dimension_numbers = #tpu.dot_dimension_numbers<[1], [0], [0], [1], [0, 0, 1, 1], [], []>} : vector<16x128xbf16>, vector<128x384xbf16>, vector<16x384xf32> -> vector<16x384xf32>
    %438 = vector.extract_strided_slice %433 {offsets = [0, 0], sizes = [16, 128], strides = [1, 1]} : vector<16x384xf32> to vector<16x128xf32>
    %439 = vector.extract_strided_slice %437 {offsets = [0, 0], sizes = [16, 128], strides = [1, 1]} : vector<16x384xf32> to vector<16x128xf32>
    %440 = arith.addf %438, %439 : vector<16x128xf32>
    %441 = arith.negf %440 : vector<16x128xf32>
    %442 = math.exp %441 : vector<16x128xf32>
    %cst_205 = arith.constant 1.000000e+00 : f32
    %443 = vector.broadcast %cst_205 : f32 to vector<16x128xf32>
    %444 = arith.addf %443, %442 : vector<16x128xf32>
    %445 = arith.divf %443, %444 : vector<16x128xf32>
    %446 = vector.extract_strided_slice %433 {offsets = [0, 128], sizes = [16, 128], strides = [1, 1]} : vector<16x384xf32> to vector<16x128xf32>
    %447 = vector.extract_strided_slice %437 {offsets = [0, 128], sizes = [16, 128], strides = [1, 1]} : vector<16x384xf32> to vector<16x128xf32>
    %448 = arith.addf %446, %447 : vector<16x128xf32>
    %449 = arith.negf %448 : vector<16x128xf32>
    %450 = math.exp %449 : vector<16x128xf32>
    %cst_206 = arith.constant 1.000000e+00 : f32
    %451 = vector.broadcast %cst_206 : f32 to vector<16x128xf32>
    %452 = arith.addf %451, %450 : vector<16x128xf32>
    %453 = arith.divf %451, %452 : vector<16x128xf32>
    %454 = vector.extract_strided_slice %433 {offsets = [0, 256], sizes = [16, 128], strides = [1, 1]} : vector<16x384xf32> to vector<16x128xf32>
    %455 = vector.extract_strided_slice %437 {offsets = [0, 256], sizes = [16, 128], strides = [1, 1]} : vector<16x384xf32> to vector<16x128xf32>
    %456 = arith.addf %455, %327 : vector<16x128xf32>
    %457 = arith.mulf %445, %456 : vector<16x128xf32>
    %458 = arith.addf %454, %457 : vector<16x128xf32>
    %459 = math.tanh %458 : vector<16x128xf32>
    %460 = arith.subf %430, %459 : vector<16x128xf32>
    %461 = arith.mulf %453, %460 : vector<16x128xf32>
    %462 = arith.addf %459, %461 : vector<16x128xf32>
    %463 = arith.truncf %462 : vector<16x128xf32> to vector<16x128xbf16>
    %c48_207 = arith.constant 48 : index
    %c0_208 = arith.constant 0 : index
    %464 = vector.load %arg11[%c48_207, %c0_208] : memref<128x128xbf16, #tpu.memory_space<vmem>>, vector<16x128xbf16>
    tpu.vector_store %arg11[%c48_207, %c0_208], %463 {strides = array<i32>} : memref<128x128xbf16, #tpu.memory_space<vmem>>, vector<16x128xbf16>,
    %c64_209 = arith.constant 64 : index
    %c0_210 = arith.constant 0 : index
    %465 = vector.load %arg12[%c64_209, %c0_210] : memref<128x384xf32, #tpu.memory_space<vmem>>, vector<16x384xf32>
    %466 = arith.truncf %462 : vector<16x128xf32> to vector<16x128xbf16>
    %c1_211 = arith.constant 1 : index
    %c0_212 = arith.constant 0 : index
    %c0_213 = arith.constant 0 : index
    %467 = vector.load %arg14[%c1_211, %c0_212, %c0_213] : memref<2x128x384xbf16, #tpu.memory_space<vmem>>, vector<1x128x384xbf16>
    %468 = vector.shape_cast %467 : vector<1x128x384xbf16> to vector<128x384xbf16>
    %cst_214 = arith.constant dense<0.000000e+00> : vector<16x384xf32>
    %469 = tpu.matmul %466, %468, %cst_214 {dimension_numbers = #tpu.dot_dimension_numbers<[1], [0], [0], [1], [0, 0, 1, 1], [], []>} : vector<16x128xbf16>, vector<128x384xbf16>, vector<16x384xf32> -> vector<16x384xf32>
    %470 = vector.extract_strided_slice %465 {offsets = [0, 0], sizes = [16, 128], strides = [1, 1]} : vector<16x384xf32> to vector<16x128xf32>
    %471 = vector.extract_strided_slice %469 {offsets = [0, 0], sizes = [16, 128], strides = [1, 1]} : vector<16x384xf32> to vector<16x128xf32>
    %472 = arith.addf %470, %471 : vector<16x128xf32>
    %473 = arith.negf %472 : vector<16x128xf32>
    %474 = math.exp %473 : vector<16x128xf32>
    %cst_215 = arith.constant 1.000000e+00 : f32
    %475 = vector.broadcast %cst_215 : f32 to vector<16x128xf32>
    %476 = arith.addf %475, %474 : vector<16x128xf32>
    %477 = arith.divf %475, %476 : vector<16x128xf32>
    %478 = vector.extract_strided_slice %465 {offsets = [0, 128], sizes = [16, 128], strides = [1, 1]} : vector<16x384xf32> to vector<16x128xf32>
    %479 = vector.extract_strided_slice %469 {offsets = [0, 128], sizes = [16, 128], strides = [1, 1]} : vector<16x384xf32> to vector<16x128xf32>
    %480 = arith.addf %478, %479 : vector<16x128xf32>
    %481 = arith.negf %480 : vector<16x128xf32>
    %482 = math.exp %481 : vector<16x128xf32>
    %cst_216 = arith.constant 1.000000e+00 : f32
    %483 = vector.broadcast %cst_216 : f32 to vector<16x128xf32>
    %484 = arith.addf %483, %482 : vector<16x128xf32>
    %485 = arith.divf %483, %484 : vector<16x128xf32>
    %486 = vector.extract_strided_slice %465 {offsets = [0, 256], sizes = [16, 128], strides = [1, 1]} : vector<16x384xf32> to vector<16x128xf32>
    %487 = vector.extract_strided_slice %469 {offsets = [0, 256], sizes = [16, 128], strides = [1, 1]} : vector<16x384xf32> to vector<16x128xf32>
    %488 = arith.addf %487, %327 : vector<16x128xf32>
    %489 = arith.mulf %477, %488 : vector<16x128xf32>
    %490 = arith.addf %486, %489 : vector<16x128xf32>
    %491 = math.tanh %490 : vector<16x128xf32>
    %492 = arith.subf %462, %491 : vector<16x128xf32>
    %493 = arith.mulf %485, %492 : vector<16x128xf32>
    %494 = arith.addf %491, %493 : vector<16x128xf32>
    %495 = arith.truncf %494 : vector<16x128xf32> to vector<16x128xbf16>
    %c64_217 = arith.constant 64 : index
    %c0_218 = arith.constant 0 : index
    %496 = vector.load %arg11[%c64_217, %c0_218] : memref<128x128xbf16, #tpu.memory_space<vmem>>, vector<16x128xbf16>
    tpu.vector_store %arg11[%c64_217, %c0_218], %495 {strides = array<i32>} : memref<128x128xbf16, #tpu.memory_space<vmem>>, vector<16x128xbf16>,
    %c80_219 = arith.constant 80 : index
    %c0_220 = arith.constant 0 : index
    %497 = vector.load %arg12[%c80_219, %c0_220] : memref<128x384xf32, #tpu.memory_space<vmem>>, vector<16x384xf32>
    %498 = arith.truncf %494 : vector<16x128xf32> to vector<16x128xbf16>
    %c1_221 = arith.constant 1 : index
    %c0_222 = arith.constant 0 : index
    %c0_223 = arith.constant 0 : index
    %499 = vector.load %arg14[%c1_221, %c0_222, %c0_223] : memref<2x128x384xbf16, #tpu.memory_space<vmem>>, vector<1x128x384xbf16>
    %500 = vector.shape_cast %499 : vector<1x128x384xbf16> to vector<128x384xbf16>
    %cst_224 = arith.constant dense<0.000000e+00> : vector<16x384xf32>
    %501 = tpu.matmul %498, %500, %cst_224 {dimension_numbers = #tpu.dot_dimension_numbers<[1], [0], [0], [1], [0, 0, 1, 1], [], []>} : vector<16x128xbf16>, vector<128x384xbf16>, vector<16x384xf32> -> vector<16x384xf32>
    %502 = vector.extract_strided_slice %497 {offsets = [0, 0], sizes = [16, 128], strides = [1, 1]} : vector<16x384xf32> to vector<16x128xf32>
    %503 = vector.extract_strided_slice %501 {offsets = [0, 0], sizes = [16, 128], strides = [1, 1]} : vector<16x384xf32> to vector<16x128xf32>
    %504 = arith.addf %502, %503 : vector<16x128xf32>
    %505 = arith.negf %504 : vector<16x128xf32>
    %506 = math.exp %505 : vector<16x128xf32>
    %cst_225 = arith.constant 1.000000e+00 : f32
    %507 = vector.broadcast %cst_225 : f32 to vector<16x128xf32>
    %508 = arith.addf %507, %506 : vector<16x128xf32>
    %509 = arith.divf %507, %508 : vector<16x128xf32>
    %510 = vector.extract_strided_slice %497 {offsets = [0, 128], sizes = [16, 128], strides = [1, 1]} : vector<16x384xf32> to vector<16x128xf32>
    %511 = vector.extract_strided_slice %501 {offsets = [0, 128], sizes = [16, 128], strides = [1, 1]} : vector<16x384xf32> to vector<16x128xf32>
    %512 = arith.addf %510, %511 : vector<16x128xf32>
    %513 = arith.negf %512 : vector<16x128xf32>
    %514 = math.exp %513 : vector<16x128xf32>
    %cst_226 = arith.constant 1.000000e+00 : f32
    %515 = vector.broadcast %cst_226 : f32 to vector<16x128xf32>
    %516 = arith.addf %515, %514 : vector<16x128xf32>
    %517 = arith.divf %515, %516 : vector<16x128xf32>
    %518 = vector.extract_strided_slice %497 {offsets = [0, 256], sizes = [16, 128], strides = [1, 1]} : vector<16x384xf32> to vector<16x128xf32>
    %519 = vector.extract_strided_slice %501 {offsets = [0, 256], sizes = [16, 128], strides = [1, 1]} : vector<16x384xf32> to vector<16x128xf32>
    %520 = arith.addf %519, %327 : vector<16x128xf32>
    %521 = arith.mulf %509, %520 : vector<16x128xf32>
    %522 = arith.addf %518, %521 : vector<16x128xf32>
    %523 = math.tanh %522 : vector<16x128xf32>
    %524 = arith.subf %494, %523 : vector<16x128xf32>
    %525 = arith.mulf %517, %524 : vector<16x128xf32>
    %526 = arith.addf %523, %525 : vector<16x128xf32>
    %527 = arith.truncf %526 : vector<16x128xf32> to vector<16x128xbf16>
    %c80_227 = arith.constant 80 : index
    %c0_228 = arith.constant 0 : index
    %528 = vector.load %arg11[%c80_227, %c0_228] : memref<128x128xbf16, #tpu.memory_space<vmem>>, vector<16x128xbf16>
    tpu.vector_store %arg11[%c80_227, %c0_228], %527 {strides = array<i32>} : memref<128x128xbf16, #tpu.memory_space<vmem>>, vector<16x128xbf16>,
    %c96_229 = arith.constant 96 : index
    %c0_230 = arith.constant 0 : index
    %529 = vector.load %arg12[%c96_229, %c0_230] : memref<128x384xf32, #tpu.memory_space<vmem>>, vector<16x384xf32>
    %530 = arith.truncf %526 : vector<16x128xf32> to vector<16x128xbf16>
    %c1_231 = arith.constant 1 : index
    %c0_232 = arith.constant 0 : index
    %c0_233 = arith.constant 0 : index
    %531 = vector.load %arg14[%c1_231, %c0_232, %c0_233] : memref<2x128x384xbf16, #tpu.memory_space<vmem>>, vector<1x128x384xbf16>
    %532 = vector.shape_cast %531 : vector<1x128x384xbf16> to vector<128x384xbf16>
    %cst_234 = arith.constant dense<0.000000e+00> : vector<16x384xf32>
    %533 = tpu.matmul %530, %532, %cst_234 {dimension_numbers = #tpu.dot_dimension_numbers<[1], [0], [0], [1], [0, 0, 1, 1], [], []>} : vector<16x128xbf16>, vector<128x384xbf16>, vector<16x384xf32> -> vector<16x384xf32>
    %534 = vector.extract_strided_slice %529 {offsets = [0, 0], sizes = [16, 128], strides = [1, 1]} : vector<16x384xf32> to vector<16x128xf32>
    %535 = vector.extract_strided_slice %533 {offsets = [0, 0], sizes = [16, 128], strides = [1, 1]} : vector<16x384xf32> to vector<16x128xf32>
    %536 = arith.addf %534, %535 : vector<16x128xf32>
    %537 = arith.negf %536 : vector<16x128xf32>
    %538 = math.exp %537 : vector<16x128xf32>
    %cst_235 = arith.constant 1.000000e+00 : f32
    %539 = vector.broadcast %cst_235 : f32 to vector<16x128xf32>
    %540 = arith.addf %539, %538 : vector<16x128xf32>
    %541 = arith.divf %539, %540 : vector<16x128xf32>
    %542 = vector.extract_strided_slice %529 {offsets = [0, 128], sizes = [16, 128], strides = [1, 1]} : vector<16x384xf32> to vector<16x128xf32>
    %543 = vector.extract_strided_slice %533 {offsets = [0, 128], sizes = [16, 128], strides = [1, 1]} : vector<16x384xf32> to vector<16x128xf32>
    %544 = arith.addf %542, %543 : vector<16x128xf32>
    %545 = arith.negf %544 : vector<16x128xf32>
    %546 = math.exp %545 : vector<16x128xf32>
    %cst_236 = arith.constant 1.000000e+00 : f32
    %547 = vector.broadcast %cst_236 : f32 to vector<16x128xf32>
    %548 = arith.addf %547, %546 : vector<16x128xf32>
    %549 = arith.divf %547, %548 : vector<16x128xf32>
    %550 = vector.extract_strided_slice %529 {offsets = [0, 256], sizes = [16, 128], strides = [1, 1]} : vector<16x384xf32> to vector<16x128xf32>
    %551 = vector.extract_strided_slice %533 {offsets = [0, 256], sizes = [16, 128], strides = [1, 1]} : vector<16x384xf32> to vector<16x128xf32>
    %552 = arith.addf %551, %327 : vector<16x128xf32>
    %553 = arith.mulf %541, %552 : vector<16x128xf32>
    %554 = arith.addf %550, %553 : vector<16x128xf32>
    %555 = math.tanh %554 : vector<16x128xf32>
    %556 = arith.subf %526, %555 : vector<16x128xf32>
    %557 = arith.mulf %549, %556 : vector<16x128xf32>
    %558 = arith.addf %555, %557 : vector<16x128xf32>
    %559 = arith.truncf %558 : vector<16x128xf32> to vector<16x128xbf16>
    %c96_237 = arith.constant 96 : index
    %c0_238 = arith.constant 0 : index
    %560 = vector.load %arg11[%c96_237, %c0_238] : memref<128x128xbf16, #tpu.memory_space<vmem>>, vector<16x128xbf16>
    tpu.vector_store %arg11[%c96_237, %c0_238], %559 {strides = array<i32>} : memref<128x128xbf16, #tpu.memory_space<vmem>>, vector<16x128xbf16>,
    %c112_239 = arith.constant 112 : index
    %c0_240 = arith.constant 0 : index
    %561 = vector.load %arg12[%c112_239, %c0_240] : memref<128x384xf32, #tpu.memory_space<vmem>>, vector<16x384xf32>
    %562 = arith.truncf %558 : vector<16x128xf32> to vector<16x128xbf16>
    %c1_241 = arith.constant 1 : index
    %c0_242 = arith.constant 0 : index
    %c0_243 = arith.constant 0 : index
    %563 = vector.load %arg14[%c1_241, %c0_242, %c0_243] : memref<2x128x384xbf16, #tpu.memory_space<vmem>>, vector<1x128x384xbf16>
    %564 = vector.shape_cast %563 : vector<1x128x384xbf16> to vector<128x384xbf16>
    %cst_244 = arith.constant dense<0.000000e+00> : vector<16x384xf32>
    %565 = tpu.matmul %562, %564, %cst_244 {dimension_numbers = #tpu.dot_dimension_numbers<[1], [0], [0], [1], [0, 0, 1, 1], [], []>} : vector<16x128xbf16>, vector<128x384xbf16>, vector<16x384xf32> -> vector<16x384xf32>
    %566 = vector.extract_strided_slice %561 {offsets = [0, 0], sizes = [16, 128], strides = [1, 1]} : vector<16x384xf32> to vector<16x128xf32>
    %567 = vector.extract_strided_slice %565 {offsets = [0, 0], sizes = [16, 128], strides = [1, 1]} : vector<16x384xf32> to vector<16x128xf32>
    %568 = arith.addf %566, %567 : vector<16x128xf32>
    %569 = arith.negf %568 : vector<16x128xf32>
    %570 = math.exp %569 : vector<16x128xf32>
    %cst_245 = arith.constant 1.000000e+00 : f32
    %571 = vector.broadcast %cst_245 : f32 to vector<16x128xf32>
    %572 = arith.addf %571, %570 : vector<16x128xf32>
    %573 = arith.divf %571, %572 : vector<16x128xf32>
    %574 = vector.extract_strided_slice %561 {offsets = [0, 128], sizes = [16, 128], strides = [1, 1]} : vector<16x384xf32> to vector<16x128xf32>
    %575 = vector.extract_strided_slice %565 {offsets = [0, 128], sizes = [16, 128], strides = [1, 1]} : vector<16x384xf32> to vector<16x128xf32>
    %576 = arith.addf %574, %575 : vector<16x128xf32>
    %577 = arith.negf %576 : vector<16x128xf32>
    %578 = math.exp %577 : vector<16x128xf32>
    %cst_246 = arith.constant 1.000000e+00 : f32
    %579 = vector.broadcast %cst_246 : f32 to vector<16x128xf32>
    %580 = arith.addf %579, %578 : vector<16x128xf32>
    %581 = arith.divf %579, %580 : vector<16x128xf32>
    %582 = vector.extract_strided_slice %561 {offsets = [0, 256], sizes = [16, 128], strides = [1, 1]} : vector<16x384xf32> to vector<16x128xf32>
    %583 = vector.extract_strided_slice %565 {offsets = [0, 256], sizes = [16, 128], strides = [1, 1]} : vector<16x384xf32> to vector<16x128xf32>
    %584 = arith.addf %583, %327 : vector<16x128xf32>
    %585 = arith.mulf %573, %584 : vector<16x128xf32>
    %586 = arith.addf %582, %585 : vector<16x128xf32>
    %587 = math.tanh %586 : vector<16x128xf32>
    %588 = arith.subf %558, %587 : vector<16x128xf32>
    %589 = arith.mulf %581, %588 : vector<16x128xf32>
    %590 = arith.addf %587, %589 : vector<16x128xf32>
    %591 = arith.truncf %590 : vector<16x128xf32> to vector<16x128xbf16>
    %c112_247 = arith.constant 112 : index
    %c0_248 = arith.constant 0 : index
    %592 = vector.load %arg11[%c112_247, %c0_248] : memref<128x128xbf16, #tpu.memory_space<vmem>>, vector<16x128xbf16>
    tpu.vector_store %arg11[%c112_247, %c0_248], %591 {strides = array<i32>} : memref<128x128xbf16, #tpu.memory_space<vmem>>, vector<16x128xbf16>,
    %c1_249 = arith.constant 1 : index
    %c0_250 = arith.constant 0 : index
    %c0_251 = arith.constant 0 : index
    %593 = vector.load %arg10[%c1_249, %c0_250, %c0_251] : memref<2x16x128xf32, #tpu.memory_space<vmem>>, vector<1x16x128xf32>
    %594 = vector.shape_cast %593 : vector<1x16x128xf32> to vector<16x128xf32>
    %595 = vector.shape_cast %590 : vector<16x128xf32> to vector<1x16x128xf32>
    tpu.vector_store %arg10[%c1_249, %c0_250, %c0_251], %595 {strides = array<i32>} : memref<2x16x128xf32, #tpu.memory_space<vmem>>, vector<1x16x128xf32>,
    %c0_252 = arith.constant 0 : index
    %c0_253 = arith.constant 0 : index
    %596 = vector.load %arg11[%c0_252, %c0_253] : memref<128x128xbf16, #tpu.memory_space<vmem>>, vector<128x128xbf16>
    %c0_254 = arith.constant 0 : index
    %c0_255 = arith.constant 0 : index
    %597 = vector.load %arg7[%c0_254, %c0_255] : memref<128x128xbf16, #tpu.memory_space<vmem>>, vector<128x128xbf16>
    %cst_256 = arith.constant dense<0.000000e+00> : vector<128x128xf32>
    %598 = tpu.matmul %596, %597, %cst_256 {dimension_numbers = #tpu.dot_dimension_numbers<[1], [0], [0], [1], [0, 0, 1, 1], [], []>} : vector<128x128xbf16>, vector<128x128xbf16>, vector<128x128xf32> -> vector<128x128xf32>
    %c0_257 = arith.constant 0 : index
    %c0_258 = arith.constant 0 : index
    %599 = vector.load %arg8[%c0_257, %c0_258] : memref<1x128xf32, #tpu.memory_space<vmem>>, vector<1x128xf32>
    %600 = vector.broadcast %599 : vector<1x128xf32> to vector<128x128xf32>
    %601 = arith.addf %598, %600 : vector<128x128xf32>
    %602 = vector.extract_strided_slice %601 {offsets = [0, 0], sizes = [16, 128], strides = [1, 1]} : vector<128x128xf32> to vector<16x128xf32>
    %c0_259 = arith.constant 0 : index
    %c0_260 = arith.constant 0 : index
    %603 = vector.load %arg9[%c0_259, %c0_260] : memref<16x1024xf32, #tpu.memory_space<vmem>>, vector<16x128xf32>
    tpu.vector_store %arg9[%c0_259, %c0_260], %602 {strides = array<i32>} : memref<16x1024xf32, #tpu.memory_space<vmem>>, vector<16x128xf32>,
    %604 = vector.extract_strided_slice %601 {offsets = [16, 0], sizes = [16, 128], strides = [1, 1]} : vector<128x128xf32> to vector<16x128xf32>
    %c0_261 = arith.constant 0 : index
    %c128 = arith.constant 128 : index
    %605 = vector.load %arg9[%c0_261, %c128] : memref<16x1024xf32, #tpu.memory_space<vmem>>, vector<16x128xf32>
    tpu.vector_store %arg9[%c0_261, %c128], %604 {strides = array<i32>} : memref<16x1024xf32, #tpu.memory_space<vmem>>, vector<16x128xf32>,
    %606 = vector.extract_strided_slice %601 {offsets = [32, 0], sizes = [16, 128], strides = [1, 1]} : vector<128x128xf32> to vector<16x128xf32>
    %c0_262 = arith.constant 0 : index
    %c256 = arith.constant 256 : index
    %607 = vector.load %arg9[%c0_262, %c256] : memref<16x1024xf32, #tpu.memory_space<vmem>>, vector<16x128xf32>
    tpu.vector_store %arg9[%c0_262, %c256], %606 {strides = array<i32>} : memref<16x1024xf32, #tpu.memory_space<vmem>>, vector<16x128xf32>,
    %608 = vector.extract_strided_slice %601 {offsets = [48, 0], sizes = [16, 128], strides = [1, 1]} : vector<128x128xf32> to vector<16x128xf32>
    %c0_263 = arith.constant 0 : index
    %c384 = arith.constant 384 : index
    %609 = vector.load %arg9[%c0_263, %c384] : memref<16x1024xf32, #tpu.memory_space<vmem>>, vector<16x128xf32>
    tpu.vector_store %arg9[%c0_263, %c384], %608 {strides = array<i32>} : memref<16x1024xf32, #tpu.memory_space<vmem>>, vector<16x128xf32>,
    %610 = vector.extract_strided_slice %601 {offsets = [64, 0], sizes = [16, 128], strides = [1, 1]} : vector<128x128xf32> to vector<16x128xf32>
    %c0_264 = arith.constant 0 : index
    %c512 = arith.constant 512 : index
    %611 = vector.load %arg9[%c0_264, %c512] : memref<16x1024xf32, #tpu.memory_space<vmem>>, vector<16x128xf32>
    tpu.vector_store %arg9[%c0_264, %c512], %610 {strides = array<i32>} : memref<16x1024xf32, #tpu.memory_space<vmem>>, vector<16x128xf32>,
    %612 = vector.extract_strided_slice %601 {offsets = [80, 0], sizes = [16, 128], strides = [1, 1]} : vector<128x128xf32> to vector<16x128xf32>
    %c0_265 = arith.constant 0 : index
    %c640 = arith.constant 640 : index
    %613 = vector.load %arg9[%c0_265, %c640] : memref<16x1024xf32, #tpu.memory_space<vmem>>, vector<16x128xf32>
    tpu.vector_store %arg9[%c0_265, %c640], %612 {strides = array<i32>} : memref<16x1024xf32, #tpu.memory_space<vmem>>, vector<16x128xf32>,
    %614 = vector.extract_strided_slice %601 {offsets = [96, 0], sizes = [16, 128], strides = [1, 1]} : vector<128x128xf32> to vector<16x128xf32>
    %c0_266 = arith.constant 0 : index
    %c768 = arith.constant 768 : index
    %615 = vector.load %arg9[%c0_266, %c768] : memref<16x1024xf32, #tpu.memory_space<vmem>>, vector<16x128xf32>
    tpu.vector_store %arg9[%c0_266, %c768], %614 {strides = array<i32>} : memref<16x1024xf32, #tpu.memory_space<vmem>>, vector<16x128xf32>,
    %616 = vector.extract_strided_slice %601 {offsets = [112, 0], sizes = [16, 128], strides = [1, 1]} : vector<128x128xf32> to vector<16x128xf32>
    %c0_267 = arith.constant 0 : index
    %c896 = arith.constant 896 : index
    %617 = vector.load %arg9[%c0_267, %c896] : memref<16x1024xf32, #tpu.memory_space<vmem>>, vector<16x128xf32>
    tpu.vector_store %arg9[%c0_267, %c896], %616 {strides = array<i32>} : memref<16x1024xf32, #tpu.memory_space<vmem>>, vector<16x128xf32>,
    return
  }
  func.func @transform_0(%arg0: i32) -> (i32, i32) {
    %c0_i32 = arith.constant 0 : i32
    %c0_i32_0 = arith.constant 0 : i32
    %c0_i32_1 = arith.constant 0 : i32
    return %c0_i32, %c0_i32_0 : i32, i32
  }
  func.func @transform_1(%arg0: i32) -> (i32, i32, i32) {
    %c0_i32 = arith.constant 0 : i32
    %c0_i32_0 = arith.constant 0 : i32
    %c0_i32_1 = arith.constant 0 : i32
    %c0_i32_2 = arith.constant 0 : i32
    return %c0_i32, %c0_i32_0, %c0_i32_1 : i32, i32, i32
  }
  func.func @transform_4(%arg0: i32) -> (i32, i32, i32) {
    %c0_i32 = arith.constant 0 : i32
    %c0_i32_0 = arith.constant 0 : i32
    %c0_i32_1 = arith.constant 0 : i32
    %c0_i32_2 = arith.constant 0 : i32
    return %c0_i32, %c0_i32_0, %c0_i32_1 : i32, i32, i32
  }
  func.func @transform_5(%arg0: i32) -> (i32, i32, i32) {
    %c0_i32 = arith.constant 0 : i32
    %c0_i32_0 = arith.constant 0 : i32
    %c0_i32_1 = arith.constant 0 : i32
    %c0_i32_2 = arith.constant 0 : i32
    return %c0_i32, %c0_i32_0, %c0_i32_1 : i32, i32, i32
  }
  func.func @transform_6(%arg0: i32) -> (i32, i32) {
    %c0_i32 = arith.constant 0 : i32
    %c0_i32_0 = arith.constant 0 : i32
    %c0_i32_1 = arith.constant 0 : i32
    return %c0_i32, %c0_i32_0 : i32, i32
  }
  func.func @transform_7(%arg0: i32) -> (i32, i32) {
    %c0_i32 = arith.constant 0 : i32
    %c0_i32_0 = arith.constant 0 : i32
    %c0_i32_1 = arith.constant 0 : i32
    return %c0_i32, %c0_i32_0 : i32, i32
  }
  func.func @transform_8(%arg0: i32) -> (i32, i32) {
    %c0_i32 = arith.constant 0 : i32
    %c0_i32_0 = arith.constant 0 : i32
    %c0_i32_1 = arith.constant 0 : i32
    return %c0_i32, %c0_i32_0 : i32, i32
  }
  func.func @transform_9(%arg0: i32) -> (i32, i32, i32) {
    %c0_i32 = arith.constant 0 : i32
    %c0_i32_0 = arith.constant 0 : i32
    %c0_i32_1 = arith.constant 0 : i32
    %c0_i32_2 = arith.constant 0 : i32
    return %c0_i32, %c0_i32_0, %c0_i32_1 : i32, i32, i32
  }
}

</mosaic_0001>

<bundles_post_ra>
// kernel: tpu_custom_call.1
= control target key start
LH: loop header
LB: loop body
LE: loop exit
PB: predicated region body
PF: predicated region fallthrough
CT: control target
= control target key end

     0   :  { %15 = vsyncpa [#allocation8], 0  ;;  %s6579_s0 = inlined_call_operand.hbm [shape: bf16[128,128], index: 0, kind: input, shape index: {}]   ;;  %s6580_s1 = inlined_call_operand.hbm [shape: f32[2,16,128], index: 1, kind: input, shape index: {}]   ;;  %s6581_s2 = inlined_call_operand.hbm [shape: bf16[2,128,384], index: 2, kind: input, shape index: {}]   ;;  %s6582_s3 = inlined_call_operand.hbm [shape: bf16[2,128,384], index: 3, kind: input, shape index: {}]   ;;  %s6583_s4 = inlined_call_operand.vmem [shape: f32[2,1,384], index: 4, kind: input, shape index: {}]   ;;  %s6584_s5 = inlined_call_operand.vmem [shape: f32[2,1,128], index: 5, kind: input, shape index: {}]   ;;  %s6585_s6 = inlined_call_operand.hbm [shape: bf16[128,128], index: 6, kind: input, shape index: {}]   ;;  %s6586_s7 = inlined_call_operand.vmem [shape: f32[1,128], index: 7, kind: input, shape index: {}]   ;;  %s6587_s8 = inlined_call_operand.hbm [shape: f32[16,1024], index: 8, kind: output, shape index: {0}]   ;;  %s6588_s9 = inlined_call_operand.hbm [shape: f32[2,16,128], index: 9, kind: output, shape index: {1}]  }
   0x1   :  { %16 = vsyncpa [#allocation11], 0 }
   0x2   :  { %17 = vsyncpa [#allocation9], 0 }
   0x3   :  { %18 = vsyncpa [#allocation15], 0  ;;  %s5046_s30 = smov [#allocation10]   ;;  %s4920_s13 = scalar_lea.hbm %s6580_s1, 512 }
   0x4   :  { %s36_s10 = sshll.u32 %s5046_s30, 4  ;;  %p4921_p0 = scmp.ne.s32.totalorder %s6580_s1, %s4920_s13  ;;  %s37_s10 = int_to_ptr.vmem [resolvable:$true] %s36_s10 }
   0x5   :  { %p4924_p1 = scmp.lt.u32.totalorder %s4920_s13, %s6580_s1 }
   0x7   :  { %p4926_p2 = pnand %p4924_p1, %p4921_p0 }
   0x9   :  { %4929 = shalt.err (!%p4926_p2)
}
   0xa   :  { %s4930_s18 = scalar_lea.vmem %s37_s10, 512  ;;  %p4935_p4 = scmp.lt.s32.totalorder %s37_s10, %s37_s10 }
   0xb   :  { %p4931_p3 = scmp.ne.s32.totalorder %s37_s10, %s4930_s18  ;;  %p4936_p5 = scmp.lt.s32.totalorder %s4930_s18, %s4930_s18 }
   0xd   :  { %p4937_p6 = por %p4936_p5, %p4935_p4 }
   0xf   :  { %p4938_p7 = pnand %p4937_p6, %p4931_p3 }
  0x11   :  { %4941 = shalt.err (!%p4938_p7)
}
  0x12   :  { %s5047_s19 = smov 128   ;;  %s5048_s20 = smov 8  }
  0x13   :  { %42 = dma.hbm_to_vmem [thread:$0]  %s6580_s1, 512, %s37_s10, [#allocation11], %s5047_s19, %s5047_s19, %s5048_s20  }
  0x14   :  { %s5049_s23 = smov [#allocation7]   ;;  %s4942_s27 = scalar_lea.hbm %s6579_s0, 1024 }
  0x15   :  { %s24_s24 = sshll.u32 %s5049_s23, 4  ;;  %p4943_p8 = scmp.ne.s32.totalorder %s6579_s0, %s4942_s27  ;;  %s25_s24 = int_to_ptr.vmem [resolvable:$true] %s24_s24 }
  0x16   :  { %p4946_p9 = scmp.lt.u32.totalorder %s4942_s27, %s6579_s0 }
  0x18   :  { %p4948_p10 = pnand %p4946_p9, %p4943_p8 }
  0x1a   :  { %4951 = shalt.err (!%p4948_p10)
}
  0x1b   :  { %s4952_s12 = scalar_lea.vmem %s25_s24, 1024  ;;  %p4957_p12 = scmp.lt.s32.totalorder %s25_s24, %s25_s24 }
  0x1c   :  { %p4953_p11 = scmp.ne.s32.totalorder %s25_s24, %s4952_s12  ;;  %p4958_p13 = scmp.lt.s32.totalorder %s4952_s12, %s4952_s12 }
  0x1e   :  { %p4959_p0 = por %p4958_p13, %p4957_p12 }
  0x20   :  { %p4960_p1 = pnand %p4959_p0, %p4953_p11 }
  0x22   :  { %4963 = shalt.err (!%p4960_p1)
}
  0x23   :  { %s5050_s1 = smov 64   ;;  %s5051_s10 = smov 4  }
  0x24   :  { %30 = dma.hbm_to_vmem [thread:$0]  %s6579_s0, 1024, %s25_s24, [#allocation8], %s5050_s1, %s5050_s1, %s5051_s10  }
  0x25   :  { %s5052_s15 = smov [#allocation12]   ;;  %s4964_s21 = scalar_lea.hbm %s6585_s6, 1024 }
  0x26   :  { %s52_s16 = sshll.u32 %s5052_s15, 4  ;;  %p4965_p2 = scmp.ne.s32.totalorder %s6585_s6, %s4964_s21  ;;  %s53_s16 = int_to_ptr.vmem [resolvable:$true] %s52_s16 }
  0x27   :  { %p4968_p3 = scmp.lt.u32.totalorder %s4964_s21, %s6585_s6 }
  0x29   :  { %p4970_p4 = pnand %p4968_p3, %p4965_p2 }
  0x2b   :  { %4973 = shalt.err (!%p4970_p4)
}
  0x2c   :  { %s4974_s27 = scalar_lea.vmem %s53_s16, 1024  ;;  %p4979_p6 = scmp.lt.s32.totalorder %s53_s16, %s53_s16 }
  0x2d   :  { %p4975_p5 = scmp.ne.s32.totalorder %s53_s16, %s4974_s27  ;;  %p4980_p7 = scmp.lt.s32.totalorder %s4974_s27, %s4974_s27 }
  0x2f   :  { %p4981_p8 = por %p4980_p7, %p4979_p6 }
  0x31   :  { %p4982_p9 = pnand %p4981_p8, %p4975_p5 }
  0x33   :  { %4985 = shalt.err (!%p4982_p9)
}
  0x34   :  { %58 = dma.hbm_to_vmem [thread:$0]  %s6585_s6, 1024, %s53_s16, [#allocation11], %s5050_s1, %s5050_s1, %s5051_s10  }
  0x35   :  { %5030 = dma.done.wait [#allocation8], 1024  }
  0x36   :  { %5031 = vsyncadd [#allocation8], 4294966272 }
  0x37   :  { %5032 = dma.done.wait [#allocation11], 1536  }
  0x38   :  { %5033 = vsyncadd [#allocation11], 4294965760  ;;  %s75_s28 = sld [smem:[#allocation0]]   ;;  %93 = sst [smem:[#allocation17 + $0x3]] %s5050_s1 }
  0x39   :  { %95 = sst [smem:[#allocation17 + $0x4]] %s5047_s19  ;;  %s5053_s29 = smov [#allocation4]  }
  0x3a   :  { %s83_s30 = sshll.u32 %s5053_s29, 4  ;;  %101 = sst [smem:[#allocation17 + $0x7]] %s5050_s1  ;;  %s84_s30 = int_to_ptr.vmem [resolvable:$true] %s83_s30 }
  0x3b   :  { %103 = sst [smem:[#allocation17 + $0x8]] %s5051_s10  ;;  %s5054_s11 = smov 384  }
  0x3c   :  { %87 = sst [smem:[#allocation17]] %s5054_s11  ;;  %s5055_s12 = smov 3  }
  0x3d   :  { %89 = sst [smem:[#allocation17 + $0x1]] %s5054_s11  ;;  %s5056_s14 = smov 2  }
  0x3e   :  { %s3704_s6 = sshll.u32 %s75_s28, 26  ;;  %91 = sst [smem:[#allocation17 + $0x2]] %s5055_s12 }
  0x3f   :  { %s5177_s13 = sadd.s32 134217728, %s3704_s6  ;;  %97 = sst [smem:[#allocation17 + $0x5]] %s5056_s14 }
  0x40   :  { %s5057_s15 = smov 192   ;;  %s5058_s16 = smov [#allocation6]  }
  0x41   :  { %99 = sst [smem:[#allocation17 + $0x6]] %s5057_s15  ;;  %s5059_s17 = smov [#allocation16]  }
  0x42   :  { %105 = dma.general %s6581_s2, 3072, %s84_s30, %s5058_s16, %s5059_s17, [#allocation17], %s5177_s13, 0  }
  0x43   :  { %122 = sst [smem:[#allocation19]] %s5054_s11  ;;  %s5060_s22 = smov [#allocation5]  }
  0x44   :  { %124 = sst [smem:[#allocation19 + $0x1]] %s5054_s11  ;;  %s118_s23 = sshll.u32 %s5060_s22, 4  ;;  %s119_s23 = int_to_ptr.vmem [resolvable:$true] %s118_s23 }
  0x45   :  { %126 = sst [smem:[#allocation19 + $0x2]] %s5055_s12  ;;  %s5061_s25 = smov [#allocation6 + $0x2]  }
  0x46   :  { %128 = sst [smem:[#allocation19 + $0x3]] %s5050_s1  ;;  %s5062_s26 = smov [#allocation18]  }
  0x47   :  { %130 = sst [smem:[#allocation19 + $0x4]] %s5047_s19 }
  0x48   :  { %132 = sst [smem:[#allocation19 + $0x5]] %s5056_s14 }
  0x49   :  { %134 = sst [smem:[#allocation19 + $0x6]] %s5057_s15 }
  0x4a   :  { %136 = sst [smem:[#allocation19 + $0x7]] %s5050_s1 }
  0x4b   :  { %138 = sst [smem:[#allocation19 + $0x8]] %s5051_s10 }
  0x4c   :  { %140 = dma.general %s6582_s3, 3072, %s119_s23, %s5061_s25, %s5062_s26, [#allocation19], %s5177_s13, 0  }
  0x4d   :  { %5034 = dma.done.wait [#allocation6], 3072 }
  0x4e   :  { %5035 = vsyncadd [#allocation6], 4294964224 }
  0x4f   :  { %5036 = dma.done.wait [#allocation6 + $0x2], 3072 }
  0x50   :  { %5037 = vsyncadd [#allocation6 + $0x2], 4294964224  ;;  %165 = sst [smem:[#allocation21]] %s5054_s11  ;;  %v6591_v0 = vmov 0   ;;  %s5064_s24 = smov [#allocation4 + $0xc0]   ;;  %v6593_v52 = vmov 0.0  }
  0x51   :  { %367 = vmatprep.mubr.bf16.mxu0 %v6591_v0  ;;  %407 = vmatprep.mubr.bf16.mxu1 %v6591_v0  ;;  %167 = sst [smem:[#allocation21 + $0x1]] %s5054_s11  ;;  %s161_s28 = sshll.u32 %s5064_s24, 4  ;;  %vm5071_vm0 = vmmov 0   ;;  %s162_s28 = int_to_ptr.vmem [resolvable:$true] %s161_s28 }
  0x52   :  { %169 = sst [smem:[#allocation21 + $0x2]] %s5055_s12  ;;  %s147_s6 = scalar_lea.hbm %s6581_s2, 3072 }
  0x53   :  { %171 = sst [smem:[#allocation21 + $0x3]] %s5050_s1  ;;  %s5065_s16 = smov [#allocation6 + $0x1]  }
  0x54   :  { %173 = sst [smem:[#allocation21 + $0x4]] %s5047_s19  ;;  %s5066_s17 = smov [#allocation20]  }
  0x55   :  { %175 = sst [smem:[#allocation21 + $0x5]] %s5056_s14  ;;  %s5067_s2 = smov [#allocation5 + $0xc0]  }
  0x56   :  { %177 = sst [smem:[#allocation21 + $0x6]] %s5057_s15  ;;  %s198_s18 = sshll.u32 %s5067_s2, 4  ;;  %s199_s18 = int_to_ptr.vmem [resolvable:$true] %s198_s18 }
  0x57   :  { %179 = sst [smem:[#allocation21 + $0x7]] %s5050_s1  ;;  %s184_s23 = scalar_lea.hbm %s6582_s3, 3072 }
  0x58   :  { %181 = sst [smem:[#allocation21 + $0x8]] %s5051_s10  ;;  %s5069_s25 = smov [#allocation22]  }
  0x59   :  { %183 = dma.general %s147_s6, 3072, %s162_s28, %s5065_s16, %s5066_s17, [#allocation21], %s5177_s13, 0  }
  0x5a   :  { %202 = sst [smem:[#allocation23]] %s5054_s11 }
  0x5b   :  { %204 = sst [smem:[#allocation23 + $0x1]] %s5054_s11  ;;  %s5068_s11 = smov [#allocation6 + $0x3]  }
  0x5c   :  { %206 = sst [smem:[#allocation23 + $0x2]] %s5055_s12 }
  0x5d   :  { %208 = sst [smem:[#allocation23 + $0x3]] %s5050_s1 }
  0x5e   :  { %210 = sst [smem:[#allocation23 + $0x4]] %s5047_s19 }
  0x5f   :  { %212 = sst [smem:[#allocation23 + $0x5]] %s5056_s14 }
  0x60   :  { %214 = sst [smem:[#allocation23 + $0x6]] %s5057_s15 }
  0x61   :  { %216 = sst [smem:[#allocation23 + $0x7]] %s5050_s1 }
  0x62   :  { %218 = sst [smem:[#allocation23 + $0x8]] %s5051_s10 }
  0x63   :  { %220 = dma.general %s184_s23, 3072, %s199_s18, %s5068_s11, %s5069_s25, [#allocation23], %s5177_s13, 0  }
  0x64   :  { %v248_v1 = vld [vmem:[#allocation4 + $0x8] sm:$0xff]  ;;  %v247_v2 = vld [vmem:[#allocation4] sm:$0xff]  ;;  %v250_v4 = vld [vmem:[#allocation4 + $0x18] sm:$0xff] }
  0x65   :  { %v251_v3 = vld [vmem:[#allocation4 + $0x20] sm:$0xff]  ;;  %335 = vmatprep.subr.bf16.mxu0 %v248_v1  ;;  %4409 = vmatprep.subr.bf16.mxu1 %v248_v1  ;;  %v254_v5 = vld [vmem:[#allocation4 + $0x38] sm:$0xff]  ;;  %v253_v6 = vld [vmem:[#allocation4 + $0x30] sm:$0xff] }
  0x66   :  { %336 = vmatpush1.bf16.msra.mxu0 %v247_v2  ;;  %4417 = vmatpush1.bf16.msra.mxu1 %v247_v2  ;;  %v257_v7 = vld [vmem:[#allocation4 + $0x50] sm:$0xff]  ;;  %v256_v8 = vld [vmem:[#allocation4 + $0x48] sm:$0xff]  ;;  %v259_v10 = vld [vmem:[#allocation4 + $0x60] sm:$0xff] }
  0x67   :  { %337 = vmatprep.subr.bf16.mxu0 %v251_v3  ;;  %4410 = vmatprep.subr.bf16.mxu1 %v251_v3  ;;  %v260_v9 = vld [vmem:[#allocation4 + $0x68] sm:$0xff]  ;;  %v263_v11 = vld [vmem:[#allocation4 + $0x80] sm:$0xff]  ;;  %v262_v12 = vld [vmem:[#allocation4 + $0x78] sm:$0xff] }
  0x68   :  { %v266_v13 = vld [vmem:[#allocation4 + $0x98] sm:$0xff]  ;;  %v265_v14 = vld [vmem:[#allocation4 + $0x90] sm:$0xff]  ;;  %v268_v16 = vld [vmem:[#allocation4 + $0xa8] sm:$0xff] }
  0x69   :  { %v269_v15 = vld [vmem:[#allocation4 + $0xb0] sm:$0xff]  ;;  %v5226_v18 = vld [vmem:[#allocation5 + $0x8] sm:$0xff]  ;;  %v5228_v19 = vld [vmem:[#allocation7] sm:$0xff]  }
  0x6a   :  { %338 = vmatpush1.bf16.msra.mxu0 %v250_v4  ;;  %4418 = vmatpush1.bf16.msra.mxu1 %v250_v4  ;;  %v249_v17 = vld [vmem:[#allocation4 + $0x10] sm:$0xff]  ;;  %v5230_v20 = vld [vmem:[#allocation7 + $0x20] sm:$0xff]   ;;  %v252_v22 = vld [vmem:[#allocation4 + $0x28] sm:$0xff] }
  0x6b   :  { %339 = vmatprep.subr.bf16.mxu0 %v254_v5  ;;  %4411 = vmatprep.subr.bf16.mxu1 %v254_v5  ;;  %v5233_v21 = vld [vmem:[#allocation5] sm:$0xff]  ;;  %v5241_v24 = vld [vmem:[#allocation5 + $0x18] sm:$0xff]  ;;  %v5247_v27 = vld [vmem:[#allocation7 + $0x8] sm:$0xff]  }
  0x6c   :  { %v5235_v23 = vld [vmem:[#allocation5 + $0x20] sm:$0xff]  ;;  %v5245_v26 = vld [vmem:[#allocation5 + $0x38] sm:$0xff]  ;;  %v5249_v28 = vld [vmem:[#allocation7 + $0x28] sm:$0xff]  }
  0x6d   :  { %v255_v25 = vld [vmem:[#allocation4 + $0x40] sm:$0xff]  ;;  %v5253_v29 = vld [vmem:[#allocation5 + $0x30] sm:$0xff]  ;;  %v258_v30 = vld [vmem:[#allocation4 + $0x58] sm:$0xff] }
  0x6e   :  { %340 = vmatpush1.bf16.msra.mxu0 %v253_v6  ;;  %4419 = vmatpush1.bf16.msra.mxu1 %v253_v6  ;;  %v5255_v31 = vld [vmem:[#allocation5 + $0x50] sm:$0xff]  ;;  %v5261_v32 = vld [vmem:[#allocation5 + $0x48] sm:$0xff]  ;;  %v5271_v37 = vld [vmem:[#allocation5 + $0x60] sm:$0xff] }
  0x6f   :  { %341 = vmatprep.subr.bf16.mxu0 %v257_v7  ;;  %4412 = vmatprep.subr.bf16.mxu1 %v257_v7  ;;  %v261_v33 = vld [vmem:[#allocation4 + $0x70] sm:$0xff]  ;;  %v5265_v34 = vld [vmem:[#allocation5 + $0x68] sm:$0xff]  ;;  %v5273_v39 = vld [vmem:[#allocation5 + $0x80] sm:$0xff] }
  0x70   :  { %v4586_v35 = vld [vmem:[#allocation7 + $0x10] sm:$0xff]   ;;  %v264_v38 = vld [vmem:[#allocation4 + $0x88] sm:$0xff]  ;;  %v5278_v40 = vld [vmem:[#allocation5 + $0x78] sm:$0xff] }
  0x71   :  { %v5267_v36 = vld [vmem:[#allocation7 + $0x30] sm:$0xff]   ;;  %v267_v41 = vld [vmem:[#allocation4 + $0xa0] sm:$0xff]  ;;  %v5282_v42 = vld [vmem:[#allocation5 + $0x98] sm:$0xff] }
  0x72   :  { %342 = vmatpush1.bf16.msra.mxu0 %v256_v8  ;;  %4420 = vmatpush1.bf16.msra.mxu1 %v256_v8  ;;  %v4588_v43 = vld [vmem:[#allocation7 + $0x18] sm:$0xff]   ;;  %v5288_v45 = vld [vmem:[#allocation5 + $0x90] sm:$0xff]  ;;  %v5294_v48 = vld [vmem:[#allocation10] sm:$0xff] }
  0x73   :  { %343 = vmatprep.subr.bf16.mxu0 %v260_v9  ;;  %4413 = vmatprep.subr.bf16.mxu1 %v260_v9  ;;  %v5284_v44 = vld [vmem:[#allocation7 + $0x38] sm:$0xff]   ;;  %v5290_v47 = vld [vmem:[#allocation5 + $0xb0] sm:$0xff]  ;;  %v5296_v49 = vld [vmem:[#allocation10 + $0x8] sm:$0xff]  ;;  %v272_v9 = vlaneseq }
  0x74   :  { %v270_v46 = vld [vmem:[#allocation4 + $0xb8] sm:$0xff]  ;;  %v5299_v50 = vld [vmem:[#allocation5 + $0xa8] sm:$0xff]  ;;  %v599_v51 = vpack.c.bf16 %v5296_v49, %v5294_v48  ;;  %v5307_v53 = vld [vmem:[#allocation5 + $0x10] sm:$0xff] }
  0x75   :  { %v5313_v54 = vld [vmem:[#allocation5 + $0x28] sm:$0xff]  ;;  %v5320_v55 = vld [vmem:[#allocation5 + $0x40] sm:$0xff]  ;;  %v5327_v56 = vld [vmem:[#allocation5 + $0x58] sm:$0xff] }
  0x76   :  { %344 = vmatpush1.bf16.msra.mxu0 %v259_v10  ;;  %4421 = vmatpush1.bf16.msra.mxu1 %v259_v10  ;;  %v5333_v57 = vld [vmem:[#allocation5 + $0x70] sm:$0xff]  ;;  %v5341_v58 = vld [vmem:[#allocation5 + $0x88] sm:$0xff]  ;;  %v5347_v59 = vld [vmem:[#allocation5 + $0xa0] sm:$0xff] }
  0x77   :  { %345 = vmatprep.subr.bf16.mxu0 %v263_v11  ;;  %4414 = vmatprep.subr.bf16.mxu1 %v263_v11  ;;  %v5356_v60 = vld [vmem:[#allocation5 + $0xb8] sm:$0xff]  ;;  %v5406_v11 = vshrl.u32 %v272_v9, 7 }
  0x79   :  { %6605 = vst [vmem:[#allocation39_spill] sm:$0xff] %v5406_v11 }
  0x7a   :  { %346 = vmatpush1.bf16.msra.mxu0 %v262_v12  ;;  %4422 = vmatpush1.bf16.msra.mxu1 %v262_v12 }
  0x7b   :  { %347 = vmatprep.subr.bf16.mxu0 %v266_v13  ;;  %4415 = vmatprep.subr.bf16.mxu1 %v266_v13 }
  0x7e   :  { %348 = vmatpush1.bf16.msra.mxu0 %v265_v14  ;;  %4423 = vmatpush1.bf16.msra.mxu1 %v265_v14  ;;  %v6590_v14 = vsub.s32 2, %v5406_v11 }
  0x7f   :  { %349 = vmatprep.subr.bf16.mxu0 %v269_v15  ;;  %4416 = vmatprep.subr.bf16.mxu1 %v269_v15 }
  0x82   :  { %350 = vmatpush1.bf16.msra.mxu0 %v268_v16  ;;  %4424 = vmatpush1.bf16.msra.mxu1 %v268_v16  ;;  %v6589_v16 = vsub.s32 0, %v5406_v11 }
  0x83   :  { %3993 = vmatprep.subr.bf16.mxu1 %v249_v17  ;;  %624 = vmatprep.subr.bf16.mxu0 %v5226_v18 }
  0x85   :  { %368 = vmatmul.mubr.bf16.vlgmr.msra.gmra.mrb[0].mxu0 %v5228_v19  ;;  %408 = vmatmul.mubr.bf16.vlgmr.msra.gmra.mrb[0].mxu1 %v5230_v20 }
  0x86   :  { %3994 = vmatpush3.bf16.msra.mxu1 %v249_v17  ;;  %625 = vmatpush1.bf16.msra.mxu0 %v5233_v21 }
  0x87   :  { %3995 = vmatprep.subr.bf16.mxu1 %v252_v22  ;;  %626 = vmatprep.subr.bf16.mxu0 %v5235_v23 }
  0x88   :  { %377 = vmatprep.mubr.bf16.mxu0 %v6591_v0  ;;  %417 = vmatprep.mubr.bf16.mxu1 %v6591_v0 }
  0x8a   :  { %3996 = vmatpush3.bf16.msra.mxu1 %v252_v22  ;;  %627 = vmatpush1.bf16.msra.mxu0 %v5241_v24 }
  0x8b   :  { %3997 = vmatprep.subr.bf16.mxu1 %v255_v25  ;;  %628 = vmatprep.subr.bf16.mxu0 %v5245_v26 }
  0x8d   :  { %378 = vmatmul.mubr.bf16.gmra.mrb[4].mxu0 %v5247_v27  ;;  %418 = vmatmul.mubr.bf16.gmra.mrb[4].mxu1 %v5249_v28 }
  0x8e   :  { %3998 = vmatpush3.bf16.msra.mxu1 %v255_v25  ;;  %629 = vmatpush1.bf16.msra.mxu0 %v5253_v29 }
  0x8f   :  { %3999 = vmatprep.subr.bf16.mxu1 %v258_v30  ;;  %630 = vmatprep.subr.bf16.mxu0 %v5255_v31 }
  0x90   :  { %387 = vmatprep.mubr.bf16.mxu0 %v6591_v0  ;;  %427 = vmatprep.mubr.bf16.mxu1 %v6591_v0 }
  0x92   :  { %4000 = vmatpush3.bf16.msra.mxu1 %v258_v30  ;;  %631 = vmatpush1.bf16.msra.mxu0 %v5261_v32 }
  0x93   :  { %4001 = vmatprep.subr.bf16.mxu1 %v261_v33  ;;  %632 = vmatprep.subr.bf16.mxu0 %v5265_v34 }
  0x95   :  { %388 = vmatmul.mubr.bf16.gmra.mrb[8].mxu0 %v4586_v35  ;;  %428 = vmatmul.mubr.bf16.gmra.mrb[8].mxu1 %v5267_v36 }
  0x96   :  { %4002 = vmatpush3.bf16.msra.mxu1 %v261_v33  ;;  %633 = vmatpush1.bf16.msra.mxu0 %v5271_v37 }
  0x97   :  { %4003 = vmatprep.subr.bf16.mxu1 %v264_v38  ;;  %634 = vmatprep.subr.bf16.mxu0 %v5273_v39 }
  0x98   :  { %397 = vmatprep.mubr.bf16.mxu0 %v6591_v0  ;;  %437 = vmatprep.mubr.bf16.mxu1 %v6591_v0 }
  0x9a   :  { %4004 = vmatpush3.bf16.msra.mxu1 %v264_v38  ;;  %635 = vmatpush1.bf16.msra.mxu0 %v5278_v40 }
  0x9b   :  { %4005 = vmatprep.subr.bf16.mxu1 %v267_v41  ;;  %636 = vmatprep.subr.bf16.mxu0 %v5282_v42 }
  0x9d   :  { %398 = vmatmul.mubr.bf16.gmra.mrb[12].mxu0 %v4588_v43  ;;  %438 = vmatmul.mubr.bf16.gmra.mrb[12].mxu1 %v5284_v44 }
  0x9e   :  { %4006 = vmatpush3.bf16.msra.mxu1 %v267_v41  ;;  %637 = vmatpush1.bf16.msra.mxu0 %v5288_v45 }
  0x9f   :  { %4007 = vmatprep.subr.bf16.mxu1 %v270_v46  ;;  %638 = vmatprep.subr.bf16.mxu0 %v5290_v47 }
  0xa0   :  { %4009 = vmatprep.mubr.bf16.mxu1 %v5228_v19  ;;  %656 = vmatprep.mubr.bf16.mxu0 %v6591_v0  ;;  %v221_v19 = vld [vmem:[%s6583_s4] sm:$0x7] }
  0xa1   :  { %v5427_v22 = vrot.slane %v221_v19, %v6589_v16 }
  0xa2   :  { %4008 = vmatpush3.bf16.msra.mxu1 %v270_v46  ;;  %639 = vmatpush1.bf16.msra.mxu0 %v5299_v50 }
  0xa3   :  { %4025 = vmatprep.subr.bf16.mxu1 %v6593_v52  ;;  %782 = vmatprep.subr.bf16.mxu0 %v5226_v18 }
  0xa5   :  { %4010 = vmatmul.mubr.bf16.vlgmr.msra.gmra.mrb[16].mxu1 %v5247_v27  ;;  %657 = vmatmul.mubr.bf16.vlgmr.msra.gmra.mrb[0].mxu0 %v599_v51 }
  0xa6   :  { %4026 = vmatpush3.bf16.msra.mxu1 %v5307_v53  ;;  %4013 = vmatprep.mubr.bf16.mxu1 %v4586_v35 }
  0xa7   :  { %4027 = vmatprep.subr.bf16.mxu1 %v6593_v52  ;;  %783 = vmatpush1.bf16.msra.mxu0 %v5233_v21 }
  0xa8   :  { %784 = vmatprep.subr.bf16.mxu0 %v5235_v23  ;;  %814 = vmatprep.mubr.bf16.mxu0 %v6591_v0 }
  0xaa   :  { %4028 = vmatpush3.bf16.msra.mxu1 %v5313_v54 }
  0xab   :  { %4029 = vmatprep.subr.bf16.mxu1 %v6593_v52  ;;  %785 = vmatpush1.bf16.msra.mxu0 %v5241_v24 }
  0xac   :  { %786 = vmatprep.subr.bf16.mxu0 %v5245_v26 }
  0xad   :  { %4014 = vmatmul.mubr.bf16.gmra.mrb[20].mxu1 %v4588_v43 }
  0xae   :  { %4030 = vmatpush3.bf16.msra.mxu1 %v5320_v55  ;;  %4017 = vmatprep.mubr.bf16.mxu1 %v5230_v20  ;;  %v5423_v20 = vrot.slane %v221_v19, %v6590_v14 }
  0xaf   :  { %4031 = vmatprep.subr.bf16.mxu1 %v6593_v52  ;;  %787 = vmatpush1.bf16.msra.mxu0 %v5253_v29 }
  0xb0   :  { %788 = vmatprep.subr.bf16.mxu0 %v5255_v31 }
  0xb2   :  { %4032 = vmatpush3.bf16.msra.mxu1 %v5327_v56 }
  0xb3   :  { %4033 = vmatprep.subr.bf16.mxu1 %v6593_v52  ;;  %789 = vmatpush1.bf16.msra.mxu0 %v5261_v32 }
  0xb4   :  { %790 = vmatprep.subr.bf16.mxu0 %v5265_v34 }
  0xb5   :  { %4018 = vmatmul.mubr.bf16.gmra.mrb[24].mxu1 %v5249_v28 }
  0xb6   :  { %4034 = vmatpush3.bf16.msra.mxu1 %v5333_v57  ;;  %4021 = vmatprep.mubr.bf16.mxu1 %v5267_v36 }
  0xb7   :  { %4035 = vmatprep.subr.bf16.mxu1 %v6593_v52  ;;  %791 = vmatpush1.bf16.msra.mxu0 %v5271_v37 }
  0xb8   :  { %792 = vmatprep.subr.bf16.mxu0 %v5273_v39 }
  0xba   :  { %4036 = vmatpush3.bf16.msra.mxu1 %v5341_v58 }
  0xbb   :  { %4037 = vmatprep.subr.bf16.mxu1 %v6593_v52  ;;  %793 = vmatpush1.bf16.msra.mxu0 %v5278_v40 }
  0xbc   :  { %794 = vmatprep.subr.bf16.mxu0 %v5282_v42 }
  0xbd   :  { %4022 = vmatmul.mubr.bf16.gmra.mrb[28].mxu1 %v5284_v44 }
  0xbe   :  { %4038 = vmatpush3.bf16.msra.mxu1 %v5347_v59  ;;  %4041 = vmatprep.mubr.msk.bf16.mxu1 %vm5071_vm0, %v6593_v52 }
  0xbf   :  { %4039 = vmatprep.subr.bf16.mxu1 %v6593_v52  ;;  %795 = vmatpush1.bf16.msra.mxu0 %v5288_v45 }
  0xc0   :  { %796 = vmatprep.subr.bf16.mxu0 %v5290_v47 }
  0xc2   :  { %4040 = vmatpush3.bf16.msra.mxu1 %v5356_v60 }
  0xc3   :  { %4045 = vmatprep.subr.bf16.mxu1 %v6593_v52  ;;  %797 = vmatpush1.bf16.msra.mxu0 %v5299_v50 }
  0xc4   :  { %940 = vmatprep.subr.bf16.mxu0 %v5226_v18 }
  0xc5   :  { %4042 = vmatmul.mubr.bf16.vlgmr.msra.gmra.mrb[32].mxu1 %v599_v51 }
  0xc6   :  { %4046 = vmatpush3.bf16.msra.mxu1 %v5307_v53  ;;  %4061 = vmatprep.mubr.msk.bf16.mxu1 %vm5071_vm0, %v6593_v52 }
  0xc7   :  { %4047 = vmatprep.subr.bf16.mxu1 %v6593_v52 }
  0xca   :  { %4048 = vmatpush3.bf16.msra.mxu1 %v5313_v54 }
  0xcb   :  { %4049 = vmatprep.subr.bf16.mxu1 %v6593_v52 }
  0xce   :  { %4050 = vmatpush3.bf16.msra.mxu1 %v5320_v55 }
  0xcf   :  { %4051 = vmatprep.subr.bf16.mxu1 %v6593_v52 }
  0xd2   :  { %4052 = vmatpush3.bf16.msra.mxu1 %v5327_v56 }
  0xd3   :  { %4053 = vmatprep.subr.bf16.mxu1 %v6593_v52 }
  0xd6   :  { %4054 = vmatpush3.bf16.msra.mxu1 %v5333_v57 }
  0xd7   :  { %4055 = vmatprep.subr.bf16.mxu1 %v6593_v52 }
  0xda   :  { %4056 = vmatpush3.bf16.msra.mxu1 %v5341_v58 }
  0xdb   :  { %4057 = vmatprep.subr.bf16.mxu1 %v6593_v52 }
  0xde   :  { %4058 = vmatpush3.bf16.msra.mxu1 %v5347_v59 }
  0xdf   :  { %4059 = vmatprep.subr.bf16.mxu1 %v6593_v52 }
  0xe2   :  { %4060 = vmatpush3.bf16.msra.mxu1 %v5356_v60 }
  0xe3   :  { %4065 = vmatprep.subr.bf16.mxu1 %v6593_v52 }
 0x158   :  { %v5382_v61 = vpop.f32.mrb[0].mxu1 }
 0x159   :  { %v5384_v62 = vpop.f32.mrb[1].mxu1 }
 0x15a   :  { %v5386_v63 = vpop.f32.mrb[2].mxu1 }
 0x15b   :  { %v5388_v1 = vpop.f32.mrb[3].mxu1 }
 0x160   :  { %v5390_v2 = vpop.f32.mrb[4].mxu1 }
 0x161   :  { %v5392_v3 = vpop.f32.mrb[5].mxu1 }
 0x162   :  { %6598 = vst [vmem:[#allocation32_spill] sm:$0xff] %v5392_v3  ;;  %v5394_v4 = vpop.f32.mrb[6].mxu1 }
 0x163   :  { %6599 = vst [vmem:[#allocation33_spill] sm:$0xff] %v5394_v4  ;;  %v5396_v5 = vpop.f32.mrb[7].mxu1 }
 0x164   :  { %6600 = vst [vmem:[#allocation34_spill] sm:$0xff] %v5396_v5 }
 0x168   :  { %v5398_v6 = vpop.f32.mrb[8].mxu1 }
 0x169   :  { %6601 = vst [vmem:[#allocation35_spill] sm:$0xff] %v5398_v6  ;;  %v5400_v7 = vpop.f32.mrb[9].mxu1 }
 0x16a   :  { %6602 = vst [vmem:[#allocation36_spill] sm:$0xff] %v5400_v7  ;;  %v5402_v8 = vpop.f32.mrb[10].mxu1 }
 0x16b   :  { %6603 = vst [vmem:[#allocation37_spill] sm:$0xff] %v5402_v8  ;;  %v5404_v10 = vpop.f32.mrb[11].mxu1 }
 0x16c   :  { %6604 = vst [vmem:[#allocation38_spill] sm:$0xff] %v5404_v10 }
 0x170   :  { %v5408_v12 = vpop.f32.mrb[12].mxu1 }
 0x171   :  { %6606 = vst [vmem:[#allocation40_spill] sm:$0xff] %v5408_v12  ;;  %v5410_v13 = vpop.f32.mrb[13].mxu1 }
 0x172   :  { %6607 = vst [vmem:[#allocation41_spill] sm:$0xff] %v5410_v13  ;;  %v5413_v15 = vpop.f32.mrb[14].mxu1 }
 0x173   :  { %6608 = vst [vmem:[#allocation42_spill] sm:$0xff] %v5413_v15  ;;  %v5416_v17 = vpop.f32.mrb[15].mxu1 }
 0x174   :  { %6609 = vst [vmem:[#allocation43_spill] sm:$0xff] %v5416_v17 }
 0x178   :  { %v4011_v25 = vpop.f32.mrb[16].mxu1  ;;  %v658_v27 = vpop.f32.mrb[0].mxu0 }
 0x179   :  { %v5430_v28 = vadd.f32 %v4011_v25, %v5423_v20  ;;  %v4425_v30 = vadd.f32 %v658_v27, %v5427_v22  ;;  %v482_v33 = vpop.f32.mrb[17].mxu1  ;;  %v660_v35 = vpop.f32.mrb[1].mxu0  ;;  %v6597_v25 = vsub.s32 1, %v5406_v11 }
 0x17a   :  { %v4012_v36 = vpop.f32.mrb[18].mxu1  ;;  %v662_v38 = vpop.f32.mrb[2].mxu0 }
 0x17b   :  { %v3721_v41 = vmul.f32 -1.442695, %v4425_v30  ;;  %v5434_v43 = vadd.f32 %v4012_v36, %v5423_v20  ;;  %v4427_v44 = vadd.f32 %v662_v38, %v5427_v22  ;;  %v485_v46 = vpop.f32.mrb[19].mxu1  ;;  %v664_v51 = vpop.f32.mrb[3].mxu0 }
 0x17c   :  { %v486_v6 = vadd.f32 %v485_v46, %v5423_v20 }
 0x17d   :  { %v3722_v9 = vmul.f32 -1.442695, %v4427_v44  ;;  %4590 = vpow2.f32 %v3721_v41  ;;  %v5452_v41 = vrot.slane %v221_v19, %v6597_v25 }
 0x17f   :  { %4592 = vpow2.f32 %v3722_v9  ;;  %v4426_v44 = vadd.f32 %v660_v35, %v5452_v41  ;;  %v4428_v17 = vadd.f32 %v664_v51, %v5452_v41 }
 0x180   :  { %v4015_v16 = vpop.f32.mrb[20].mxu1 }
 0x181   :  { %v5439_v27 = vadd.f32 %v4015_v16, %v5423_v20  ;;  %v498_v14 = vpop.f32.mrb[21].mxu1  ;;  %v3723_v12 = vmul.f32 -1.442695, %v4426_v44  ;;  %v3724_v10 = vmul.f32 -1.442695, %v4428_v17 }
 0x182   :  { %v5442_v0 = vadd.f32 %v498_v14, %v5423_v20  ;;  %v4016_v30 = vpop.f32.mrb[22].mxu1 }
 0x183   :  { %v5445_v36 = vadd.f32 %v4016_v30, %v5423_v20  ;;  %v501_v38 = vpop.f32.mrb[23].mxu1  ;;  %4594 = vpow2.f32 %v3723_v12 }
 0x184   :  { %v5448_v52 = vadd.f32 %v501_v38, %v5423_v20 }
 0x187   :  { %v4591_v9 = vpop.eup %4590 }
 0x188   :  { %v4019_v16 = vpop.f32.mrb[24].mxu1  ;;  %v716_v25 = vadd.f32 1.0, %v4591_v9 }
 0x189   :  { %v5457_v14 = vadd.f32 %v4019_v16, %v5423_v20  ;;  %v514_v15 = vpop.f32.mrb[25].mxu1  ;;  %v4593_v38 = vpop.eup %4592 }
 0x18a   :  { %v5460_v30 = vadd.f32 %v514_v15, %v5423_v20  ;;  %v4020_v13 = vpop.f32.mrb[26].mxu1  ;;  %v717_v51 = vadd.f32 1.0, %v4593_v38  ;;  %4596 = vrcp.f32 %v716_v25 }
 0x18b   :  { %6610 = vst [vmem:[#allocation44_spill] sm:$0xff] %v5457_v14  ;;  %v5463_v11 = vadd.f32 %v4020_v13, %v5423_v20  ;;  %v517_v19 = vpop.f32.mrb[27].mxu1  ;;  %4598 = vpow2.f32 %v3724_v10  ;;  %v5483_v10 = vld [vmem:[%s6584_s5] ss:$0 sm:$0xff] }
 0x18c   :  { %v5466_v35 = vadd.f32 %v517_v19, %v5423_v20  ;;  %4600 = vrcp.f32 %v717_v51 }
 0x18d   :  { %6611 = vst [vmem:[#allocation45_spill] sm:$0xff] %v5463_v11  ;;  %v4595_v25 = vpop.eup %4594 }
 0x18e   :  { %v730_v7 = vadd.f32 1.0, %v4595_v25 }
 0x190   :  { %v4023_v16 = vpop.f32.mrb[28].mxu1 }
 0x191   :  { %v5469_v15 = vadd.f32 %v4023_v16, %v5423_v20  ;;  %v530_v8 = vpop.f32.mrb[29].mxu1 }
 0x192   :  { %v5472_v44 = vadd.f32 %v530_v8, %v5423_v20  ;;  %v4024_v13 = vpop.f32.mrb[30].mxu1 }
 0x193   :  { %6612 = vst [vmem:[#allocation46_spill] sm:$0xff] %v5469_v15  ;;  %v5475_v9 = vadd.f32 %v4024_v13, %v5423_v20  ;;  %v533_v19 = vpop.f32.mrb[31].mxu1  ;;  %v483_v13 = vadd.f32 %v482_v33, %v5423_v20 }
 0x194   :  { %6613 = vst [vmem:[#allocation47_spill] sm:$0xff] %v5472_v44  ;;  %v5478_v17 = vadd.f32 %v533_v19, %v5423_v20  ;;  %v4597_v8 = vpop.eup %4596 }
 0x195   :  { %6614 = vst [vmem:[#allocation48_spill] sm:$0xff] %v5475_v9  ;;  %v4599_v15 = vpop.eup %4598 }
 0x196   :  { %6615 = vst [vmem:[#allocation49_spill] sm:$0xff] %v5478_v17  ;;  %v4601_v17 = vpop.eup %4600  ;;  %v731_v5 = vadd.f32 1.0, %v4599_v15 }
 0x198   :  { %v701_v12 = vpop.f32.mrb[32].mxu1 }
 0x199   :  { %v736_v38 = vadd.f32 %v5483_v10, %v701_v12  ;;  %v4043_v51 = vpop.f32.mrb[33].mxu1 }
 0x19a   :  { %v704_v16 = vpop.f32.mrb[34].mxu1 }
 0x19b   :  { %v738_v9 = vmul.f32 %v4597_v8, %v736_v38  ;;  %v737_v44 = vadd.f32 %v5483_v10, %v704_v16  ;;  %v4044_v19 = vpop.f32.mrb[35].mxu1 }
 0x19d   :  { %v740_v11 = vadd.f32 %v738_v9, %v483_v13  ;;  %v739_v14 = vmul.f32 %v4601_v17, %v737_v44 }
 0x19f   :  { %4602 = vtanh.f32 %v740_v11  ;;  %v741_v4 = vadd.f32 %v739_v14, %v486_v6 }
 0x1a0   :  { %4604 = vrcp.f32 %v730_v7 }
 0x1a1   :  { %4606 = vtanh.f32 %v741_v4 }
 0x1a2   :  { %4608 = vrcp.f32 %v731_v5 }
 0x1a9   :  { %v4603_v12 = vpop.eup %4602 }
 0x1aa   :  { %v4605_v51 = vpop.eup %4604  ;;  %v744_v33 = vsub.f32 %v5294_v48, %v4603_v12  ;;  %v6616_v48 = vmov 0.0  }
 0x1ab   :  { %v4607_v38 = vpop.eup %4606 }
 0x1ac   :  { %v745_v8 = vsub.f32 %v5296_v49, %v4607_v38  ;;  %v746_v16 = vmul.f32 %v4605_v51, %v744_v33  ;;  %v4609_v19 = vpop.eup %4608  ;;  %v6617_v49 = vmov 0  }
 0x1ae   :  { %v747_v25 = vmul.f32 %v4609_v19, %v745_v8  ;;  %v5491_v3 = vadd.f32 %v4603_v12, %v746_v16 }
 0x1b0   :  { %v5493_v20 = vadd.f32 %v4607_v38, %v747_v25 }
 0x1b2   :  { %v5497_v6 = vpack.c.bf16 %v5493_v20, %v5491_v3 }
 0x1b4   :  { %815 = vmatmul.mubr.bf16.vlgmr.msra.gmra.mrb[4].mxu0 %v5497_v6  ;;  %4062 = vmatmul.mubr.bf16.vlgmr.msra.gmra.mrb[36].mxu1 %v5497_v6 }
 0x1b5   :  { %941 = vmatpush1.bf16.msra.mxu0 %v5233_v21  ;;  %4066 = vmatpush3.bf16.msra.mxu1 %v5307_v53 }
 0x1b6   :  { %942 = vmatprep.subr.bf16.mxu0 %v5235_v23  ;;  %4067 = vmatprep.subr.bf16.mxu1 %v6616_v48 }
 0x1b7   :  { %972 = vmatprep.mubr.bf16.mxu0 %v6617_v49  ;;  %4081 = vmatprep.mubr.msk.bf16.mxu1 %vm5071_vm0, %v6616_v48 }
 0x1b9   :  { %943 = vmatpush1.bf16.msra.mxu0 %v5241_v24  ;;  %4068 = vmatpush3.bf16.msra.mxu1 %v5313_v54 }
 0x1ba   :  { %944 = vmatprep.subr.bf16.mxu0 %v5245_v26  ;;  %4069 = vmatprep.subr.bf16.mxu1 %v6616_v48 }
 0x1bd   :  { %945 = vmatpush1.bf16.msra.mxu0 %v5253_v29  ;;  %4070 = vmatpush3.bf16.msra.mxu1 %v5320_v55 }
 0x1be   :  { %946 = vmatprep.subr.bf16.mxu0 %v5255_v31  ;;  %4071 = vmatprep.subr.bf16.mxu1 %v6616_v48 }
 0x1c1   :  { %947 = vmatpush1.bf16.msra.mxu0 %v5261_v32  ;;  %4072 = vmatpush3.bf16.msra.mxu1 %v5327_v56 }
 0x1c2   :  { %948 = vmatprep.subr.bf16.mxu0 %v5265_v34  ;;  %4073 = vmatprep.subr.bf16.mxu1 %v6616_v48 }
 0x1c5   :  { %949 = vmatpush1.bf16.msra.mxu0 %v5271_v37  ;;  %4074 = vmatpush3.bf16.msra.mxu1 %v5333_v57 }
 0x1c6   :  { %950 = vmatprep.subr.bf16.mxu0 %v5273_v39  ;;  %4075 = vmatprep.subr.bf16.mxu1 %v6616_v48 }
 0x1c9   :  { %951 = vmatpush1.bf16.msra.mxu0 %v5278_v40  ;;  %4076 = vmatpush3.bf16.msra.mxu1 %v5341_v58 }
 0x1ca   :  { %952 = vmatprep.subr.bf16.mxu0 %v5282_v42  ;;  %4077 = vmatprep.subr.bf16.mxu1 %v6616_v48 }
 0x1cd   :  { %953 = vmatpush1.bf16.msra.mxu0 %v5288_v45  ;;  %4078 = vmatpush3.bf16.msra.mxu1 %v5347_v59 }
 0x1ce   :  { %954 = vmatprep.subr.bf16.mxu0 %v5290_v47  ;;  %4079 = vmatprep.subr.bf16.mxu1 %v6616_v48 }
 0x1d1   :  { %955 = vmatpush1.bf16.msra.mxu0 %v5299_v50  ;;  %4080 = vmatpush3.bf16.msra.mxu1 %v5356_v60 }
 0x1d2   :  { %1098 = vmatprep.subr.bf16.mxu0 %v5226_v18  ;;  %4085 = vmatprep.subr.bf16.mxu1 %v6616_v48 }
 0x287   :  { %v816_v4 = vpop.f32.mrb[4].mxu0  ;;  %v859_v5 = vpop.f32.mrb[36].mxu1 }
 0x288   :  { %v4429_v7 = vadd.f32 %v816_v4, %v5427_v22  ;;  %v818_v11 = vpop.f32.mrb[5].mxu0  ;;  %v4063_v46 = vpop.f32.mrb[37].mxu1 }
 0x289   :  { %v820_v14 = vpop.f32.mrb[6].mxu0  ;;  %v862_v15 = vpop.f32.mrb[38].mxu1  ;;  %v4430_v18 = vadd.f32 %v818_v11, %v5452_v41 }
 0x28a   :  { %v3725_v44 = vmul.f32 -1.442695, %v4429_v7  ;;  %v4431_v9 = vadd.f32 %v820_v14, %v5427_v22  ;;  %v822_v17 = vpop.f32.mrb[7].mxu0  ;;  %v4064_v13 = vpop.f32.mrb[39].mxu1  ;;  %v894_v7 = vadd.f32 %v5483_v10, %v859_v5  ;;  %v895_v11 = vadd.f32 %v5483_v10, %v862_v15 }
 0x28b   :  { %v4432_v51 = vadd.f32 %v822_v17, %v5452_v41  ;;  %v3727_v33 = vmul.f32 -1.442695, %v4430_v18 }
 0x28c   :  { %4610 = vpow2.f32 %v3725_v44  ;;  %v3726_v12 = vmul.f32 -1.442695, %v4431_v9 }
 0x28d   :  { %v3728_v8 = vmul.f32 -1.442695, %v4432_v51 }
 0x28e   :  { %4612 = vpow2.f32 %v3726_v12 }
 0x28f   :  { %4614 = vpow2.f32 %v3727_v33 }
 0x296   :  { %v4611_v38 = vpop.eup %4610 }
 0x297   :  { %v874_v16 = vadd.f32 1.0, %v4611_v38 }
 0x298   :  { %v4613_v19 = vpop.eup %4612 }
 0x299   :  { %4616 = vrcp.f32 %v874_v16  ;;  %v875_v25 = vadd.f32 1.0, %v4613_v19  ;;  %v4615_v4 = vpop.eup %4614 }
 0x29a   :  { %4618 = vpow2.f32 %v3728_v8  ;;  %v888_v17 = vadd.f32 1.0, %v4615_v4 }
 0x29b   :  { %4620 = vrcp.f32 %v875_v25 }
 0x2a3   :  { %v4617_v46 = vpop.eup %4616 }
 0x2a4   :  { %v4619_v14 = vpop.eup %4618  ;;  %v896_v44 = vmul.f32 %v4617_v46, %v894_v7 }
 0x2a5   :  { %v4621_v9 = vpop.eup %4620  ;;  %v889_v51 = vadd.f32 1.0, %v4619_v14 }
 0x2a6   :  { %v898_v13 = vadd.f32 %v896_v44, %v5430_v28  ;;  %v897_v12 = vmul.f32 %v4621_v9, %v895_v11 }
 0x2a8   :  { %4622 = vtanh.f32 %v898_v13  ;;  %v899_v18 = vadd.f32 %v897_v12, %v5434_v43 }
 0x2a9   :  { %4624 = vrcp.f32 %v888_v17 }
 0x2aa   :  { %4626 = vtanh.f32 %v899_v18 }
 0x2ab   :  { %4628 = vrcp.f32 %v889_v51 }
 0x2b2   :  { %v4623_v33 = vpop.eup %4622 }
 0x2b3   :  { %v4625_v38 = vpop.eup %4624  ;;  %v902_v5 = vsub.f32 %v5491_v3, %v4623_v33 }
 0x2b4   :  { %v4627_v8 = vpop.eup %4626 }
 0x2b5   :  { %v903_v16 = vsub.f32 %v5493_v20, %v4627_v8  ;;  %v904_v15 = vmul.f32 %v4625_v38, %v902_v5  ;;  %v4629_v19 = vpop.eup %4628 }
 0x2b7   :  { %v905_v25 = vmul.f32 %v4629_v19, %v903_v16  ;;  %v5546_v4 = vadd.f32 %v4623_v33, %v904_v15 }
 0x2b9   :  { %v5548_v28 = vadd.f32 %v4627_v8, %v905_v25 }
 0x2bb   :  { %v5552_v43 = vpack.c.bf16 %v5548_v28, %v5546_v4 }
 0x2bd   :  { %973 = vmatmul.mubr.bf16.vlgmr.msra.gmra.mrb[8].mxu0 %v5552_v43  ;;  %4082 = vmatmul.mubr.bf16.vlgmr.msra.gmra.mrb[40].mxu1 %v5552_v43 }
 0x2be   :  { %1099 = vmatpush1.bf16.msra.mxu0 %v5233_v21  ;;  %4086 = vmatpush3.bf16.msra.mxu1 %v5307_v53 }
 0x2bf   :  { %1100 = vmatprep.subr.bf16.mxu0 %v5235_v23  ;;  %4087 = vmatprep.subr.bf16.mxu1 %v6616_v48 }
 0x2c0   :  { %1130 = vmatprep.mubr.bf16.mxu0 %v6617_v49  ;;  %4101 = vmatprep.mubr.msk.bf16.mxu1 %vm5071_vm0, %v6616_v48 }
 0x2c2   :  { %1101 = vmatpush1.bf16.msra.mxu0 %v5241_v24  ;;  %4088 = vmatpush3.bf16.msra.mxu1 %v5313_v54 }
 0x2c3   :  { %1102 = vmatprep.subr.bf16.mxu0 %v5245_v26  ;;  %4089 = vmatprep.subr.bf16.mxu1 %v6616_v48 }
 0x2c6   :  { %1103 = vmatpush1.bf16.msra.mxu0 %v5253_v29  ;;  %4090 = vmatpush3.bf16.msra.mxu1 %v5320_v55 }
 0x2c7   :  { %1104 = vmatprep.subr.bf16.mxu0 %v5255_v31  ;;  %4091 = vmatprep.subr.bf16.mxu1 %v6616_v48 }
 0x2ca   :  { %1105 = vmatpush1.bf16.msra.mxu0 %v5261_v32  ;;  %4092 = vmatpush3.bf16.msra.mxu1 %v5327_v56 }
 0x2cb   :  { %1106 = vmatprep.subr.bf16.mxu0 %v5265_v34  ;;  %4093 = vmatprep.subr.bf16.mxu1 %v6616_v48 }
 0x2ce   :  { %1107 = vmatpush1.bf16.msra.mxu0 %v5271_v37  ;;  %4094 = vmatpush3.bf16.msra.mxu1 %v5333_v57 }
 0x2cf   :  { %1108 = vmatprep.subr.bf16.mxu0 %v5273_v39  ;;  %4095 = vmatprep.subr.bf16.mxu1 %v6616_v48 }
 0x2d2   :  { %1109 = vmatpush1.bf16.msra.mxu0 %v5278_v40  ;;  %4096 = vmatpush3.bf16.msra.mxu1 %v5341_v58 }
 0x2d3   :  { %1110 = vmatprep.subr.bf16.mxu0 %v5282_v42  ;;  %4097 = vmatprep.subr.bf16.mxu1 %v6616_v48 }
 0x2d6   :  { %1111 = vmatpush1.bf16.msra.mxu0 %v5288_v45  ;;  %4098 = vmatpush3.bf16.msra.mxu1 %v5347_v59 }
 0x2d7   :  { %1112 = vmatprep.subr.bf16.mxu0 %v5290_v47  ;;  %4099 = vmatprep.subr.bf16.mxu1 %v6616_v48 }
 0x2da   :  { %1113 = vmatpush1.bf16.msra.mxu0 %v5299_v50  ;;  %4100 = vmatpush3.bf16.msra.mxu1 %v5356_v60 }
 0x2db   :  { %4105 = vmatprep.subr.bf16.mxu1 %v6616_v48 }
 0x390   :  { %v974_v21 = vpop.f32.mrb[8].mxu0  ;;  %v1017_v23 = vpop.f32.mrb[40].mxu1 }
 0x391   :  { %v4433_v24 = vadd.f32 %v974_v21, %v5427_v22  ;;  %v976_v26 = vpop.f32.mrb[9].mxu0  ;;  %v4083_v29 = vpop.f32.mrb[41].mxu1  ;;  %v1052_v11 = vadd.f32 %v5483_v10, %v1017_v23 }
 0x392   :  { %v978_v31 = vpop.f32.mrb[10].mxu0  ;;  %v1020_v32 = vpop.f32.mrb[42].mxu1  ;;  %v4434_v45 = vadd.f32 %v976_v26, %v5452_v41 }
 0x393   :  { %v3729_v34 = vmul.f32 -1.442695, %v4433_v24  ;;  %v4435_v37 = vadd.f32 %v978_v31, %v5427_v22  ;;  %v980_v39 = vpop.f32.mrb[11].mxu0  ;;  %v4084_v40 = vpop.f32.mrb[43].mxu1  ;;  %v1053_v12 = vadd.f32 %v5483_v10, %v1020_v32  ;;  %v5658_v31 = vld [vmem:[#allocation5 + $0x80] sm:$0xff]  ;;  %v5662_v32 = vld [vmem:[#allocation5 + $0x78] sm:$0xff] }
 0x394   :  { %v4436_v47 = vadd.f32 %v980_v39, %v5452_v41  ;;  %v3731_v50 = vmul.f32 -1.442695, %v4434_v45  ;;  %v5670_v39 = vld [vmem:[#allocation5 + $0xb0] sm:$0xff]  ;;  %v5674_v40 = vld [vmem:[#allocation5 + $0xa8] sm:$0xff] }
 0x395   :  { %4630 = vpow2.f32 %v3729_v34  ;;  %v3730_v42 = vmul.f32 -1.442695, %v4435_v37  ;;  %v5664_v34 = vld [vmem:[#allocation5 + $0x98] sm:$0xff]  ;;  %v5668_v37 = vld [vmem:[#allocation5 + $0x90] sm:$0xff] }
 0x396   :  { %v3732_v20 = vmul.f32 -1.442695, %v4436_v47 }
 0x397   :  { %4632 = vpow2.f32 %v3730_v42 }
 0x398   :  { %4634 = vpow2.f32 %v3731_v50 }
 0x39f   :  { %v4631_v3 = vpop.eup %4630 }
 0x3a0   :  { %v1032_v7 = vadd.f32 1.0, %v4631_v3 }
 0x3a1   :  { %v4633_v46 = vpop.eup %4632 }
 0x3a2   :  { %4636 = vrcp.f32 %v1032_v7  ;;  %v1033_v14 = vadd.f32 1.0, %v4633_v46  ;;  %v4635_v44 = vpop.eup %4634 }
 0x3a3   :  { %4638 = vpow2.f32 %v3732_v20  ;;  %v1046_v51 = vadd.f32 1.0, %v4635_v44 }
 0x3a4   :  { %4640 = vrcp.f32 %v1033_v14 }
 0x3ac   :  { %v4637_v9 = vpop.eup %4636 }
 0x3ad   :  { %v4639_v17 = vpop.eup %4638  ;;  %v1054_v13 = vmul.f32 %v4637_v9, %v1052_v11 }
 0x3ae   :  { %v4641_v18 = vpop.eup %4640  ;;  %v1047_v8 = vadd.f32 1.0, %v4639_v17 }
 0x3af   :  { %v1056_v33 = vadd.f32 %v1054_v13, %v5442_v0  ;;  %v1055_v38 = vmul.f32 %v4641_v18, %v1053_v12 }
 0x3b1   :  { %4642 = vtanh.f32 %v1056_v33  ;;  %v1057_v5 = vadd.f32 %v1055_v38, %v5448_v52 }
 0x3b2   :  { %4644 = vrcp.f32 %v1046_v51 }
 0x3b3   :  { %4646 = vtanh.f32 %v1057_v5 }
 0x3b4   :  { %4648 = vrcp.f32 %v1047_v8 }
 0x3bb   :  { %v4643_v16 = vpop.eup %4642 }
 0x3bc   :  { %v4645_v15 = vpop.eup %4644  ;;  %v1060_v19 = vsub.f32 %v5546_v4, %v4643_v16  ;;  %v5653_v4 = vld [vmem:[#allocation5 + $0x68] sm:$0xff] }
 0x3bd   :  { %v4647_v25 = vpop.eup %4646 }
 0x3be   :  { %v1061_v21 = vsub.f32 %v5548_v28, %v4647_v25  ;;  %v1062_v23 = vmul.f32 %v4645_v15, %v1060_v19  ;;  %v4649_v24 = vpop.eup %4648  ;;  %v5656_v28 = vld [vmem:[#allocation5 + $0x60] sm:$0xff] }
 0x3c0   :  { %v1063_v26 = vmul.f32 %v4649_v24, %v1061_v21  ;;  %v5600_v29 = vadd.f32 %v4643_v16, %v1062_v23 }
 0x3c2   :  { %v5602_v0 = vadd.f32 %v4647_v25, %v1063_v26 }
 0x3c4   :  { %v5606_v52 = vpack.c.bf16 %v5602_v0, %v5600_v29 }
 0x3c6   :  { %1131 = vmatmul.mubr.bf16.vlgmr.msra.gmra.mrb[12].mxu0 %v5606_v52  ;;  %4102 = vmatmul.mubr.bf16.vlgmr.msra.gmra.mrb[44].mxu1 %v5606_v52 }
 0x3c7   :  { %4106 = vmatpush3.bf16.msra.mxu1 %v5307_v53  ;;  %1288 = vmatprep.mubr.bf16.mxu0 %v6617_v49  ;;  %v5629_v53 = vld [vmem:[#allocation5 + $0x8] sm:$0xff] }
 0x3c8   :  { %4107 = vmatprep.subr.bf16.mxu1 %v6616_v48  ;;  %4121 = vmatprep.mubr.msk.bf16.mxu1 %vm5071_vm0, %v6616_v48 }
 0x3c9   :  { %1256 = vmatprep.subr.bf16.mxu0 %v5629_v53 }
 0x3cb   :  { %4108 = vmatpush3.bf16.msra.mxu1 %v5313_v54  ;;  %v5632_v54 = vld [vmem:[#allocation5] sm:$0xff] }
 0x3cc   :  { %4109 = vmatprep.subr.bf16.mxu1 %v6616_v48  ;;  %1257 = vmatpush1.bf16.msra.mxu0 %v5632_v54 }
 0x3cf   :  { %4110 = vmatpush3.bf16.msra.mxu1 %v5320_v55  ;;  %v5635_v55 = vld [vmem:[#allocation5 + $0x20] sm:$0xff] }
 0x3d0   :  { %4111 = vmatprep.subr.bf16.mxu1 %v6616_v48  ;;  %1258 = vmatprep.subr.bf16.mxu0 %v5635_v55 }
 0x3d3   :  { %4112 = vmatpush3.bf16.msra.mxu1 %v5327_v56  ;;  %v5638_v56 = vld [vmem:[#allocation5 + $0x18] sm:$0xff] }
 0x3d4   :  { %4113 = vmatprep.subr.bf16.mxu1 %v6616_v48  ;;  %1259 = vmatpush1.bf16.msra.mxu0 %v5638_v56 }
 0x3d7   :  { %4114 = vmatpush3.bf16.msra.mxu1 %v5333_v57  ;;  %v5641_v57 = vld [vmem:[#allocation5 + $0x38] sm:$0xff] }
 0x3d8   :  { %4115 = vmatprep.subr.bf16.mxu1 %v6616_v48  ;;  %1260 = vmatprep.subr.bf16.mxu0 %v5641_v57 }
 0x3db   :  { %4116 = vmatpush3.bf16.msra.mxu1 %v5341_v58  ;;  %v5644_v58 = vld [vmem:[#allocation5 + $0x30] sm:$0xff] }
 0x3dc   :  { %4117 = vmatprep.subr.bf16.mxu1 %v6616_v48  ;;  %1261 = vmatpush1.bf16.msra.mxu0 %v5644_v58 }
 0x3df   :  { %4118 = vmatpush3.bf16.msra.mxu1 %v5347_v59  ;;  %v5647_v59 = vld [vmem:[#allocation5 + $0x50] sm:$0xff] }
 0x3e0   :  { %4119 = vmatprep.subr.bf16.mxu1 %v6616_v48  ;;  %1262 = vmatprep.subr.bf16.mxu0 %v5647_v59 }
 0x3e3   :  { %4120 = vmatpush3.bf16.msra.mxu1 %v5356_v60  ;;  %v5650_v60 = vld [vmem:[#allocation5 + $0x48] sm:$0xff] }
 0x3e4   :  { %4125 = vmatprep.subr.bf16.mxu1 %v6616_v48  ;;  %1263 = vmatpush1.bf16.msra.mxu0 %v5650_v60 }
 0x3e5   :  { %1264 = vmatprep.subr.bf16.mxu0 %v5653_v4 }
 0x3e8   :  { %1265 = vmatpush1.bf16.msra.mxu0 %v5656_v28 }
 0x3e9   :  { %1266 = vmatprep.subr.bf16.mxu0 %v5658_v31 }
 0x3ec   :  { %1267 = vmatpush1.bf16.msra.mxu0 %v5662_v32 }
 0x3ed   :  { %1268 = vmatprep.subr.bf16.mxu0 %v5664_v34 }
 0x3f0   :  { %1269 = vmatpush1.bf16.msra.mxu0 %v5668_v37 }
 0x3f1   :  { %1270 = vmatprep.subr.bf16.mxu0 %v5670_v39 }
 0x3f4   :  { %1271 = vmatpush1.bf16.msra.mxu0 %v5674_v40 }
 0x3f5   :  { %1414 = vmatprep.subr.bf16.mxu0 %v5629_v53 }
 0x499   :  { %v1132_v42 = vpop.f32.mrb[12].mxu0  ;;  %v1175_v45 = vpop.f32.mrb[44].mxu1 }
 0x49a   :  { %v4437_v47 = vadd.f32 %v1132_v42, %v5427_v22  ;;  %v1134_v50 = vpop.f32.mrb[13].mxu0  ;;  %v4103_v3 = vpop.f32.mrb[45].mxu1  ;;  %v1210_v16 = vadd.f32 %v5483_v10, %v1175_v45 }
 0x49b   :  { %v1136_v20 = vpop.f32.mrb[14].mxu0  ;;  %v1178_v7 = vpop.f32.mrb[46].mxu1  ;;  %v4438_v17 = vadd.f32 %v1134_v50, %v5452_v41 }
 0x49c   :  { %v3733_v46 = vmul.f32 -1.442695, %v4437_v47  ;;  %v4439_v14 = vadd.f32 %v1136_v20, %v5427_v22  ;;  %v1138_v44 = vpop.f32.mrb[15].mxu0  ;;  %v4104_v11 = vpop.f32.mrb[47].mxu1  ;;  %v1211_v21 = vadd.f32 %v5483_v10, %v1178_v7 }
 0x49d   :  { %v4440_v13 = vadd.f32 %v1138_v44, %v5452_v41  ;;  %v3735_v12 = vmul.f32 -1.442695, %v4438_v17  ;;  %v5725_v17 = vld [vmem:[#allocation5 + $0x40] sm:$0xff] }
 0x49e   :  { %4650 = vpow2.f32 %v3733_v46  ;;  %v3734_v9 = vmul.f32 -1.442695, %v4439_v14 }
 0x49f   :  { %v3736_v51 = vmul.f32 -1.442695, %v4440_v13  ;;  %v5729_v13 = vld [vmem:[#allocation5 + $0x58] sm:$0xff] }
 0x4a0   :  { %4652 = vpow2.f32 %v3734_v9 }
 0x4a1   :  { %4654 = vpow2.f32 %v3735_v12  ;;  %v5733_v12 = vld [vmem:[#allocation5 + $0x70] sm:$0xff] }
 0x4a8   :  { %v4651_v18 = vpop.eup %4650 }
 0x4a9   :  { %v1190_v33 = vadd.f32 1.0, %v4651_v18  ;;  %v5737_v18 = vld [vmem:[#allocation5 + $0x88] sm:$0xff] }
 0x4aa   :  { %v4653_v38 = vpop.eup %4652 }
 0x4ab   :  { %4656 = vrcp.f32 %v1190_v33  ;;  %v1191_v5 = vadd.f32 1.0, %v4653_v38  ;;  %v4655_v8 = vpop.eup %4654  ;;  %v5745_v33 = vld [vmem:[#allocation5 + $0xb8] sm:$0xff]  ;;  %v410_v38 = vadd.f32 %v5382_v61, %v5427_v22 }
 0x4ac   :  { %4658 = vpow2.f32 %v3736_v51  ;;  %v1204_v24 = vadd.f32 1.0, %v4655_v8  ;;  %v5741_v51 = vld [vmem:[#allocation5 + $0xa0] sm:$0xff] }
 0x4ad   :  { %4660 = vrcp.f32 %v1191_v5  ;;  %v412_v5 = vadd.f32 %v5384_v62, %v5452_v41 }
 0x4b5   :  { %v4657_v15 = vpop.eup %4656 }
 0x4b6   :  { %v4659_v19 = vpop.eup %4658  ;;  %v1212_v25 = vmul.f32 %v4657_v15, %v1210_v16  ;;  %v414_v15 = vadd.f32 %v5386_v63, %v5427_v22 }
 0x4b7   :  { %v4661_v23 = vpop.eup %4660  ;;  %v1205_v50 = vadd.f32 1.0, %v4659_v19 }
 0x4b8   :  { %v1214_v26 = vadd.f32 %v1212_v25, %v5439_v27  ;;  %v1213_v42 = vmul.f32 %v4661_v23, %v1211_v21  ;;  %v416_v23 = vadd.f32 %v5388_v1, %v5452_v41 }
 0x4ba   :  { %4662 = vtanh.f32 %v1214_v26  ;;  %v1215_v47 = vadd.f32 %v1213_v42, %v5445_v36 }
 0x4bb   :  { %4664 = vrcp.f32 %v1204_v24 }
 0x4bc   :  { %4666 = vtanh.f32 %v1215_v47 }
 0x4bd   :  { %4668 = vrcp.f32 %v1205_v50 }
 0x4c4   :  { %v4663_v3 = vpop.eup %4662 }
 0x4c5   :  { %v4665_v20 = vpop.eup %4664  ;;  %v1218_v45 = vsub.f32 %v5600_v29, %v4663_v3  ;;  %v5717_v29 = vld [vmem:[#allocation5 + $0x10] sm:$0xff] }
 0x4c6   :  { %v4667_v46 = vpop.eup %4666 }
 0x4c7   :  { %v1219_v14 = vsub.f32 %v5602_v0, %v4667_v46  ;;  %v1220_v7 = vmul.f32 %v4665_v20, %v1218_v45  ;;  %v4669_v44 = vpop.eup %4668  ;;  %v5721_v0 = vld [vmem:[#allocation5 + $0x28] sm:$0xff] }
 0x4c9   :  { %v1221_v11 = vmul.f32 %v4669_v44, %v1219_v14  ;;  %v5688_v9 = vadd.f32 %v4663_v3, %v1220_v7 }
 0x4cb   :  { %v5690_v27 = vadd.f32 %v4667_v46, %v1221_v11 }
 0x4cd   :  { %v5694_v36 = vpack.c.bf16 %v5690_v27, %v5688_v9 }
 0x4cf   :  { %1289 = vmatmul.mubr.bf16.vlgmr.msra.gmra.mrb[16].mxu0 %v5694_v36  ;;  %4122 = vmatmul.mubr.bf16.vlgmr.msra.gmra.mrb[48].mxu1 %v5694_v36 }
 0x4d0   :  { %1415 = vmatpush1.bf16.msra.mxu0 %v5632_v54  ;;  %1446 = vmatprep.mubr.bf16.mxu0 %v6617_v49 }
 0x4d1   :  { %1416 = vmatprep.subr.bf16.mxu0 %v5635_v55  ;;  %4141 = vmatprep.mubr.msk.bf16.mxu1 %vm5071_vm0, %v6616_v48 }
 0x4d2   :  { %4126 = vmatpush3.bf16.msra.mxu1 %v5717_v29 }
 0x4d3   :  { %4127 = vmatprep.subr.bf16.mxu1 %v6616_v48 }
 0x4d4   :  { %1417 = vmatpush1.bf16.msra.mxu0 %v5638_v56 }
 0x4d5   :  { %1418 = vmatprep.subr.bf16.mxu0 %v5641_v57 }
 0x4d6   :  { %4128 = vmatpush3.bf16.msra.mxu1 %v5721_v0 }
 0x4d7   :  { %4129 = vmatprep.subr.bf16.mxu1 %v6616_v48 }
 0x4d8   :  { %1419 = vmatpush1.bf16.msra.mxu0 %v5644_v58 }
 0x4d9   :  { %1420 = vmatprep.subr.bf16.mxu0 %v5647_v59 }
 0x4da   :  { %4130 = vmatpush3.bf16.msra.mxu1 %v5725_v17 }
 0x4db   :  { %4131 = vmatprep.subr.bf16.mxu1 %v6616_v48 }
 0x4dc   :  { %1421 = vmatpush1.bf16.msra.mxu0 %v5650_v60 }
 0x4dd   :  { %1422 = vmatprep.subr.bf16.mxu0 %v5653_v4 }
 0x4de   :  { %4132 = vmatpush3.bf16.msra.mxu1 %v5729_v13 }
 0x4df   :  { %4133 = vmatprep.subr.bf16.mxu1 %v6616_v48 }
 0x4e0   :  { %1423 = vmatpush1.bf16.msra.mxu0 %v5656_v28 }
 0x4e1   :  { %1424 = vmatprep.subr.bf16.mxu0 %v5658_v31 }
 0x4e2   :  { %4134 = vmatpush3.bf16.msra.mxu1 %v5733_v12 }
 0x4e3   :  { %4135 = vmatprep.subr.bf16.mxu1 %v6616_v48 }
 0x4e4   :  { %1425 = vmatpush1.bf16.msra.mxu0 %v5662_v32 }
 0x4e5   :  { %1426 = vmatprep.subr.bf16.mxu0 %v5664_v34 }
 0x4e6   :  { %4136 = vmatpush3.bf16.msra.mxu1 %v5737_v18 }
 0x4e7   :  { %4137 = vmatprep.subr.bf16.mxu1 %v6616_v48 }
 0x4e8   :  { %1427 = vmatpush1.bf16.msra.mxu0 %v5668_v37 }
 0x4e9   :  { %1428 = vmatprep.subr.bf16.mxu0 %v5670_v39 }
 0x4ea   :  { %4138 = vmatpush3.bf16.msra.mxu1 %v5741_v51 }
 0x4eb   :  { %4139 = vmatprep.subr.bf16.mxu1 %v6616_v48 }
 0x4ec   :  { %1429 = vmatpush1.bf16.msra.mxu0 %v5674_v40 }
 0x4ed   :  { %1572 = vmatprep.subr.bf16.mxu0 %v5629_v53 }
 0x4ee   :  { %4140 = vmatpush3.bf16.msra.mxu1 %v5745_v33 }
 0x4ef   :  { %4145 = vmatprep.subr.bf16.mxu1 %v6616_v48 }
 0x5a2   :  { %v1290_v8 = vpop.f32.mrb[16].mxu0  ;;  %v1333_v16 = vpop.f32.mrb[48].mxu1 }
 0x5a3   :  { %v1340_v19 = vadd.f32 %v1290_v8, %v410_v38  ;;  %v1292_v25 = vpop.f32.mrb[17].mxu0  ;;  %v4123_v21 = vpop.f32.mrb[49].mxu1  ;;  %v1368_v11 = vadd.f32 %v5483_v10, %v1333_v16 }
 0x5a4   :  { %v1354_v24 = vadd.f32 %v1292_v25, %v412_v5  ;;  %v1294_v26 = vpop.f32.mrb[18].mxu0  ;;  %v1336_v42 = vpop.f32.mrb[50].mxu1 }
 0x5a5   :  { %v3737_v47 = vmul.f32 -1.442695, %v1340_v19  ;;  %v1341_v50 = vadd.f32 %v1294_v26, %v414_v15  ;;  %v1296_v61 = vpop.f32.mrb[19].mxu0  ;;  %v4124_v3 = vpop.f32.mrb[51].mxu1  ;;  %v1369_v15 = vadd.f32 %v5483_v10, %v1336_v42 }
 0x5a6   :  { %v1355_v20 = vadd.f32 %v1296_v61, %v416_v23  ;;  %v3739_v45 = vmul.f32 -1.442695, %v1354_v24 }
 0x5a7   :  { %4670 = vpow2.f32 %v3737_v47  ;;  %v3738_v62 = vmul.f32 -1.442695, %v1341_v50 }
 0x5a8   :  { %v3740_v63 = vmul.f32 -1.442695, %v1355_v20 }
 0x5a9   :  { %4672 = vpow2.f32 %v3738_v62 }
 0x5aa   :  { %4674 = vpow2.f32 %v3739_v45 }
 0x5b1   :  { %v4671_v46 = vpop.eup %4670 }
 0x5b2   :  { %v1348_v14 = vadd.f32 1.0, %v4671_v46 }
 0x5b3   :  { %v4673_v7 = vpop.eup %4672 }
 0x5b4   :  { %4676 = vrcp.f32 %v1348_v14  ;;  %v1349_v44 = vadd.f32 1.0, %v4673_v7  ;;  %v4675_v1 = vpop.eup %4674  ;;  %v6619_v7 = vld [vmem:[#allocation33_spill] sm:$0xff] }
 0x5b5   :  { %4678 = vpow2.f32 %v3740_v63  ;;  %v1362_v25 = vadd.f32 1.0, %v4675_v1 }
 0x5b6   :  { %4680 = vrcp.f32 %v1349_v44  ;;  %v424_v44 = vadd.f32 %v6619_v7, %v5427_v22 }
 0x5be   :  { %v4677_v38 = vpop.eup %4676 }
 0x5bf   :  { %v4679_v5 = vpop.eup %4678  ;;  %v1370_v8 = vmul.f32 %v4677_v38, %v1368_v11 }
 0x5c0   :  { %v4681_v19 = vpop.eup %4680  ;;  %v1363_v26 = vadd.f32 1.0, %v4679_v5  ;;  %v6620_v5 = vld [vmem:[#allocation34_spill] sm:$0xff] }
 0x5c1   :  { %v1372_v21 = vadd.f32 %v1370_v8, %v5460_v30  ;;  %v1371_v23 = vmul.f32 %v4681_v19, %v1369_v15  ;;  %v426_v8 = vadd.f32 %v6620_v5, %v5452_v41  ;;  %v6622_v5 = vld [vmem:[#allocation45_spill] sm:$0xff] }
 0x5c3   :  { %4682 = vtanh.f32 %v1372_v21  ;;  %v1373_v24 = vadd.f32 %v1371_v23, %v5466_v35 }
 0x5c4   :  { %4684 = vrcp.f32 %v1362_v25 }
 0x5c5   :  { %4686 = vtanh.f32 %v1373_v24 }
 0x5c6   :  { %4688 = vrcp.f32 %v1363_v26 }
 0x5cd   :  { %v4683_v47 = vpop.eup %4682 }
 0x5ce   :  { %v4685_v50 = vpop.eup %4684  ;;  %v1376_v16 = vsub.f32 %v5688_v9, %v4683_v47  ;;  %v420_v9 = vadd.f32 %v5390_v2, %v5427_v22 }
 0x5cf   :  { %v4687_v61 = vpop.eup %4686 }
 0x5d0   :  { %v1377_v3 = vsub.f32 %v5690_v27, %v4687_v61  ;;  %v1378_v42 = vmul.f32 %v4685_v50, %v1376_v16  ;;  %v4689_v20 = vpop.eup %4688  ;;  %v6618_v27 = vld [vmem:[#allocation32_spill] sm:$0xff] }
 0x5d1   :  { %v422_v46 = vadd.f32 %v6618_v27, %v5452_v41 }
 0x5d2   :  { %v1379_v62 = vmul.f32 %v4689_v20, %v1377_v3  ;;  %v5763_v45 = vadd.f32 %v4683_v47, %v1378_v42 }
 0x5d4   :  { %v5765_v30 = vadd.f32 %v4687_v61, %v1379_v62 }
 0x5d6   :  { %v5769_v35 = vpack.c.bf16 %v5765_v30, %v5763_v45 }
 0x5d8   :  { %1447 = vmatmul.mubr.bf16.vlgmr.msra.gmra.mrb[20].mxu0 %v5769_v35  ;;  %4142 = vmatmul.mubr.bf16.vlgmr.msra.gmra.mrb[52].mxu1 %v5769_v35 }
 0x5d9   :  { %1573 = vmatpush1.bf16.msra.mxu0 %v5632_v54  ;;  %4146 = vmatpush3.bf16.msra.mxu1 %v5717_v29 }
 0x5da   :  { %1574 = vmatprep.subr.bf16.mxu0 %v5635_v55  ;;  %4147 = vmatprep.subr.bf16.mxu1 %v6616_v48 }
 0x5db   :  { %1604 = vmatprep.mubr.bf16.mxu0 %v6617_v49  ;;  %4161 = vmatprep.mubr.msk.bf16.mxu1 %vm5071_vm0, %v6616_v48 }
 0x5dd   :  { %1575 = vmatpush1.bf16.msra.mxu0 %v5638_v56  ;;  %4148 = vmatpush3.bf16.msra.mxu1 %v5721_v0 }
 0x5de   :  { %1576 = vmatprep.subr.bf16.mxu0 %v5641_v57  ;;  %4149 = vmatprep.subr.bf16.mxu1 %v6616_v48 }
 0x5e1   :  { %1577 = vmatpush1.bf16.msra.mxu0 %v5644_v58  ;;  %4150 = vmatpush3.bf16.msra.mxu1 %v5725_v17 }
 0x5e2   :  { %1578 = vmatprep.subr.bf16.mxu0 %v5647_v59  ;;  %4151 = vmatprep.subr.bf16.mxu1 %v6616_v48 }
 0x5e5   :  { %1579 = vmatpush1.bf16.msra.mxu0 %v5650_v60  ;;  %4152 = vmatpush3.bf16.msra.mxu1 %v5729_v13 }
 0x5e6   :  { %1580 = vmatprep.subr.bf16.mxu0 %v5653_v4  ;;  %4153 = vmatprep.subr.bf16.mxu1 %v6616_v48 }
 0x5e9   :  { %1581 = vmatpush1.bf16.msra.mxu0 %v5656_v28  ;;  %4154 = vmatpush3.bf16.msra.mxu1 %v5733_v12 }
 0x5ea   :  { %1582 = vmatprep.subr.bf16.mxu0 %v5658_v31  ;;  %4155 = vmatprep.subr.bf16.mxu1 %v6616_v48 }
 0x5ed   :  { %1583 = vmatpush1.bf16.msra.mxu0 %v5662_v32  ;;  %4156 = vmatpush3.bf16.msra.mxu1 %v5737_v18 }
 0x5ee   :  { %1584 = vmatprep.subr.bf16.mxu0 %v5664_v34  ;;  %4157 = vmatprep.subr.bf16.mxu1 %v6616_v48 }
 0x5f1   :  { %1585 = vmatpush1.bf16.msra.mxu0 %v5668_v37  ;;  %4158 = vmatpush3.bf16.msra.mxu1 %v5741_v51 }
 0x5f2   :  { %1586 = vmatprep.subr.bf16.mxu0 %v5670_v39  ;;  %4159 = vmatprep.subr.bf16.mxu1 %v6616_v48 }
 0x5f5   :  { %1587 = vmatpush1.bf16.msra.mxu0 %v5674_v40  ;;  %4160 = vmatpush3.bf16.msra.mxu1 %v5745_v33 }
 0x5f6   :  { %1730 = vmatprep.subr.bf16.mxu0 %v5629_v53  ;;  %4165 = vmatprep.subr.bf16.mxu1 %v6616_v48 }
 0x6ab   :  { %v1448_v63 = vpop.f32.mrb[20].mxu0  ;;  %v1491_v14 = vpop.f32.mrb[52].mxu1 }
 0x6ac   :  { %v1498_v1 = vadd.f32 %v1448_v63, %v420_v9  ;;  %v1450_v11 = vpop.f32.mrb[21].mxu0  ;;  %v4143_v38 = vpop.f32.mrb[53].mxu1  ;;  %v1526_v62 = vadd.f32 %v5483_v10, %v1491_v14 }
 0x6ad   :  { %v1512_v53 = vadd.f32 %v1450_v11, %v422_v46  ;;  %v1452_v15 = vpop.f32.mrb[22].mxu0  ;;  %v1494_v19 = vpop.f32.mrb[54].mxu1 }
 0x6ae   :  { %v3741_v25 = vmul.f32 -1.442695, %v1498_v1  ;;  %v1499_v21 = vadd.f32 %v1452_v15, %v424_v44  ;;  %v1454_v2 = vpop.f32.mrb[23].mxu0  ;;  %v4144_v23 = vpop.f32.mrb[55].mxu1  ;;  %v1527_v63 = vadd.f32 %v5483_v10, %v1494_v19  ;;  %v6621_v1 = vld [vmem:[#allocation44_spill] sm:$0xff] }
 0x6af   :  { %v1513_v24 = vadd.f32 %v1454_v2, %v426_v8  ;;  %v3743_v47 = vmul.f32 -1.442695, %v1512_v53 }
 0x6b0   :  { %4690 = vpow2.f32 %v3741_v25  ;;  %v3742_v26 = vmul.f32 -1.442695, %v1499_v21 }
 0x6b1   :  { %v3744_v16 = vmul.f32 -1.442695, %v1513_v24 }
 0x6b2   :  { %4692 = vpow2.f32 %v3742_v26 }
 0x6b3   :  { %4694 = vpow2.f32 %v3743_v47 }
 0x6ba   :  { %v4691_v50 = vpop.eup %4690 }
 0x6bb   :  { %v1506_v61 = vadd.f32 1.0, %v4691_v50 }
 0x6bc   :  { %v4693_v3 = vpop.eup %4692 }
 0x6bd   :  { %4696 = vrcp.f32 %v1506_v61  ;;  %v1507_v42 = vadd.f32 1.0, %v4693_v3  ;;  %v4695_v20 = vpop.eup %4694 }
 0x6be   :  { %4698 = vpow2.f32 %v3744_v16  ;;  %v1520_v44 = vadd.f32 1.0, %v4695_v20 }
 0x6bf   :  { %4700 = vrcp.f32 %v1507_v42  ;;  %v5876_v42 = vld [vmem:[%s6584_s5] ss:$0 sm:$0xff] }
 0x6c7   :  { %v4697_v9 = vpop.eup %4696 }
 0x6c8   :  { %v4699_v27 = vpop.eup %4698  ;;  %v1528_v46 = vmul.f32 %v4697_v9, %v1526_v62 }
 0x6c9   :  { %v4701_v7 = vpop.eup %4700  ;;  %v1521_v53 = vadd.f32 1.0, %v4699_v27 }
 0x6ca   :  { %v1530_v11 = vadd.f32 %v1528_v46, %v6621_v1  ;;  %v1529_v38 = vmul.f32 %v4701_v7, %v1527_v63 }
 0x6cc   :  { %4702 = vtanh.f32 %v1530_v11  ;;  %v1531_v8 = vadd.f32 %v1529_v38, %v6622_v5  ;;  %v6628_v38 = vld [vmem:[#allocation49_spill] sm:$0xff] }
 0x6cd   :  { %4704 = vrcp.f32 %v1520_v44  ;;  %v6627_v44 = vld [vmem:[#allocation47_spill] sm:$0xff] }
 0x6ce   :  { %4706 = vtanh.f32 %v1531_v8 }
 0x6cf   :  { %4708 = vrcp.f32 %v1521_v53 }
 0x6d6   :  { %v4703_v15 = vpop.eup %4702 }
 0x6d7   :  { %v4705_v25 = vpop.eup %4704  ;;  %v1534_v14 = vsub.f32 %v5763_v45, %v4703_v15 }
 0x6d8   :  { %v4707_v21 = vpop.eup %4706 }
 0x6d9   :  { %v1535_v2 = vsub.f32 %v5765_v30, %v4707_v21  ;;  %v1536_v10 = vmul.f32 %v4705_v25, %v1534_v14  ;;  %v4709_v19 = vpop.eup %4708 }
 0x6db   :  { %v1537_v23 = vmul.f32 %v4709_v19, %v1535_v2  ;;  %v5822_v24 = vadd.f32 %v4703_v15, %v1536_v10 }
 0x6dd   :  { %v5824_v26 = vadd.f32 %v4707_v21, %v1537_v23 }
 0x6df   :  { %v5828_v47 = vpack.c.bf16 %v5824_v26, %v5822_v24 }
 0x6e1   :  { %1605 = vmatmul.mubr.bf16.vlgmr.msra.gmra.mrb[24].mxu0 %v5828_v47  ;;  %4162 = vmatmul.mubr.bf16.vlgmr.msra.gmra.mrb[56].mxu1 %v5828_v47 }
 0x6e2   :  { %1731 = vmatpush1.bf16.msra.mxu0 %v5632_v54  ;;  %4166 = vmatpush3.bf16.msra.mxu1 %v5717_v29  ;;  %v6623_v54 = vld [vmem:[#allocation35_spill] sm:$0xff] }
 0x6e3   :  { %1732 = vmatprep.subr.bf16.mxu0 %v5635_v55  ;;  %4167 = vmatprep.subr.bf16.mxu1 %v6616_v48  ;;  %v430_v55 = vadd.f32 %v6623_v54, %v5427_v22 }
 0x6e4   :  { %1762 = vmatprep.mubr.bf16.mxu0 %v6617_v49  ;;  %4181 = vmatprep.mubr.msk.bf16.mxu1 %vm5071_vm0, %v6616_v48 }
 0x6e6   :  { %1733 = vmatpush1.bf16.msra.mxu0 %v5638_v56  ;;  %4168 = vmatpush3.bf16.msra.mxu1 %v5721_v0  ;;  %v6624_v56 = vld [vmem:[#allocation36_spill] sm:$0xff] }
 0x6e7   :  { %1734 = vmatprep.subr.bf16.mxu0 %v5641_v57  ;;  %4169 = vmatprep.subr.bf16.mxu1 %v6616_v48  ;;  %v432_v57 = vadd.f32 %v6624_v56, %v5452_v41  ;;  %v6629_v56 = vld [vmem:[#allocation40_spill] sm:$0xff] }
 0x6ea   :  { %1735 = vmatpush1.bf16.msra.mxu0 %v5644_v58  ;;  %4170 = vmatpush3.bf16.msra.mxu1 %v5725_v17 }
 0x6eb   :  { %1736 = vmatprep.subr.bf16.mxu0 %v5647_v59  ;;  %4171 = vmatprep.subr.bf16.mxu1 %v6616_v48 }
 0x6ee   :  { %1737 = vmatpush1.bf16.msra.mxu0 %v5650_v60  ;;  %4172 = vmatpush3.bf16.msra.mxu1 %v5729_v13  ;;  %v6625_v60 = vld [vmem:[#allocation37_spill] sm:$0xff] }
 0x6ef   :  { %1738 = vmatprep.subr.bf16.mxu0 %v5653_v4  ;;  %4173 = vmatprep.subr.bf16.mxu1 %v6616_v48  ;;  %v434_v4 = vadd.f32 %v6625_v60, %v5427_v22 }
 0x6f2   :  { %1739 = vmatpush1.bf16.msra.mxu0 %v5656_v28  ;;  %4174 = vmatpush3.bf16.msra.mxu1 %v5733_v12 }
 0x6f3   :  { %1740 = vmatprep.subr.bf16.mxu0 %v5658_v31  ;;  %4175 = vmatprep.subr.bf16.mxu1 %v6616_v48 }
 0x6f6   :  { %1741 = vmatpush1.bf16.msra.mxu0 %v5662_v32  ;;  %4176 = vmatpush3.bf16.msra.mxu1 %v5737_v18 }
 0x6f7   :  { %1742 = vmatprep.subr.bf16.mxu0 %v5664_v34  ;;  %4177 = vmatprep.subr.bf16.mxu1 %v6616_v48  ;;  %v6626_v34 = vld [vmem:[#allocation38_spill] sm:$0xff] }
 0x6fa   :  { %1743 = vmatpush1.bf16.msra.mxu0 %v5668_v37  ;;  %4178 = vmatpush3.bf16.msra.mxu1 %v5741_v51  ;;  %v436_v37 = vadd.f32 %v6626_v34, %v5452_v41  ;;  %v6632_v34 = vld [vmem:[#allocation43_spill] sm:$0xff] }
 0x6fb   :  { %1744 = vmatprep.subr.bf16.mxu0 %v5670_v39  ;;  %4179 = vmatprep.subr.bf16.mxu1 %v6616_v48 }
 0x6fe   :  { %1745 = vmatpush1.bf16.msra.mxu0 %v5674_v40  ;;  %4180 = vmatpush3.bf16.msra.mxu1 %v5745_v33 }
 0x7b4   :  { %v1606_v58 = vpop.f32.mrb[24].mxu0  ;;  %v1649_v59 = vpop.f32.mrb[56].mxu1 }
 0x7b5   :  { %v1656_v28 = vadd.f32 %v1606_v58, %v430_v55  ;;  %v1608_v31 = vpop.f32.mrb[25].mxu0  ;;  %v4163_v32 = vpop.f32.mrb[57].mxu1  ;;  %v1684_v20 = vadd.f32 %v5876_v42, %v1649_v59  ;;  %v6630_v58 = vld [vmem:[#allocation41_spill] sm:$0xff] }
 0x7b6   :  { %v1670_v39 = vadd.f32 %v1608_v31, %v432_v57  ;;  %v1610_v40 = vpop.f32.mrb[26].mxu0  ;;  %v1652_v29 = vpop.f32.mrb[58].mxu1  ;;  %v440_v57 = vadd.f32 %v6629_v56, %v5427_v22 }
 0x7b7   :  { %v3745_v0 = vmul.f32 -1.442695, %v1656_v28  ;;  %v1657_v17 = vadd.f32 %v1610_v40, %v434_v4  ;;  %v1612_v13 = vpop.f32.mrb[27].mxu0  ;;  %v4164_v12 = vpop.f32.mrb[59].mxu1  ;;  %v1685_v46 = vadd.f32 %v5876_v42, %v1652_v29 }
 0x7b8   :  { %v1671_v18 = vadd.f32 %v1612_v13, %v436_v37  ;;  %v3747_v33 = vmul.f32 -1.442695, %v1670_v39  ;;  %v446_v37 = vadd.f32 %v6632_v34, %v5452_v41 }
 0x7b9   :  { %4710 = vpow2.f32 %v3745_v0  ;;  %v3746_v51 = vmul.f32 -1.442695, %v1657_v17 }
 0x7ba   :  { %v3748_v30 = vmul.f32 -1.442695, %v1671_v18 }
 0x7bb   :  { %4712 = vpow2.f32 %v3746_v51 }
 0x7bc   :  { %4714 = vpow2.f32 %v3747_v33 }
 0x7c3   :  { %v4711_v45 = vpop.eup %4710 }
 0x7c4   :  { %v1664_v50 = vadd.f32 1.0, %v4711_v45 }
 0x7c5   :  { %v4713_v16 = vpop.eup %4712 }
 0x7c6   :  { %4716 = vrcp.f32 %v1664_v50  ;;  %v1665_v61 = vadd.f32 1.0, %v4713_v16  ;;  %v4715_v3 = vpop.eup %4714 }
 0x7c7   :  { %4718 = vpow2.f32 %v3748_v30  ;;  %v1678_v7 = vadd.f32 1.0, %v4715_v3 }
 0x7c8   :  { %4720 = vrcp.f32 %v1665_v61 }
 0x7d0   :  { %v4717_v62 = vpop.eup %4716 }
 0x7d1   :  { %v4719_v9 = vpop.eup %4718  ;;  %v1686_v27 = vmul.f32 %v4717_v62, %v1684_v20 }
 0x7d2   :  { %v4721_v63 = vpop.eup %4720  ;;  %v1679_v8 = vadd.f32 1.0, %v4719_v9 }
 0x7d3   :  { %v1688_v1 = vadd.f32 %v1686_v27, %v6627_v44  ;;  %v1687_v11 = vmul.f32 %v4721_v63, %v1685_v46  ;;  %v6633_v63 = vld [vmem:[#allocation46_spill] sm:$0xff] }
 0x7d5   :  { %4722 = vtanh.f32 %v1688_v1  ;;  %v1689_v5 = vadd.f32 %v1687_v11, %v6628_v38  ;;  %v6634_v1 = vld [vmem:[#allocation48_spill] sm:$0xff] }
 0x7d6   :  { %4724 = vrcp.f32 %v1678_v7 }
 0x7d7   :  { %4726 = vtanh.f32 %v1689_v5 }
 0x7d8   :  { %4728 = vrcp.f32 %v1679_v8 }
 0x7df   :  { %v4723_v53 = vpop.eup %4722 }
 0x7e0   :  { %v4725_v15 = vpop.eup %4724  ;;  %v1692_v25 = vsub.f32 %v5822_v24, %v4723_v53  ;;  %v442_v24 = vadd.f32 %v6630_v58, %v5452_v41 }
 0x7e1   :  { %v4727_v14 = vpop.eup %4726 }
 0x7e2   :  { %v1693_v21 = vsub.f32 %v5824_v26, %v4727_v14  ;;  %v1694_v2 = vmul.f32 %v4725_v15, %v1692_v25  ;;  %v4729_v10 = vpop.eup %4728  ;;  %v6631_v26 = vld [vmem:[#allocation42_spill] sm:$0xff] }
 0x7e3   :  { %v444_v4 = vadd.f32 %v6631_v26, %v5427_v22 }
 0x7e4   :  { %v1695_v19 = vmul.f32 %v4729_v10, %v1693_v21  ;;  %v1696_v23 = vadd.f32 %v4723_v53, %v1694_v2 }
 0x7e6   :  { %v1697_v54 = vadd.f32 %v4727_v14, %v1695_v19 }
 0x7e8   :  { %v5884_v55 = vpack.c.bf16 %v1697_v54, %v1696_v23 }
 0x7ea   :  { %1763 = vmatmul.mubr.bf16.vlgmr.msra.gmra.mrb[28].mxu0 %v5884_v55  ;;  %4182 = vmatmul.mubr.bf16.vlgmr.msra.gmra.mrb[60].mxu1 %v5884_v55 }
 0x8bd   :  { %v1764_v59 = vpop.f32.mrb[28].mxu0  ;;  %v1807_v60 = vpop.f32.mrb[60].mxu1 }
 0x8be   :  { %v1814_v28 = vadd.f32 %v1764_v59, %v440_v57  ;;  %v1766_v31 = vpop.f32.mrb[29].mxu0  ;;  %v4183_v32 = vpop.f32.mrb[61].mxu1  ;;  %v1842_v61 = vadd.f32 %v5876_v42, %v1807_v60 }
 0x8bf   :  { %v1828_v39 = vadd.f32 %v1766_v31, %v442_v24  ;;  %v1768_v40 = vpop.f32.mrb[30].mxu0  ;;  %v1810_v29 = vpop.f32.mrb[62].mxu1 }
 0x8c0   :  { %v3749_v0 = vmul.f32 -1.442695, %v1814_v28  ;;  %v1815_v17 = vadd.f32 %v1768_v40, %v444_v4  ;;  %v1770_v13 = vpop.f32.mrb[31].mxu0  ;;  %v4184_v12 = vpop.f32.mrb[63].mxu1  ;;  %v1843_v9 = vadd.f32 %v5876_v42, %v1810_v29 }
 0x8c1   :  { %v1829_v18 = vadd.f32 %v1770_v13, %v446_v37  ;;  %v3751_v33 = vmul.f32 -1.442695, %v1828_v39 }
 0x8c2   :  { %4730 = vpow2.f32 %v3749_v0  ;;  %v3750_v51 = vmul.f32 -1.442695, %v1815_v17 }
 0x8c3   :  { %v3752_v22 = vmul.f32 -1.442695, %v1829_v18 }
 0x8c4   :  { %4732 = vpow2.f32 %v3750_v51 }
 0x8c5   :  { %4734 = vpow2.f32 %v3751_v33 }
 0x8cc   :  { %v4731_v45 = vpop.eup %4730 }
 0x8cd   :  { %v1822_v30 = vadd.f32 1.0, %v4731_v45 }
 0x8ce   :  { %v4733_v50 = vpop.eup %4732 }
 0x8cf   :  { %4736 = vrcp.f32 %v1822_v30  ;;  %v1823_v16 = vadd.f32 1.0, %v4733_v50  ;;  %v4735_v41 = vpop.eup %4734 }
 0x8d0   :  { %4738 = vpow2.f32 %v3752_v22  ;;  %v1836_v46 = vadd.f32 1.0, %v4735_v41 }
 0x8d1   :  { %4740 = vrcp.f32 %v1823_v16 }
 0x8d9   :  { %v4737_v3 = vpop.eup %4736 }
 0x8da   :  { %v4739_v20 = vpop.eup %4738  ;;  %v1844_v62 = vmul.f32 %v4737_v3, %v1842_v61 }
 0x8db   :  { %v4741_v27 = vpop.eup %4740  ;;  %v1837_v38 = vadd.f32 1.0, %v4739_v20 }
 0x8dc   :  { %v1846_v7 = vadd.f32 %v1844_v62, %v6633_v63  ;;  %v1845_v44 = vmul.f32 %v4741_v27, %v1843_v9 }
 0x8de   :  { %4742 = vtanh.f32 %v1846_v7  ;;  %v1847_v11 = vadd.f32 %v1845_v44, %v6634_v1 }
 0x8df   :  { %4744 = vrcp.f32 %v1836_v46 }
 0x8e0   :  { %4746 = vtanh.f32 %v1847_v11 }
 0x8e1   :  { %4748 = vrcp.f32 %v1837_v38 }
 0x8e8   :  { %v4743_v5 = vpop.eup %4742 }
 0x8e9   :  { %v4745_v8 = vpop.eup %4744  ;;  %v1850_v53 = vsub.f32 %v1696_v23, %v4743_v5 }
 0x8ea   :  { %v4747_v15 = vpop.eup %4746 }
 0x8eb   :  { %v1852_v25 = vmul.f32 %v4745_v8, %v1850_v53  ;;  %v1851_v14 = vsub.f32 %v1697_v54, %v4747_v15  ;;  %v4749_v21 = vpop.eup %4748 }
 0x8ed   :  { %v1854_v42 = vadd.f32 %v4743_v5, %v1852_v25  ;;  %v1853_v2 = vmul.f32 %v4749_v21, %v1851_v14 }
 0x8ef   :  { %1858 = vst [vmem:[#allocation14] sm:$0xff] %v1854_v42  ;;  %v1855_v10 = vadd.f32 %v4747_v15, %v1853_v2 }
 0x8f1   :  { %v5900_v19 = vpack.c.bf16 %v1855_v10, %v1854_v42  ;;  %1859 = vst [vmem:[#allocation14 + $0x8] sm:$0xff] %v1855_v10 }
 0x8f2   :  { %5038 = dma.done.wait [#allocation6 + $0x1], 3072 }
 0x8f3   :  { %5039 = vsyncadd [#allocation6 + $0x1], 4294964224 }
 0x8f4   :  { %5040 = dma.done.wait [#allocation6 + $0x3], 3072 }
 0x8f5   :  { %5041 = vsyncadd [#allocation6 + $0x3], 4294964224  ;;  %1957 = vmatprep.mubr.bf16.mxu1 %v6617_v49  ;;  %4201 = vmatprep.mubr.bf16.mxu0 %v5497_v6  ;;  %v1886_v23 = vld [vmem:[#allocation4 + $0xc8] sm:$0xff]  ;;  %v1885_v56 = vld [vmem:[#allocation4 + $0xc0] sm:$0xff] }
 0x8f6   :  { %v1889_v57 = vld [vmem:[#allocation4 + $0xe0] sm:$0xff]  ;;  %1925 = vmatprep.subr.bf16.mxu1 %v1886_v23  ;;  %v1888_v54 = vld [vmem:[#allocation4 + $0xd8] sm:$0xff]  ;;  %v1891_v24 = vld [vmem:[#allocation4 + $0xf0] sm:$0xff] }
 0x8f7   :  { %1926 = vmatpush1.bf16.msra.mxu1 %v1885_v56  ;;  %v1892_v58 = vld [vmem:[#allocation4 + $0xf8] sm:$0xff]  ;;  %v1887_v59 = vld [vmem:[#allocation4 + $0xd0] sm:$0xff]  ;;  %v1890_v26 = vld [vmem:[#allocation4 + $0xe8] sm:$0xff] }
 0x8f8   :  { %1927 = vmatprep.subr.bf16.mxu1 %v1889_v57  ;;  %v1895_v60 = vld [vmem:[#allocation4 + $0x110] sm:$0xff]  ;;  %4185 = vmatprep.subr.bf16.mxu0 %v1887_v59  ;;  %v1894_v4 = vld [vmem:[#allocation4 + $0x108] sm:$0xff]  ;;  %v1893_v28 = vld [vmem:[#allocation4 + $0x100] sm:$0xff] }
 0x8f9   :  { %4186 = vmatpush3.bf16.msra.mxu0 %v1887_v59  ;;  %v1898_v31 = vld [vmem:[#allocation4 + $0x128] sm:$0xff]  ;;  %v1897_v32 = vld [vmem:[#allocation4 + $0x120] sm:$0xff]  ;;  %v1896_v34 = vld [vmem:[#allocation4 + $0x118] sm:$0xff] }
 0x8fa   :  { %4187 = vmatprep.subr.bf16.mxu0 %v1890_v26  ;;  %v1901_v37 = vld [vmem:[#allocation4 + $0x140] sm:$0xff]  ;;  %v1900_v39 = vld [vmem:[#allocation4 + $0x138] sm:$0xff]  ;;  %v1899_v40 = vld [vmem:[#allocation4 + $0x130] sm:$0xff] }
 0x8fb   :  { %1928 = vmatpush1.bf16.msra.mxu1 %v1888_v54  ;;  %v1904_v29 = vld [vmem:[#allocation4 + $0x158] sm:$0xff]  ;;  %v1903_v0 = vld [vmem:[#allocation4 + $0x150] sm:$0xff]  ;;  %v1902_v17 = vld [vmem:[#allocation4 + $0x148] sm:$0xff] }
 0x8fc   :  { %1929 = vmatprep.subr.bf16.mxu1 %v1892_v58  ;;  %v1907_v13 = vld [vmem:[#allocation4 + $0x170] sm:$0xff]  ;;  %v1906_v12 = vld [vmem:[#allocation4 + $0x168] sm:$0xff]  ;;  %v1905_v18 = vld [vmem:[#allocation4 + $0x160] sm:$0xff] }
 0x8fd   :  { %4188 = vmatpush3.bf16.msra.mxu0 %v1890_v26  ;;  %v5904_v51 = vld [vmem:[#allocation5 + $0xc8] sm:$0xff]  ;;  %v5907_v33 = vld [vmem:[#allocation5 + $0xc0] sm:$0xff]  ;;  %v1908_v22 = vld [vmem:[#allocation4 + $0x178] sm:$0xff] }
 0x8fe   :  { %4189 = vmatprep.subr.bf16.mxu0 %v1893_v28  ;;  %v5909_v45 = vld [vmem:[#allocation5 + $0xe0] sm:$0xff]  ;;  %v5915_v30 = vld [vmem:[#allocation5 + $0xd8] sm:$0xff]  ;;  %v5921_v16 = vld [vmem:[#allocation5 + $0xd0] sm:$0xff] }
 0x8ff   :  { %1930 = vmatpush1.bf16.msra.mxu1 %v1891_v24  ;;  %v5917_v50 = vld [vmem:[#allocation5 + $0xf8] sm:$0xff]  ;;  %v5926_v41 = vld [vmem:[#allocation5 + $0x110] sm:$0xff]  ;;  %v5933_v61 = vld [vmem:[#allocation5 + $0xe8] sm:$0xff] }
 0x900   :  { %1931 = vmatprep.subr.bf16.mxu1 %v1895_v60  ;;  %v5936_v3 = vld [vmem:[#allocation5 + $0x108] sm:$0xff]  ;;  %v5948_v62 = vld [vmem:[#allocation5 + $0x120] sm:$0xff]  ;;  %v5957_v27 = vld [vmem:[#allocation5 + $0x118] sm:$0xff] }
 0x901   :  { %4190 = vmatpush3.bf16.msra.mxu0 %v1893_v28  ;;  %v5939_v20 = vld [vmem:[#allocation5 + $0x128] sm:$0xff]  ;;  %v5950_v9 = vld [vmem:[#allocation5 + $0x140] sm:$0xff]  ;;  %v5960_v46 = vld [vmem:[#allocation5 + $0x138] sm:$0xff] }
 0x902   :  { %4191 = vmatprep.subr.bf16.mxu0 %v1896_v34  ;;  %v5963_v63 = vld [vmem:[#allocation5 + $0x158] sm:$0xff]  ;;  %v5972_v7 = vld [vmem:[#allocation5 + $0x150] sm:$0xff]  ;;  %v5981_v1 = vld [vmem:[#allocation5 + $0x148] sm:$0xff] }
 0x903   :  { %1932 = vmatpush1.bf16.msra.mxu1 %v1894_v4  ;;  %v5974_v44 = vld [vmem:[#allocation5 + $0x170] sm:$0xff]  ;;  %v5984_v11 = vld [vmem:[#allocation5 + $0x168] sm:$0xff]  ;;  %v5999_v38 = vld [vmem:[#allocation5 + $0x178] sm:$0xff] }
 0x904   :  { %1933 = vmatprep.subr.bf16.mxu1 %v1898_v31  ;;  %v6001_v5 = vld [vmem:[#allocation10 + $0x10] sm:$0xff]  ;;  %v6003_v8 = vld [vmem:[#allocation10 + $0x18] sm:$0xff] }
 0x905   :  { %4192 = vmatpush3.bf16.msra.mxu0 %v1896_v34 }
 0x906   :  { %4193 = vmatprep.subr.bf16.mxu0 %v1899_v40 }
 0x907   :  { %1934 = vmatpush1.bf16.msra.mxu1 %v1897_v32 }
 0x908   :  { %1935 = vmatprep.subr.bf16.mxu1 %v1901_v37 }
 0x909   :  { %4194 = vmatpush3.bf16.msra.mxu0 %v1899_v40 }
 0x90a   :  { %4195 = vmatprep.subr.bf16.mxu0 %v1902_v17 }
 0x90b   :  { %1936 = vmatpush1.bf16.msra.mxu1 %v1900_v39 }
 0x90c   :  { %1937 = vmatprep.subr.bf16.mxu1 %v1904_v29 }
 0x90d   :  { %4196 = vmatpush3.bf16.msra.mxu0 %v1902_v17 }
 0x90e   :  { %4197 = vmatprep.subr.bf16.mxu0 %v1905_v18 }
 0x90f   :  { %1938 = vmatpush1.bf16.msra.mxu1 %v1903_v0 }
 0x910   :  { %1939 = vmatprep.subr.bf16.mxu1 %v1907_v13 }
 0x911   :  { %4198 = vmatpush3.bf16.msra.mxu0 %v1905_v18 }
 0x912   :  { %4199 = vmatprep.subr.bf16.mxu0 %v1908_v22 }
 0x913   :  { %1940 = vmatpush1.bf16.msra.mxu1 %v1906_v12 }
 0x914   :  { %2214 = vmatprep.subr.bf16.mxu1 %v5904_v51 }
 0x915   :  { %4200 = vmatpush3.bf16.msra.mxu0 %v1908_v22 }
 0x916   :  { %1958 = vmatmul.mubr.bf16.vlgmr.msra.gmra.mrb[64].mxu1 %v5497_v6  ;;  %4217 = vmatprep.subr.bf16.mxu0 %v6616_v48  ;;  %v5924_v6 = vld [vmem:[#allocation5 + $0xf0] sm:$0xff] }
 0x917   :  { %2215 = vmatpush1.bf16.msra.mxu1 %v5907_v33  ;;  %1967 = vmatprep.mubr.bf16.mxu1 %v6617_v49 }
 0x918   :  { %2216 = vmatprep.subr.bf16.mxu1 %v5909_v45  ;;  %4202 = vmatmul.mubr.bf16.vlgmr.msra.gmra.mrb[32].mxu0 %v5552_v43 }
 0x919   :  { %4218 = vmatpush3.bf16.msra.mxu0 %v5921_v16  ;;  %4205 = vmatprep.mubr.bf16.mxu0 %v5606_v52 }
 0x91a   :  { %4219 = vmatprep.subr.bf16.mxu0 %v6616_v48 }
 0x91b   :  { %2217 = vmatpush1.bf16.msra.mxu1 %v5915_v30 }
 0x91c   :  { %2218 = vmatprep.subr.bf16.mxu1 %v5917_v50 }
 0x91d   :  { %4220 = vmatpush3.bf16.msra.mxu0 %v5933_v61 }
 0x91e   :  { %1968 = vmatmul.mubr.bf16.gmra.mrb[68].mxu1 %v5552_v43  ;;  %4221 = vmatprep.subr.bf16.mxu0 %v6616_v48  ;;  %v5945_v43 = vld [vmem:[#allocation5 + $0x100] sm:$0xff] }
 0x91f   :  { %1977 = vmatprep.mubr.bf16.mxu1 %v6617_v49  ;;  %2219 = vmatpush1.bf16.msra.mxu1 %v5924_v6 }
 0x920   :  { %2220 = vmatprep.subr.bf16.mxu1 %v5926_v41  ;;  %4206 = vmatmul.mubr.bf16.gmra.mrb[36].mxu0 %v5694_v36 }
 0x921   :  { %4222 = vmatpush3.bf16.msra.mxu0 %v5945_v43  ;;  %4209 = vmatprep.mubr.bf16.mxu0 %v5769_v35 }
 0x922   :  { %4223 = vmatprep.subr.bf16.mxu0 %v6616_v48 }
 0x923   :  { %2221 = vmatpush1.bf16.msra.mxu1 %v5936_v3 }
 0x924   :  { %2222 = vmatprep.subr.bf16.mxu1 %v5939_v20 }
 0x925   :  { %4224 = vmatpush3.bf16.msra.mxu0 %v5957_v27 }
 0x926   :  { %1978 = vmatmul.mubr.bf16.gmra.mrb[72].mxu1 %v5606_v52  ;;  %4225 = vmatprep.subr.bf16.mxu0 %v6616_v48  ;;  %v5969_v52 = vld [vmem:[#allocation5 + $0x130] sm:$0xff] }
 0x927   :  { %1987 = vmatprep.mubr.bf16.mxu1 %v6617_v49  ;;  %2223 = vmatpush1.bf16.msra.mxu1 %v5948_v62 }
 0x928   :  { %2224 = vmatprep.subr.bf16.mxu1 %v5950_v9  ;;  %4210 = vmatmul.mubr.bf16.gmra.mrb[40].mxu0 %v5828_v47 }
 0x929   :  { %4226 = vmatpush3.bf16.msra.mxu0 %v5969_v52  ;;  %4213 = vmatprep.mubr.bf16.mxu0 %v5884_v55 }
 0x92a   :  { %4227 = vmatprep.subr.bf16.mxu0 %v6616_v48 }
 0x92b   :  { %2225 = vmatpush1.bf16.msra.mxu1 %v5960_v46 }
 0x92c   :  { %2226 = vmatprep.subr.bf16.mxu1 %v5963_v63 }
 0x92d   :  { %4228 = vmatpush3.bf16.msra.mxu0 %v5981_v1 }
 0x92e   :  { %1988 = vmatmul.mubr.bf16.gmra.mrb[76].mxu1 %v5694_v36  ;;  %4229 = vmatprep.subr.bf16.mxu0 %v6616_v48  ;;  %v5991_v36 = vld [vmem:[#allocation5 + $0x160] sm:$0xff] }
 0x92f   :  { %1997 = vmatprep.mubr.bf16.mxu1 %v6617_v49  ;;  %2227 = vmatpush1.bf16.msra.mxu1 %v5972_v7 }
 0x930   :  { %2228 = vmatprep.subr.bf16.mxu1 %v5974_v44  ;;  %4214 = vmatmul.mubr.bf16.gmra.mrb[44].mxu0 %v5900_v19 }
 0x931   :  { %4230 = vmatpush3.bf16.msra.mxu0 %v5991_v36  ;;  %4233 = vmatprep.mubr.msk.bf16.mxu0 %vm5071_vm0, %v6616_v48 }
 0x932   :  { %4231 = vmatprep.subr.bf16.mxu0 %v6616_v48 }
 0x933   :  { %2229 = vmatpush1.bf16.msra.mxu1 %v5984_v11 }
 0x934   :  { %2372 = vmatprep.subr.bf16.mxu1 %v5904_v51 }
 0x935   :  { %4232 = vmatpush3.bf16.msra.mxu0 %v5999_v38 }
 0x936   :  { %1998 = vmatmul.mubr.bf16.gmra.mrb[80].mxu1 %v5769_v35  ;;  %v2189_v35 = vpack.c.bf16 %v6003_v8, %v6001_v5  ;;  %4237 = vmatprep.subr.bf16.mxu0 %v6616_v48 }
 0x937   :  { %2007 = vmatprep.mubr.bf16.mxu1 %v6617_v49 }
 0x938   :  { %4234 = vmatmul.mubr.bf16.vlgmr.msra.gmra.mrb[48].mxu0 %v2189_v35 }
 0x939   :  { %4238 = vmatpush3.bf16.msra.mxu0 %v5921_v16  ;;  %4253 = vmatprep.mubr.msk.bf16.mxu0 %vm5071_vm0, %v6616_v48 }
 0x93a   :  { %4239 = vmatprep.subr.bf16.mxu0 %v6616_v48 }
 0x93d   :  { %4240 = vmatpush3.bf16.msra.mxu0 %v5933_v61 }
 0x93e   :  { %2008 = vmatmul.mubr.bf16.gmra.mrb[84].mxu1 %v5828_v47  ;;  %4241 = vmatprep.subr.bf16.mxu0 %v6616_v48  ;;  %v3753_v47 = vld [vmem:[%s6583_s4 + $0x3] sm:$0x7] }
 0x93f   :  { %2017 = vmatprep.mubr.bf16.mxu1 %v6617_v49 }
 0x941   :  { %4242 = vmatpush3.bf16.msra.mxu0 %v5945_v43 }
 0x942   :  { %4243 = vmatprep.subr.bf16.mxu0 %v6616_v48 }
 0x945   :  { %4244 = vmatpush3.bf16.msra.mxu0 %v5957_v27 }
 0x946   :  { %2018 = vmatmul.mubr.bf16.gmra.mrb[88].mxu1 %v5884_v55  ;;  %4245 = vmatprep.subr.bf16.mxu0 %v6616_v48  ;;  %v6635_v55 = vld [vmem:[#allocation39_spill] sm:$0xff] }
 0x947   :  { %2027 = vmatprep.mubr.bf16.mxu1 %v6617_v49  ;;  %v6636_v53 = vsub.s32 2, %v6635_v55 }
 0x949   :  { %4246 = vmatpush3.bf16.msra.mxu0 %v5969_v52  ;;  %v6057_v15 = vrot.slane %v3753_v47, %v6636_v53 }
 0x94a   :  { %4247 = vmatprep.subr.bf16.mxu0 %v6616_v48 }
 0x94d   :  { %4248 = vmatpush3.bf16.msra.mxu0 %v5981_v1 }
 0x94e   :  { %2028 = vmatmul.mubr.bf16.gmra.mrb[92].mxu1 %v5900_v19  ;;  %4249 = vmatprep.subr.bf16.mxu0 %v6616_v48 }
 0x94f   :  { %2246 = vmatprep.mubr.bf16.mxu1 %v6617_v49 }
 0x951   :  { %4250 = vmatpush3.bf16.msra.mxu0 %v5991_v36 }
 0x952   :  { %4251 = vmatprep.subr.bf16.mxu0 %v6616_v48 }
 0x955   :  { %4252 = vmatpush3.bf16.msra.mxu0 %v5999_v38 }
 0x956   :  { %2247 = vmatmul.mubr.bf16.vlgmr.msra.gmra.mrb[64].mxu1 %v2189_v35  ;;  %4257 = vmatprep.subr.bf16.mxu0 %v6616_v48 }
 0x957   :  { %2373 = vmatpush1.bf16.msra.mxu1 %v5907_v33  ;;  %2404 = vmatprep.mubr.bf16.mxu1 %v6617_v49 }
 0x958   :  { %2374 = vmatprep.subr.bf16.mxu1 %v5909_v45 }
 0x95b   :  { %2375 = vmatpush1.bf16.msra.mxu1 %v5915_v30 }
 0x95c   :  { %2376 = vmatprep.subr.bf16.mxu1 %v5917_v50 }
 0x95f   :  { %2377 = vmatpush1.bf16.msra.mxu1 %v5924_v6 }
 0x960   :  { %2378 = vmatprep.subr.bf16.mxu1 %v5926_v41 }
 0x963   :  { %2379 = vmatpush1.bf16.msra.mxu1 %v5936_v3 }
 0x964   :  { %2380 = vmatprep.subr.bf16.mxu1 %v5939_v20 }
 0x967   :  { %2381 = vmatpush1.bf16.msra.mxu1 %v5948_v62 }
 0x968   :  { %2382 = vmatprep.subr.bf16.mxu1 %v5950_v9 }
 0x96b   :  { %2383 = vmatpush1.bf16.msra.mxu1 %v5960_v46 }
 0x96c   :  { %2384 = vmatprep.subr.bf16.mxu1 %v5963_v63 }
 0x96f   :  { %2385 = vmatpush1.bf16.msra.mxu1 %v5972_v7 }
 0x970   :  { %2386 = vmatprep.subr.bf16.mxu1 %v5974_v44 }
 0x973   :  { %2387 = vmatpush1.bf16.msra.mxu1 %v5984_v11 }
 0x974   :  { %2530 = vmatprep.subr.bf16.mxu1 %v5904_v51 }
 0x9eb   :  { %v4203_v25 = vpop.f32.mrb[32].mxu0 }
 0x9ec   :  { %v6060_v14 = vadd.f32 %v4203_v25, %v6057_v15  ;;  %v2072_v21 = vpop.f32.mrb[33].mxu0 }
 0x9ed   :  { %v4204_v42 = vpop.f32.mrb[34].mxu0 }
 0x9ee   :  { %v6063_v2 = vadd.f32 %v4204_v42, %v6057_v15  ;;  %v6065_v10 = vpop.f32.mrb[35].mxu0  ;;  %v6640_v42 = vsub.s32 0, %v6635_v55 }
 0x9f3   :  { %v4207_v19 = vpop.f32.mrb[36].mxu0 }
 0x9f4   :  { %v6068_v23 = vadd.f32 %v4207_v19, %v6057_v15  ;;  %v2088_v56 = vpop.f32.mrb[37].mxu0  ;;  %v6105_v19 = vrot.slane %v3753_v47, %v6640_v42 }
 0x9f5   :  { %v6071_v57 = vadd.f32 %v2088_v56, %v6057_v15  ;;  %v4208_v54 = vpop.f32.mrb[38].mxu0 }
 0x9f6   :  { %v6074_v58 = vadd.f32 %v4208_v54, %v6057_v15  ;;  %v2091_v24 = vpop.f32.mrb[39].mxu0 }
 0x9f7   :  { %v6077_v59 = vadd.f32 %v2091_v24, %v6057_v15 }
 0x9fb   :  { %v4211_v60 = vpop.f32.mrb[40].mxu0 }
 0x9fc   :  { %v6080_v26 = vadd.f32 %v4211_v60, %v6057_v15  ;;  %v2104_v4 = vpop.f32.mrb[41].mxu0 }
 0x9fd   :  { %v6083_v28 = vadd.f32 %v2104_v4, %v6057_v15  ;;  %v4212_v31 = vpop.f32.mrb[42].mxu0 }
 0x9fe   :  { %v6086_v32 = vadd.f32 %v4212_v31, %v6057_v15  ;;  %v2107_v34 = vpop.f32.mrb[43].mxu0 }
 0x9ff   :  { %v6089_v37 = vadd.f32 %v2107_v34, %v6057_v15 }
 0xa03   :  { %v4215_v39 = vpop.f32.mrb[44].mxu0 }
 0xa04   :  { %v6092_v40 = vadd.f32 %v4215_v39, %v6057_v15  ;;  %v2120_v29 = vpop.f32.mrb[45].mxu0  ;;  %v6641_v39 = vsub.s32 1, %v6635_v55 }
 0xa05   :  { %v6095_v0 = vadd.f32 %v2120_v29, %v6057_v15  ;;  %v4216_v17 = vpop.f32.mrb[46].mxu0 }
 0xa06   :  { %6637 = vst [vmem:[#allocation32_spill] sm:$0xff] %v6092_v40  ;;  %v6098_v13 = vadd.f32 %v4216_v17, %v6057_v15  ;;  %v2123_v12 = vpop.f32.mrb[47].mxu0  ;;  %v6111_v29 = vrot.slane %v3753_v47, %v6641_v39  ;;  %v6118_v47 = vld [vmem:[%s6584_s5 + $0x1] ss:$0 sm:$0xff] }
 0xa07   :  { %v6101_v18 = vadd.f32 %v2123_v12, %v6057_v15 }
 0xa08   :  { %6638 = vst [vmem:[#allocation33_spill] sm:$0xff] %v6098_v13 }
 0xa09   :  { %6639 = vst [vmem:[#allocation34_spill] sm:$0xff] %v6101_v18 }
 0xa0b   :  { %v2291_v22 = vpop.f32.mrb[48].mxu0 }
 0xa0c   :  { %v4235_v35 = vpop.f32.mrb[49].mxu0  ;;  %v2326_v55 = vadd.f32 %v6118_v47, %v2291_v22 }
 0xa0d   :  { %v2294_v53 = vpop.f32.mrb[50].mxu0 }
 0xa0e   :  { %v4236_v25 = vpop.f32.mrb[51].mxu0  ;;  %v2327_v39 = vadd.f32 %v6118_v47, %v2294_v53 }
 0xa29   :  { %v2248_v56 = vpop.f32.mrb[64].mxu1 }
 0xa2a   :  { %v4473_v54 = vadd.f32 %v2248_v56, %v6105_v19  ;;  %v2250_v24 = vpop.f32.mrb[65].mxu1 }
 0xa2b   :  { %v2252_v60 = vpop.f32.mrb[66].mxu1  ;;  %v4474_v12 = vadd.f32 %v2250_v24, %v6111_v29 }
 0xa2c   :  { %v3756_v4 = vmul.f32 -1.442695, %v4473_v54  ;;  %v4475_v31 = vadd.f32 %v2252_v60, %v6105_v19  ;;  %v2254_v34 = vpop.f32.mrb[67].mxu1 }
 0xa2d   :  { %v4476_v35 = vadd.f32 %v2254_v34, %v6111_v29  ;;  %v3758_v25 = vmul.f32 -1.442695, %v4474_v12 }
 0xa2e   :  { %4759 = vpow2.f32 %v3756_v4  ;;  %v3757_v17 = vmul.f32 -1.442695, %v4475_v31  ;;  %v2073_v31 = vadd.f32 %v2072_v21, %v6057_v15 }
 0xa2f   :  { %v3759_v56 = vmul.f32 -1.442695, %v4476_v35 }
 0xa30   :  { %4761 = vpow2.f32 %v3757_v17 }
 0xa31   :  { %4763 = vpow2.f32 %v3758_v25 }
 0xa38   :  { %v4760_v42 = vpop.eup %4759 }
 0xa39   :  { %v2306_v13 = vadd.f32 1.0, %v4760_v42 }
 0xa3a   :  { %v4762_v40 = vpop.eup %4761 }
 0xa3b   :  { %4765 = vrcp.f32 %v2306_v13  ;;  %v2307_v54 = vadd.f32 1.0, %v4762_v40  ;;  %v4764_v24 = vpop.eup %4763  ;;  %v2076_v40 = vadd.f32 %v6065_v10, %v6057_v15 }
 0xa3c   :  { %4767 = vpow2.f32 %v3759_v56  ;;  %v2320_v13 = vadd.f32 1.0, %v4764_v24 }
 0xa3d   :  { %4769 = vrcp.f32 %v2307_v54 }
 0xa45   :  { %v4766_v60 = vpop.eup %4765 }
 0xa46   :  { %v4768_v4 = vpop.eup %4767  ;;  %v2328_v34 = vmul.f32 %v4766_v60, %v2326_v55 }
 0xa47   :  { %v4770_v17 = vpop.eup %4769  ;;  %v2321_v25 = vadd.f32 1.0, %v4768_v4 }
 0xa48   :  { %v2330_v12 = vadd.f32 %v2328_v34, %v2073_v31  ;;  %v2329_v35 = vmul.f32 %v4770_v17, %v2327_v39 }
 0xa4a   :  { %4771 = vtanh.f32 %v2330_v12  ;;  %v2331_v42 = vadd.f32 %v2329_v35, %v2076_v40 }
 0xa4b   :  { %4773 = vrcp.f32 %v2320_v13 }
 0xa4c   :  { %4775 = vtanh.f32 %v2331_v42 }
 0xa4d   :  { %4777 = vrcp.f32 %v2321_v25 }
 0xa54   :  { %v4772_v22 = vpop.eup %4771 }
 0xa55   :  { %v4774_v56 = vpop.eup %4773  ;;  %v2334_v21 = vsub.f32 %v6001_v5, %v4772_v22 }
 0xa56   :  { %v4776_v54 = vpop.eup %4775 }
 0xa57   :  { %v2335_v53 = vsub.f32 %v6003_v8, %v4776_v54  ;;  %v2336_v55 = vmul.f32 %v4774_v56, %v2334_v21  ;;  %v4778_v24 = vpop.eup %4777 }
 0xa59   :  { %v2337_v60 = vmul.f32 %v4778_v24, %v2335_v53  ;;  %v6127_v18 = vadd.f32 %v4772_v22, %v2336_v55 }
 0xa5b   :  { %v6129_v15 = vadd.f32 %v4776_v54, %v2337_v60 }
 0xa5d   :  { %v6133_v10 = vpack.c.bf16 %v6129_v15, %v6127_v18 }
 0xa5f   :  { %2405 = vmatmul.mubr.bf16.vlgmr.msra.gmra.mrb[68].mxu1 %v6133_v10  ;;  %4254 = vmatmul.mubr.bf16.vlgmr.msra.gmra.mrb[52].mxu0 %v6133_v10 }
 0xa60   :  { %2531 = vmatpush1.bf16.msra.mxu1 %v5907_v33  ;;  %4258 = vmatpush3.bf16.msra.mxu0 %v5921_v16 }
 0xa61   :  { %2532 = vmatprep.subr.bf16.mxu1 %v5909_v45  ;;  %4259 = vmatprep.subr.bf16.mxu0 %v6616_v48 }
 0xa62   :  { %2562 = vmatprep.mubr.bf16.mxu1 %v6617_v49  ;;  %4273 = vmatprep.mubr.msk.bf16.mxu0 %vm5071_vm0, %v6616_v48 }
 0xa64   :  { %2533 = vmatpush1.bf16.msra.mxu1 %v5915_v30  ;;  %4260 = vmatpush3.bf16.msra.mxu0 %v5933_v61 }
 0xa65   :  { %2534 = vmatprep.subr.bf16.mxu1 %v5917_v50  ;;  %4261 = vmatprep.subr.bf16.mxu0 %v6616_v48 }
 0xa68   :  { %2535 = vmatpush1.bf16.msra.mxu1 %v5924_v6  ;;  %4262 = vmatpush3.bf16.msra.mxu0 %v5945_v43 }
 0xa69   :  { %2536 = vmatprep.subr.bf16.mxu1 %v5926_v41  ;;  %4263 = vmatprep.subr.bf16.mxu0 %v6616_v48 }
 0xa6c   :  { %2537 = vmatpush1.bf16.msra.mxu1 %v5936_v3  ;;  %4264 = vmatpush3.bf16.msra.mxu0 %v5957_v27 }
 0xa6d   :  { %2538 = vmatprep.subr.bf16.mxu1 %v5939_v20  ;;  %4265 = vmatprep.subr.bf16.mxu0 %v6616_v48 }
 0xa70   :  { %2539 = vmatpush1.bf16.msra.mxu1 %v5948_v62  ;;  %4266 = vmatpush3.bf16.msra.mxu0 %v5969_v52 }
 0xa71   :  { %2540 = vmatprep.subr.bf16.mxu1 %v5950_v9  ;;  %4267 = vmatprep.subr.bf16.mxu0 %v6616_v48 }
 0xa74   :  { %2541 = vmatpush1.bf16.msra.mxu1 %v5960_v46  ;;  %4268 = vmatpush3.bf16.msra.mxu0 %v5981_v1 }
 0xa75   :  { %2542 = vmatprep.subr.bf16.mxu1 %v5963_v63  ;;  %4269 = vmatprep.subr.bf16.mxu0 %v6616_v48 }
 0xa78   :  { %2543 = vmatpush1.bf16.msra.mxu1 %v5972_v7  ;;  %4270 = vmatpush3.bf16.msra.mxu0 %v5991_v36 }
 0xa79   :  { %2544 = vmatprep.subr.bf16.mxu1 %v5974_v44  ;;  %4271 = vmatprep.subr.bf16.mxu0 %v6616_v48 }
 0xa7c   :  { %2545 = vmatpush1.bf16.msra.mxu1 %v5984_v11  ;;  %4272 = vmatpush3.bf16.msra.mxu0 %v5999_v38 }
 0xa7d   :  { %2688 = vmatprep.subr.bf16.mxu1 %v5904_v51  ;;  %4277 = vmatprep.subr.bf16.mxu0 %v6616_v48 }
 0xb32   :  { %v2406_v5 = vpop.f32.mrb[68].mxu1  ;;  %v2449_v8 = vpop.f32.mrb[52].mxu0 }
 0xb33   :  { %v4477_v4 = vadd.f32 %v2406_v5, %v6105_v19  ;;  %v2408_v31 = vpop.f32.mrb[69].mxu1  ;;  %v4255_v34 = vpop.f32.mrb[53].mxu0  ;;  %v2484_v5 = vadd.f32 %v6118_v47, %v2449_v8 }
 0xb34   :  { %v2410_v39 = vpop.f32.mrb[70].mxu1  ;;  %v2452_v17 = vpop.f32.mrb[54].mxu0  ;;  %v4478_v42 = vadd.f32 %v2408_v31, %v6111_v29 }
 0xb35   :  { %v3760_v13 = vmul.f32 -1.442695, %v4477_v4  ;;  %v4479_v40 = vadd.f32 %v2410_v39, %v6105_v19  ;;  %v2412_v12 = vpop.f32.mrb[71].mxu1  ;;  %v4256_v35 = vpop.f32.mrb[55].mxu0  ;;  %v2485_v31 = vadd.f32 %v6118_v47, %v2452_v17 }
 0xb36   :  { %v4480_v22 = vadd.f32 %v2412_v12, %v6111_v29  ;;  %v3762_v56 = vmul.f32 -1.442695, %v4478_v42 }
 0xb37   :  { %4779 = vpow2.f32 %v3760_v13  ;;  %v3761_v25 = vmul.f32 -1.442695, %v4479_v40 }
 0xb38   :  { %v3763_v54 = vmul.f32 -1.442695, %v4480_v22 }
 0xb39   :  { %4781 = vpow2.f32 %v3761_v25 }
 0xb3a   :  { %4783 = vpow2.f32 %v3762_v56 }
 0xb41   :  { %v4780_v21 = vpop.eup %4779 }
 0xb42   :  { %v2464_v53 = vadd.f32 1.0, %v4780_v21 }
 0xb43   :  { %v4782_v55 = vpop.eup %4781 }
 0xb44   :  { %4785 = vrcp.f32 %v2464_v53  ;;  %v2465_v24 = vadd.f32 1.0, %v4782_v55  ;;  %v4784_v60 = vpop.eup %4783 }
 0xb45   :  { %4787 = vpow2.f32 %v3763_v54  ;;  %v2478_v40 = vadd.f32 1.0, %v4784_v60 }
 0xb46   :  { %4789 = vrcp.f32 %v2465_v24 }
 0xb4e   :  { %v4786_v4 = vpop.eup %4785 }
 0xb4f   :  { %v4788_v34 = vpop.eup %4787  ;;  %v2486_v39 = vmul.f32 %v4786_v4, %v2484_v5 }
 0xb50   :  { %v4790_v13 = vpop.eup %4789  ;;  %v2479_v42 = vadd.f32 1.0, %v4788_v34 }
 0xb51   :  { %v2488_v12 = vadd.f32 %v2486_v39, %v6060_v14  ;;  %v2487_v35 = vmul.f32 %v4790_v13, %v2485_v31 }
 0xb53   :  { %4791 = vtanh.f32 %v2488_v12  ;;  %v2489_v25 = vadd.f32 %v2487_v35, %v6063_v2 }
 0xb54   :  { %4793 = vrcp.f32 %v2478_v40 }
 0xb55   :  { %4795 = vtanh.f32 %v2489_v25 }
 0xb56   :  { %4797 = vrcp.f32 %v2479_v42 }
 0xb5d   :  { %v4792_v22 = vpop.eup %4791 }
 0xb5e   :  { %v4794_v56 = vpop.eup %4793  ;;  %v2492_v8 = vsub.f32 %v6127_v18, %v4792_v22 }
 0xb5f   :  { %v4796_v21 = vpop.eup %4795 }
 0xb60   :  { %v2493_v54 = vsub.f32 %v6129_v15, %v4796_v21  ;;  %v2494_v17 = vmul.f32 %v4794_v56, %v2492_v8  ;;  %v4798_v53 = vpop.eup %4797 }
 0xb62   :  { %v2495_v55 = vmul.f32 %v4798_v53, %v2493_v54  ;;  %v6182_v24 = vadd.f32 %v4792_v22, %v2494_v17 }
 0xb64   :  { %v6184_v14 = vadd.f32 %v4796_v21, %v2495_v55 }
 0xb66   :  { %v6188_v2 = vpack.c.bf16 %v6184_v14, %v6182_v24 }
 0xb68   :  { %2563 = vmatmul.mubr.bf16.vlgmr.msra.gmra.mrb[72].mxu1 %v6188_v2  ;;  %4274 = vmatmul.mubr.bf16.vlgmr.msra.gmra.mrb[56].mxu0 %v6188_v2 }
 0xb69   :  { %2689 = vmatpush1.bf16.msra.mxu1 %v5907_v33  ;;  %4278 = vmatpush3.bf16.msra.mxu0 %v5921_v16 }
 0xb6a   :  { %2690 = vmatprep.subr.bf16.mxu1 %v5909_v45  ;;  %4279 = vmatprep.subr.bf16.mxu0 %v6616_v48 }
 0xb6b   :  { %2720 = vmatprep.mubr.bf16.mxu1 %v6617_v49  ;;  %4293 = vmatprep.mubr.msk.bf16.mxu0 %vm5071_vm0, %v6616_v48 }
 0xb6d   :  { %2691 = vmatpush1.bf16.msra.mxu1 %v5915_v30  ;;  %4280 = vmatpush3.bf16.msra.mxu0 %v5933_v61 }
 0xb6e   :  { %2692 = vmatprep.subr.bf16.mxu1 %v5917_v50  ;;  %4281 = vmatprep.subr.bf16.mxu0 %v6616_v48 }
 0xb71   :  { %2693 = vmatpush1.bf16.msra.mxu1 %v5924_v6  ;;  %4282 = vmatpush3.bf16.msra.mxu0 %v5945_v43 }
 0xb72   :  { %2694 = vmatprep.subr.bf16.mxu1 %v5926_v41  ;;  %4283 = vmatprep.subr.bf16.mxu0 %v6616_v48 }
 0xb75   :  { %2695 = vmatpush1.bf16.msra.mxu1 %v5936_v3  ;;  %4284 = vmatpush3.bf16.msra.mxu0 %v5957_v27 }
 0xb76   :  { %2696 = vmatprep.subr.bf16.mxu1 %v5939_v20  ;;  %4285 = vmatprep.subr.bf16.mxu0 %v6616_v48 }
 0xb79   :  { %2697 = vmatpush1.bf16.msra.mxu1 %v5948_v62  ;;  %4286 = vmatpush3.bf16.msra.mxu0 %v5969_v52 }
 0xb7a   :  { %2698 = vmatprep.subr.bf16.mxu1 %v5950_v9  ;;  %4287 = vmatprep.subr.bf16.mxu0 %v6616_v48 }
 0xb7d   :  { %2699 = vmatpush1.bf16.msra.mxu1 %v5960_v46  ;;  %4288 = vmatpush3.bf16.msra.mxu0 %v5981_v1 }
 0xb7e   :  { %2700 = vmatprep.subr.bf16.mxu1 %v5963_v63  ;;  %4289 = vmatprep.subr.bf16.mxu0 %v6616_v48 }
 0xb81   :  { %2701 = vmatpush1.bf16.msra.mxu1 %v5972_v7  ;;  %4290 = vmatpush3.bf16.msra.mxu0 %v5991_v36 }
 0xb82   :  { %2702 = vmatprep.subr.bf16.mxu1 %v5974_v44  ;;  %4291 = vmatprep.subr.bf16.mxu0 %v6616_v48 }
 0xb85   :  { %2703 = vmatpush1.bf16.msra.mxu1 %v5984_v11  ;;  %4292 = vmatpush3.bf16.msra.mxu0 %v5999_v38 }
 0xb86   :  { %2846 = vmatprep.subr.bf16.mxu1 %v5904_v51  ;;  %4297 = vmatprep.subr.bf16.mxu0 %v6616_v48 }
 0xc3b   :  { %v2564_v18 = vpop.f32.mrb[72].mxu1  ;;  %v2607_v15 = vpop.f32.mrb[56].mxu0 }
 0xc3c   :  { %v4481_v60 = vadd.f32 %v2564_v18, %v6105_v19  ;;  %v2566_v5 = vpop.f32.mrb[73].mxu1  ;;  %v4275_v4 = vpop.f32.mrb[57].mxu0  ;;  %v2642_v53 = vadd.f32 %v6118_v47, %v2607_v15 }
 0xc3d   :  { %v2568_v34 = vpop.f32.mrb[74].mxu1  ;;  %v2610_v39 = vpop.f32.mrb[58].mxu0  ;;  %v4482_v51 = vadd.f32 %v2566_v5, %v6111_v29 }
 0xc3e   :  { %v3764_v31 = vmul.f32 -1.442695, %v4481_v60  ;;  %v4483_v13 = vadd.f32 %v2568_v34, %v6105_v19  ;;  %v2570_v40 = vpop.f32.mrb[75].mxu1  ;;  %v4276_v12 = vpop.f32.mrb[59].mxu0  ;;  %v2643_v5 = vadd.f32 %v6118_v47, %v2610_v39 }
 0xc3f   :  { %v4484_v25 = vadd.f32 %v2570_v40, %v6111_v29  ;;  %v3766_v42 = vmul.f32 -1.442695, %v4482_v51 }
 0xc40   :  { %4799 = vpow2.f32 %v3764_v31  ;;  %v3765_v35 = vmul.f32 -1.442695, %v4483_v13 }
 0xc41   :  { %v3767_v56 = vmul.f32 -1.442695, %v4484_v25 }
 0xc42   :  { %4801 = vpow2.f32 %v3765_v35 }
 0xc43   :  { %4803 = vpow2.f32 %v3766_v42 }
 0xc4a   :  { %v4800_v22 = vpop.eup %4799 }
 0xc4b   :  { %v2622_v8 = vadd.f32 1.0, %v4800_v22 }
 0xc4c   :  { %v4802_v21 = vpop.eup %4801 }
 0xc4d   :  { %4805 = vrcp.f32 %v2622_v8  ;;  %v2623_v54 = vadd.f32 1.0, %v4802_v21  ;;  %v4804_v17 = vpop.eup %4803 }
 0xc4e   :  { %4807 = vpow2.f32 %v3767_v56  ;;  %v2636_v34 = vadd.f32 1.0, %v4804_v17 }
 0xc4f   :  { %4809 = vrcp.f32 %v2623_v54 }
 0xc57   :  { %v4806_v55 = vpop.eup %4805 }
 0xc58   :  { %v4808_v18 = vpop.eup %4807  ;;  %v2644_v60 = vmul.f32 %v4806_v55, %v2642_v53 }
 0xc59   :  { %v4810_v4 = vpop.eup %4809  ;;  %v2637_v12 = vadd.f32 1.0, %v4808_v18 }
 0xc5a   :  { %v2646_v31 = vadd.f32 %v2644_v60, %v6071_v57  ;;  %v2645_v13 = vmul.f32 %v4810_v4, %v2643_v5 }
 0xc5c   :  { %4811 = vtanh.f32 %v2646_v31  ;;  %v2647_v40 = vadd.f32 %v2645_v13, %v6077_v59 }
 0xc5d   :  { %4813 = vrcp.f32 %v2636_v34 }
 0xc5e   :  { %4815 = vtanh.f32 %v2647_v40 }
 0xc5f   :  { %4817 = vrcp.f32 %v2637_v12 }
 0xc66   :  { %v4812_v35 = vpop.eup %4811 }
 0xc67   :  { %v4814_v51 = vpop.eup %4813  ;;  %v2650_v15 = vsub.f32 %v6182_v24, %v4812_v35 }
 0xc68   :  { %v4816_v25 = vpop.eup %4815 }
 0xc69   :  { %v2651_v42 = vsub.f32 %v6184_v14, %v4816_v25  ;;  %v2652_v39 = vmul.f32 %v4814_v51, %v2650_v15  ;;  %v4818_v22 = vpop.eup %4817  ;;  %v6304_v15 = vld [vmem:[#allocation5 + $0xc8] sm:$0xff] }
 0xc6b   :  { %v2653_v56 = vmul.f32 %v4818_v22, %v2651_v42  ;;  %v6237_v8 = vadd.f32 %v4812_v35, %v2652_v39  ;;  %v6309_v42 = vld [vmem:[#allocation5 + $0xd0] sm:$0xff]  ;;  %v6314_v39 = vld [vmem:[#allocation5 + $0xe0] sm:$0xff]  ;;  %v6317_v22 = vld [vmem:[#allocation5 + $0xd8] sm:$0xff] }
 0xc6d   :  { %v6239_v57 = vadd.f32 %v4816_v25, %v2653_v56  ;;  %v6307_v25 = vld [vmem:[#allocation5 + $0xc0] sm:$0xff]  ;;  %v6319_v56 = vld [vmem:[#allocation5 + $0xe8] sm:$0xff] }
 0xc6f   :  { %v6243_v59 = vpack.c.bf16 %v6239_v57, %v6237_v8 }
 0xc71   :  { %2721 = vmatmul.mubr.bf16.vlgmr.msra.gmra.mrb[76].mxu1 %v6243_v59  ;;  %4294 = vmatmul.mubr.bf16.vlgmr.msra.gmra.mrb[60].mxu0 %v6243_v59 }
 0xc72   :  { %2847 = vmatpush1.bf16.msra.mxu1 %v5907_v33  ;;  %4298 = vmatpush3.bf16.msra.mxu0 %v5921_v16 }
 0xc73   :  { %2848 = vmatprep.subr.bf16.mxu1 %v5909_v45  ;;  %4299 = vmatprep.subr.bf16.mxu0 %v6616_v48 }
 0xc74   :  { %2878 = vmatprep.mubr.bf16.mxu1 %v6617_v49  ;;  %4313 = vmatprep.mubr.msk.bf16.mxu0 %vm5071_vm0, %v6616_v48 }
 0xc76   :  { %2849 = vmatpush1.bf16.msra.mxu1 %v5915_v30  ;;  %4300 = vmatpush3.bf16.msra.mxu0 %v5933_v61 }
 0xc77   :  { %2850 = vmatprep.subr.bf16.mxu1 %v5917_v50  ;;  %4301 = vmatprep.subr.bf16.mxu0 %v6616_v48 }
 0xc7a   :  { %2851 = vmatpush1.bf16.msra.mxu1 %v5924_v6  ;;  %4302 = vmatpush3.bf16.msra.mxu0 %v5945_v43 }
 0xc7b   :  { %2852 = vmatprep.subr.bf16.mxu1 %v5926_v41  ;;  %4303 = vmatprep.subr.bf16.mxu0 %v6616_v48 }
 0xc7e   :  { %2853 = vmatpush1.bf16.msra.mxu1 %v5936_v3  ;;  %4304 = vmatpush3.bf16.msra.mxu0 %v5957_v27 }
 0xc7f   :  { %2854 = vmatprep.subr.bf16.mxu1 %v5939_v20  ;;  %4305 = vmatprep.subr.bf16.mxu0 %v6616_v48 }
 0xc82   :  { %2855 = vmatpush1.bf16.msra.mxu1 %v5948_v62  ;;  %4306 = vmatpush3.bf16.msra.mxu0 %v5969_v52 }
 0xc83   :  { %2856 = vmatprep.subr.bf16.mxu1 %v5950_v9  ;;  %4307 = vmatprep.subr.bf16.mxu0 %v6616_v48 }
 0xc86   :  { %2857 = vmatpush1.bf16.msra.mxu1 %v5960_v46  ;;  %4308 = vmatpush3.bf16.msra.mxu0 %v5981_v1 }
 0xc87   :  { %2858 = vmatprep.subr.bf16.mxu1 %v5963_v63  ;;  %4309 = vmatprep.subr.bf16.mxu0 %v6616_v48 }
 0xc8a   :  { %2859 = vmatpush1.bf16.msra.mxu1 %v5972_v7  ;;  %4310 = vmatpush3.bf16.msra.mxu0 %v5991_v36 }
 0xc8b   :  { %2860 = vmatprep.subr.bf16.mxu1 %v5974_v44  ;;  %4311 = vmatprep.subr.bf16.mxu0 %v6616_v48 }
 0xc8e   :  { %2861 = vmatpush1.bf16.msra.mxu1 %v5984_v11  ;;  %4312 = vmatpush3.bf16.msra.mxu0 %v5999_v38 }
 0xc8f   :  { %4317 = vmatprep.subr.bf16.mxu0 %v6616_v48  ;;  %3004 = vmatprep.subr.bf16.mxu1 %v6304_v15 }
 0xd44   :  { %v2722_v33 = vpop.f32.mrb[76].mxu1  ;;  %v2765_v45 = vpop.f32.mrb[60].mxu0 }
 0xd45   :  { %v4485_v30 = vadd.f32 %v2722_v33, %v6105_v19  ;;  %v2724_v50 = vpop.f32.mrb[77].mxu1  ;;  %v4295_v16 = vpop.f32.mrb[61].mxu0  ;;  %v2800_v36 = vadd.f32 %v6118_v47, %v2765_v45  ;;  %v6329_v33 = vld [vmem:[#allocation5 + $0x100] sm:$0xff]  ;;  %v6334_v45 = vld [vmem:[#allocation5 + $0x110] sm:$0xff] }
 0xd46   :  { %v2726_v6 = vpop.f32.mrb[78].mxu1  ;;  %v2768_v41 = vpop.f32.mrb[62].mxu0  ;;  %v4486_v9 = vadd.f32 %v2724_v50, %v6111_v29  ;;  %v6339_v50 = vld [vmem:[#allocation5 + $0x118] sm:$0xff]  ;;  %v6343_v16 = vld [vmem:[#allocation5 + $0x128] sm:$0xff] }
 0xd47   :  { %v3768_v61 = vmul.f32 -1.442695, %v4485_v30  ;;  %v4487_v3 = vadd.f32 %v2726_v6, %v6105_v19  ;;  %v2728_v20 = vpop.f32.mrb[79].mxu1  ;;  %v4296_v43 = vpop.f32.mrb[63].mxu0  ;;  %v2801_v21 = vadd.f32 %v6118_v47, %v2768_v41  ;;  %v6337_v30 = vld [vmem:[#allocation5 + $0x108] sm:$0xff]  ;;  %v6347_v6 = vld [vmem:[#allocation5 + $0x120] sm:$0xff] }
 0xd48   :  { %v4488_v27 = vadd.f32 %v2728_v20, %v6111_v29  ;;  %v3770_v46 = vmul.f32 -1.442695, %v4486_v9  ;;  %v6349_v41 = vld [vmem:[#allocation5 + $0x130] sm:$0xff]  ;;  %v6359_v20 = vld [vmem:[#allocation5 + $0x148] sm:$0xff]  ;;  %v6361_v43 = vld [vmem:[#allocation5 + $0x158] sm:$0xff] }
 0xd49   :  { %4819 = vpow2.f32 %v3768_v61  ;;  %v3769_v62 = vmul.f32 -1.442695, %v4487_v3  ;;  %v6351_v61 = vld [vmem:[#allocation5 + $0x140] sm:$0xff]  ;;  %v6357_v3 = vld [vmem:[#allocation5 + $0x138] sm:$0xff] }
 0xd4a   :  { %v3771_v52 = vmul.f32 -1.442695, %v4488_v27  ;;  %v6369_v9 = vld [vmem:[#allocation5 + $0x160] sm:$0xff]  ;;  %v6371_v27 = vld [vmem:[#allocation5 + $0x170] sm:$0xff] }
 0xd4b   :  { %4821 = vpow2.f32 %v3769_v62  ;;  %v6367_v62 = vld [vmem:[#allocation5 + $0x150] sm:$0xff] }
 0xd4c   :  { %4823 = vpow2.f32 %v3770_v46  ;;  %v6377_v46 = vld [vmem:[#allocation5 + $0x168] sm:$0xff] }
 0xd53   :  { %v4820_v63 = vpop.eup %4819 }
 0xd54   :  { %v2780_v7 = vadd.f32 1.0, %v4820_v63  ;;  %v6379_v63 = vld [vmem:[#allocation5 + $0x178] sm:$0xff] }
 0xd55   :  { %v4822_v44 = vpop.eup %4821 }
 0xd56   :  { %4825 = vrcp.f32 %v2780_v7  ;;  %v2781_v1 = vadd.f32 1.0, %v4822_v44  ;;  %v4824_v11 = vpop.eup %4823 }
 0xd57   :  { %4827 = vpow2.f32 %v3771_v52  ;;  %v2794_v17 = vadd.f32 1.0, %v4824_v11 }
 0xd58   :  { %4829 = vrcp.f32 %v2781_v1 }
 0xd60   :  { %v4826_v38 = vpop.eup %4825 }
 0xd61   :  { %v4828_v24 = vpop.eup %4827  ;;  %v2802_v14 = vmul.f32 %v4826_v38, %v2800_v36 }
 0xd62   :  { %v4830_v54 = vpop.eup %4829  ;;  %v2795_v60 = vadd.f32 1.0, %v4828_v24 }
 0xd63   :  { %v2804_v53 = vadd.f32 %v2802_v14, %v6068_v23  ;;  %v2803_v55 = vmul.f32 %v4830_v54, %v2801_v21 }
 0xd65   :  { %4831 = vtanh.f32 %v2804_v53  ;;  %v2805_v18 = vadd.f32 %v2803_v55, %v6074_v58 }
 0xd66   :  { %4833 = vrcp.f32 %v2794_v17 }
 0xd67   :  { %4835 = vtanh.f32 %v2805_v18 }
 0xd68   :  { %4837 = vrcp.f32 %v2795_v60 }
 0xd6f   :  { %v4832_v5 = vpop.eup %4831 }
 0xd70   :  { %v4834_v4 = vpop.eup %4833  ;;  %v2808_v34 = vsub.f32 %v6237_v8, %v4832_v5  ;;  %v6324_v8 = vld [vmem:[#allocation5 + $0xf8] sm:$0xff] }
 0xd71   :  { %v4836_v31 = vpop.eup %4835 }
 0xd72   :  { %v2809_v13 = vsub.f32 %v6239_v57, %v4836_v31  ;;  %v2810_v40 = vmul.f32 %v4834_v4, %v2808_v34  ;;  %v4838_v12 = vpop.eup %4837  ;;  %v6327_v57 = vld [vmem:[#allocation5 + $0xf0] sm:$0xff] }
 0xd74   :  { %v2811_v35 = vmul.f32 %v4838_v12, %v2809_v13  ;;  %v6291_v51 = vadd.f32 %v4832_v5, %v2810_v40 }
 0xd76   :  { %v6293_v23 = vadd.f32 %v4836_v31, %v2811_v35 }
 0xd78   :  { %v6297_v58 = vpack.c.bf16 %v6293_v23, %v6291_v51 }
 0xd7a   :  { %2879 = vmatmul.mubr.bf16.vlgmr.msra.gmra.mrb[80].mxu1 %v6297_v58  ;;  %4314 = vmatmul.mubr.bf16.vlgmr.msra.gmra.mrb[64].mxu0 %v6297_v58 }
 0xd7b   :  { %3036 = vmatprep.mubr.bf16.mxu1 %v6617_v49  ;;  %4333 = vmatprep.mubr.msk.bf16.mxu0 %vm5071_vm0, %v6616_v48 }
 0xd7c   :  { %3005 = vmatpush1.bf16.msra.mxu1 %v6307_v25  ;;  %4318 = vmatpush3.bf16.msra.mxu0 %v6309_v42 }
 0xd7d   :  { %4319 = vmatprep.subr.bf16.mxu0 %v6616_v48  ;;  %3006 = vmatprep.subr.bf16.mxu1 %v6314_v39 }
 0xd80   :  { %3007 = vmatpush1.bf16.msra.mxu1 %v6317_v22  ;;  %4320 = vmatpush3.bf16.msra.mxu0 %v6319_v56 }
 0xd81   :  { %4321 = vmatprep.subr.bf16.mxu0 %v6616_v48  ;;  %3008 = vmatprep.subr.bf16.mxu1 %v6324_v8 }
 0xd84   :  { %3009 = vmatpush1.bf16.msra.mxu1 %v6327_v57  ;;  %4322 = vmatpush3.bf16.msra.mxu0 %v6329_v33 }
 0xd85   :  { %4323 = vmatprep.subr.bf16.mxu0 %v6616_v48  ;;  %3010 = vmatprep.subr.bf16.mxu1 %v6334_v45 }
 0xd88   :  { %3011 = vmatpush1.bf16.msra.mxu1 %v6337_v30  ;;  %4324 = vmatpush3.bf16.msra.mxu0 %v6339_v50 }
 0xd89   :  { %3012 = vmatprep.subr.bf16.mxu1 %v6343_v16  ;;  %4325 = vmatprep.subr.bf16.mxu0 %v6616_v48 }
 0xd8c   :  { %3013 = vmatpush1.bf16.msra.mxu1 %v6347_v6  ;;  %4326 = vmatpush3.bf16.msra.mxu0 %v6349_v41 }
 0xd8d   :  { %3014 = vmatprep.subr.bf16.mxu1 %v6351_v61  ;;  %4327 = vmatprep.subr.bf16.mxu0 %v6616_v48 }
 0xd90   :  { %3015 = vmatpush1.bf16.msra.mxu1 %v6357_v3  ;;  %4328 = vmatpush3.bf16.msra.mxu0 %v6359_v20 }
 0xd91   :  { %3016 = vmatprep.subr.bf16.mxu1 %v6361_v43  ;;  %4329 = vmatprep.subr.bf16.mxu0 %v6616_v48 }
 0xd94   :  { %3017 = vmatpush1.bf16.msra.mxu1 %v6367_v62  ;;  %4330 = vmatpush3.bf16.msra.mxu0 %v6369_v9 }
 0xd95   :  { %3018 = vmatprep.subr.bf16.mxu1 %v6371_v27  ;;  %4331 = vmatprep.subr.bf16.mxu0 %v6616_v48 }
 0xd98   :  { %3019 = vmatpush1.bf16.msra.mxu1 %v6377_v46  ;;  %4332 = vmatpush3.bf16.msra.mxu0 %v6379_v63 }
 0xd99   :  { %3162 = vmatprep.subr.bf16.mxu1 %v6304_v15  ;;  %4337 = vmatprep.subr.bf16.mxu0 %v6616_v48 }
 0xe4d   :  { %v2880_v52 = vpop.f32.mrb[80].mxu1  ;;  %v2923_v7 = vpop.f32.mrb[64].mxu0 }
 0xe4e   :  { %v4489_v44 = vadd.f32 %v2880_v52, %v6105_v19  ;;  %v2882_v1 = vpop.f32.mrb[81].mxu1  ;;  %v4315_v11 = vpop.f32.mrb[65].mxu0  ;;  %v2958_v40 = vadd.f32 %v6118_v47, %v2923_v7 }
 0xe4f   :  { %v2884_v36 = vpop.f32.mrb[82].mxu1  ;;  %v2926_v38 = vpop.f32.mrb[66].mxu0  ;;  %v4490_v53 = vadd.f32 %v2882_v1, %v6111_v29 }
 0xe50   :  { %v3772_v24 = vmul.f32 -1.442695, %v4489_v44  ;;  %v4491_v14 = vadd.f32 %v2884_v36, %v6105_v19  ;;  %v2886_v21 = vpop.f32.mrb[83].mxu1  ;;  %v4316_v54 = vpop.f32.mrb[67].mxu0  ;;  %v2959_v44 = vadd.f32 %v6118_v47, %v2926_v38 }
 0xe51   :  { %v4492_v55 = vadd.f32 %v2886_v21, %v6111_v29  ;;  %v3774_v18 = vmul.f32 -1.442695, %v4490_v53 }
 0xe52   :  { %4839 = vpow2.f32 %v3772_v24  ;;  %v3773_v17 = vmul.f32 -1.442695, %v4491_v14 }
 0xe53   :  { %v3775_v5 = vmul.f32 -1.442695, %v4492_v55 }
 0xe54   :  { %4841 = vpow2.f32 %v3773_v17 }
 0xe55   :  { %4843 = vpow2.f32 %v3774_v18 }
 0xe5c   :  { %v4840_v60 = vpop.eup %4839 }
 0xe5d   :  { %v2938_v4 = vadd.f32 1.0, %v4840_v60 }
 0xe5e   :  { %v4842_v34 = vpop.eup %4841 }
 0xe5f   :  { %4845 = vrcp.f32 %v2938_v4  ;;  %v2939_v31 = vadd.f32 1.0, %v4842_v34  ;;  %v4844_v13 = vpop.eup %4843 }
 0xe60   :  { %4847 = vpow2.f32 %v3775_v5  ;;  %v2952_v11 = vadd.f32 1.0, %v4844_v13 }
 0xe61   :  { %4849 = vrcp.f32 %v2939_v31 }
 0xe69   :  { %v4846_v12 = vpop.eup %4845 }
 0xe6a   :  { %v4848_v35 = vpop.eup %4847  ;;  %v2960_v52 = vmul.f32 %v4846_v12, %v2958_v40 }
 0xe6b   :  { %v4850_v1 = vpop.eup %4849  ;;  %v2953_v21 = vadd.f32 1.0, %v4848_v35 }
 0xe6c   :  { %v2962_v36 = vadd.f32 %v2960_v52, %v6083_v28  ;;  %v2961_v24 = vmul.f32 %v4850_v1, %v2959_v44 }
 0xe6e   :  { %4851 = vtanh.f32 %v2962_v36  ;;  %v2963_v14 = vadd.f32 %v2961_v24, %v6089_v37 }
 0xe6f   :  { %4853 = vrcp.f32 %v2952_v11 }
 0xe70   :  { %4855 = vtanh.f32 %v2963_v14 }
 0xe71   :  { %4857 = vrcp.f32 %v2953_v21 }
 0xe78   :  { %v4852_v54 = vpop.eup %4851 }
 0xe79   :  { %v4854_v17 = vpop.eup %4853  ;;  %v2966_v7 = vsub.f32 %v6291_v51, %v4852_v54 }
 0xe7a   :  { %v4856_v53 = vpop.eup %4855 }
 0xe7b   :  { %v2967_v55 = vsub.f32 %v6293_v23, %v4856_v53  ;;  %v2968_v38 = vmul.f32 %v4854_v17, %v2966_v7  ;;  %v4858_v18 = vpop.eup %4857 }
 0xe7d   :  { %v2969_v60 = vmul.f32 %v4858_v18, %v2967_v55  ;;  %v6395_v5 = vadd.f32 %v4852_v54, %v2968_v38 }
 0xe7f   :  { %v6397_v28 = vadd.f32 %v4856_v53, %v2969_v60 }
 0xe81   :  { %v6401_v37 = vpack.c.bf16 %v6397_v28, %v6395_v5 }
 0xe83   :  { %3037 = vmatmul.mubr.bf16.vlgmr.msra.gmra.mrb[84].mxu1 %v6401_v37  ;;  %4334 = vmatmul.mubr.bf16.vlgmr.msra.gmra.mrb[68].mxu0 %v6401_v37 }
 0xe84   :  { %3163 = vmatpush1.bf16.msra.mxu1 %v6307_v25  ;;  %4338 = vmatpush3.bf16.msra.mxu0 %v6309_v42 }
 0xe85   :  { %3164 = vmatprep.subr.bf16.mxu1 %v6314_v39  ;;  %4339 = vmatprep.subr.bf16.mxu0 %v6616_v48 }
 0xe86   :  { %3194 = vmatprep.mubr.bf16.mxu1 %v6617_v49  ;;  %4353 = vmatprep.mubr.msk.bf16.mxu0 %vm5071_vm0, %v6616_v48 }
 0xe88   :  { %3165 = vmatpush1.bf16.msra.mxu1 %v6317_v22  ;;  %4340 = vmatpush3.bf16.msra.mxu0 %v6319_v56 }
 0xe89   :  { %3166 = vmatprep.subr.bf16.mxu1 %v6324_v8  ;;  %4341 = vmatprep.subr.bf16.mxu0 %v6616_v48 }
 0xe8c   :  { %3167 = vmatpush1.bf16.msra.mxu1 %v6327_v57  ;;  %4342 = vmatpush3.bf16.msra.mxu0 %v6329_v33 }
 0xe8d   :  { %3168 = vmatprep.subr.bf16.mxu1 %v6334_v45  ;;  %4343 = vmatprep.subr.bf16.mxu0 %v6616_v48 }
 0xe90   :  { %3169 = vmatpush1.bf16.msra.mxu1 %v6337_v30  ;;  %4344 = vmatpush3.bf16.msra.mxu0 %v6339_v50 }
 0xe91   :  { %3170 = vmatprep.subr.bf16.mxu1 %v6343_v16  ;;  %4345 = vmatprep.subr.bf16.mxu0 %v6616_v48 }
 0xe94   :  { %3171 = vmatpush1.bf16.msra.mxu1 %v6347_v6  ;;  %4346 = vmatpush3.bf16.msra.mxu0 %v6349_v41 }
 0xe95   :  { %3172 = vmatprep.subr.bf16.mxu1 %v6351_v61  ;;  %4347 = vmatprep.subr.bf16.mxu0 %v6616_v48 }
 0xe98   :  { %3173 = vmatpush1.bf16.msra.mxu1 %v6357_v3  ;;  %4348 = vmatpush3.bf16.msra.mxu0 %v6359_v20 }
 0xe99   :  { %3174 = vmatprep.subr.bf16.mxu1 %v6361_v43  ;;  %4349 = vmatprep.subr.bf16.mxu0 %v6616_v48 }
 0xe9c   :  { %3175 = vmatpush1.bf16.msra.mxu1 %v6367_v62  ;;  %4350 = vmatpush3.bf16.msra.mxu0 %v6369_v9 }
 0xe9d   :  { %3176 = vmatprep.subr.bf16.mxu1 %v6371_v27  ;;  %4351 = vmatprep.subr.bf16.mxu0 %v6616_v48 }
 0xea0   :  { %3177 = vmatpush1.bf16.msra.mxu1 %v6377_v46  ;;  %4352 = vmatpush3.bf16.msra.mxu0 %v6379_v63 }
 0xea1   :  { %4357 = vmatprep.subr.bf16.mxu0 %v6616_v48  ;;  %3320 = vmatprep.subr.bf16.mxu1 %v6304_v15 }
 0xf56   :  { %v3038_v51 = vpop.f32.mrb[84].mxu1  ;;  %v3081_v23 = vpop.f32.mrb[68].mxu0 }
 0xf57   :  { %v4493_v4 = vadd.f32 %v3038_v51, %v6105_v19  ;;  %v3040_v34 = vpop.f32.mrb[85].mxu1  ;;  %v4335_v31 = vpop.f32.mrb[69].mxu0  ;;  %v3116_v53 = vadd.f32 %v6118_v47, %v3081_v23 }
 0xf58   :  { %v3042_v13 = vpop.f32.mrb[86].mxu1  ;;  %v3084_v40 = vpop.f32.mrb[70].mxu0  ;;  %v4494_v11 = vadd.f32 %v3040_v34, %v6111_v29 }
 0xf59   :  { %v3776_v12 = vmul.f32 -1.442695, %v4493_v4  ;;  %v4495_v35 = vadd.f32 %v3042_v13, %v6105_v19  ;;  %v3044_v52 = vpop.f32.mrb[87].mxu1  ;;  %v4336_v44 = vpop.f32.mrb[71].mxu0  ;;  %v3117_v60 = vadd.f32 %v6118_v47, %v3084_v40 }
 0xf5a   :  { %v4496_v15 = vadd.f32 %v3044_v52, %v6111_v29  ;;  %v3778_v36 = vmul.f32 -1.442695, %v4494_v11 }
 0xf5b   :  { %4859 = vpow2.f32 %v3776_v12  ;;  %v3777_v1 = vmul.f32 -1.442695, %v4495_v35 }
 0xf5c   :  { %v3779_v14 = vmul.f32 -1.442695, %v4496_v15 }
 0xf5d   :  { %4861 = vpow2.f32 %v3777_v1 }
 0xf5e   :  { %4863 = vpow2.f32 %v3778_v36 }
 0xf65   :  { %v4860_v24 = vpop.eup %4859 }
 0xf66   :  { %v3096_v21 = vadd.f32 1.0, %v4860_v24 }
 0xf67   :  { %v4862_v54 = vpop.eup %4861 }
 0xf68   :  { %4865 = vrcp.f32 %v3096_v21  ;;  %v3097_v17 = vadd.f32 1.0, %v4862_v54  ;;  %v4864_v7 = vpop.eup %4863 }
 0xf69   :  { %4867 = vpow2.f32 %v3779_v14  ;;  %v3110_v4 = vadd.f32 1.0, %v4864_v7 }
 0xf6a   :  { %4869 = vrcp.f32 %v3097_v17  ;;  %v6642_v17 = vld [vmem:[#allocation34_spill] sm:$0xff] }
 0xf72   :  { %v4866_v55 = vpop.eup %4865 }
 0xf73   :  { %v4868_v38 = vpop.eup %4867  ;;  %v3118_v18 = vmul.f32 %v4866_v55, %v3116_v53 }
 0xf74   :  { %v4870_v51 = vpop.eup %4869  ;;  %v3111_v12 = vadd.f32 1.0, %v4868_v38 }
 0xf75   :  { %v3120_v34 = vadd.f32 %v3118_v18, %v6080_v26  ;;  %v3119_v31 = vmul.f32 %v4870_v51, %v3117_v60 }
 0xf77   :  { %4871 = vtanh.f32 %v3120_v34  ;;  %v3121_v13 = vadd.f32 %v3119_v31, %v6086_v32 }
 0xf78   :  { %4873 = vrcp.f32 %v3110_v4 }
 0xf79   :  { %4875 = vtanh.f32 %v3121_v13 }
 0xf7a   :  { %4877 = vrcp.f32 %v3111_v12 }
 0xf81   :  { %v4872_v35 = vpop.eup %4871 }
 0xf82   :  { %v4874_v52 = vpop.eup %4873  ;;  %v3124_v23 = vsub.f32 %v6395_v5, %v4872_v35 }
 0xf83   :  { %v4876_v44 = vpop.eup %4875 }
 0xf84   :  { %v3125_v1 = vsub.f32 %v6397_v28, %v4876_v44  ;;  %v3126_v47 = vmul.f32 %v4874_v52, %v3124_v23  ;;  %v4878_v40 = vpop.eup %4877  ;;  %v4753_v52 = vld [vmem:[#allocation12 + $0x10] sm:$0xff]   ;;  %v4754_v23 = vld [vmem:[#allocation12 + $0x18] sm:$0xff]  }
 0xf86   :  { %v3127_v11 = vmul.f32 %v4878_v40, %v3125_v1  ;;  %v6450_v15 = vadd.f32 %v4872_v35, %v3126_v47  ;;  %v4752_v35 = vld [vmem:[#allocation12 + $0x8] sm:$0xff]   ;;  %v4757_v47 = vld [vmem:[#allocation12 + $0x30] sm:$0xff]   ;;  %v4758_v40 = vld [vmem:[#allocation12 + $0x38] sm:$0xff]  }
 0xf87   :  { %v4756_v1 = vld [vmem:[#allocation12 + $0x28] sm:$0xff]  }
 0xf88   :  { %v6452_v26 = vadd.f32 %v4876_v44, %v3127_v11  ;;  %v4755_v44 = vld [vmem:[#allocation12 + $0x20] sm:$0xff]  }
 0xf8a   :  { %v6456_v32 = vpack.c.bf16 %v6452_v26, %v6450_v15 }
 0xf8c   :  { %3195 = vmatmul.mubr.bf16.vlgmr.msra.gmra.mrb[88].mxu1 %v6456_v32  ;;  %4354 = vmatmul.mubr.bf16.vlgmr.msra.gmra.mrb[72].mxu0 %v6456_v32 }
 0xf8d   :  { %4358 = vmatpush3.bf16.msra.mxu0 %v6309_v42  ;;  %3321 = vmatpush1.bf16.msra.mxu1 %v6307_v25 }
 0xf8e   :  { %4359 = vmatprep.subr.bf16.mxu0 %v6616_v48  ;;  %3322 = vmatprep.subr.bf16.mxu1 %v6314_v39 }
 0xf8f   :  { %3352 = vmatprep.mubr.bf16.mxu1 %v6617_v49  ;;  %4373 = vmatprep.mubr.msk.bf16.mxu0 %vm5071_vm0, %v6616_v48  ;;  %v4751_v49 = vld [vmem:[#allocation12] sm:$0xff]  }
 0xf91   :  { %4360 = vmatpush3.bf16.msra.mxu0 %v6319_v56  ;;  %3323 = vmatpush1.bf16.msra.mxu1 %v6317_v22 }
 0xf92   :  { %4361 = vmatprep.subr.bf16.mxu0 %v6616_v48  ;;  %3324 = vmatprep.subr.bf16.mxu1 %v6324_v8 }
 0xf95   :  { %4362 = vmatpush3.bf16.msra.mxu0 %v6329_v33  ;;  %3325 = vmatpush1.bf16.msra.mxu1 %v6327_v57 }
 0xf96   :  { %4363 = vmatprep.subr.bf16.mxu0 %v6616_v48  ;;  %3326 = vmatprep.subr.bf16.mxu1 %v6334_v45 }
 0xf99   :  { %4364 = vmatpush3.bf16.msra.mxu0 %v6339_v50  ;;  %3327 = vmatpush1.bf16.msra.mxu1 %v6337_v30 }
 0xf9a   :  { %4365 = vmatprep.subr.bf16.mxu0 %v6616_v48  ;;  %3328 = vmatprep.subr.bf16.mxu1 %v6343_v16 }
 0xf9d   :  { %4366 = vmatpush3.bf16.msra.mxu0 %v6349_v41  ;;  %3329 = vmatpush1.bf16.msra.mxu1 %v6347_v6 }
 0xf9e   :  { %4367 = vmatprep.subr.bf16.mxu0 %v6616_v48  ;;  %3330 = vmatprep.subr.bf16.mxu1 %v6351_v61 }
 0xfa1   :  { %4368 = vmatpush3.bf16.msra.mxu0 %v6359_v20  ;;  %3331 = vmatpush1.bf16.msra.mxu1 %v6357_v3 }
 0xfa2   :  { %4369 = vmatprep.subr.bf16.mxu0 %v6616_v48  ;;  %3332 = vmatprep.subr.bf16.mxu1 %v6361_v43 }
 0xfa5   :  { %4370 = vmatpush3.bf16.msra.mxu0 %v6369_v9  ;;  %3333 = vmatpush1.bf16.msra.mxu1 %v6367_v62 }
 0xfa6   :  { %4371 = vmatprep.subr.bf16.mxu0 %v6616_v48  ;;  %3334 = vmatprep.subr.bf16.mxu1 %v6371_v27  ;;  %v6500_v27 = vld [vmem:[%s6584_s5 + $0x1] ss:$0 sm:$0xff] }
 0xfa9   :  { %4372 = vmatpush3.bf16.msra.mxu0 %v6379_v63  ;;  %3335 = vmatpush1.bf16.msra.mxu1 %v6377_v46 }
 0xfaa   :  { %4377 = vmatprep.subr.bf16.mxu0 %v4751_v49 }
0x105f   :  { %v3196_v25 = vpop.f32.mrb[88].mxu1  ;;  %v3239_v42 = vpop.f32.mrb[72].mxu0 }
0x1060   :  { %v4497_v39 = vadd.f32 %v3196_v25, %v6105_v19  ;;  %v3198_v22 = vpop.f32.mrb[89].mxu1  ;;  %v4355_v56 = vpop.f32.mrb[73].mxu0  ;;  %v3274_v46 = vadd.f32 %v6500_v27, %v3239_v42 }
0x1061   :  { %v3200_v8 = vpop.f32.mrb[90].mxu1  ;;  %v3242_v57 = vpop.f32.mrb[74].mxu0  ;;  %v4498_v16 = vadd.f32 %v3198_v22, %v6111_v29 }
0x1062   :  { %v3780_v33 = vmul.f32 -1.442695, %v4497_v39  ;;  %v4499_v45 = vadd.f32 %v3200_v8, %v6105_v19  ;;  %v3202_v48 = vpop.f32.mrb[91].mxu1  ;;  %v4356_v30 = vpop.f32.mrb[75].mxu0  ;;  %v3275_v36 = vadd.f32 %v6500_v27, %v3242_v57 }
0x1063   :  { %v4500_v6 = vadd.f32 %v3202_v48, %v6111_v29  ;;  %v3782_v41 = vmul.f32 -1.442695, %v4498_v16 }
0x1064   :  { %4879 = vpow2.f32 %v3780_v33  ;;  %v3781_v50 = vmul.f32 -1.442695, %v4499_v45 }
0x1065   :  { %v3783_v3 = vmul.f32 -1.442695, %v4500_v6 }
0x1066   :  { %4881 = vpow2.f32 %v3781_v50 }
0x1067   :  { %4883 = vpow2.f32 %v3782_v41 }
0x106e   :  { %v4880_v61 = vpop.eup %4879 }
0x106f   :  { %v3254_v20 = vadd.f32 1.0, %v4880_v61 }
0x1070   :  { %v4882_v43 = vpop.eup %4881 }
0x1071   :  { %4885 = vrcp.f32 %v3254_v20  ;;  %v3255_v62 = vadd.f32 1.0, %v4882_v43  ;;  %v4884_v9 = vpop.eup %4883  ;;  %v6643_v20 = vld [vmem:[#allocation32_spill] sm:$0xff] }
0x1072   :  { %4887 = vpow2.f32 %v3783_v3  ;;  %v3268_v14 = vadd.f32 1.0, %v4884_v9  ;;  %v6529_v3 = vld [vmem:[%s6586_s7] ss:$0 sm:$0xff]  ;;  %s5072_s7 = smov [#allocation14]  }
0x1073   :  { %4889 = vrcp.f32 %v3255_v62  ;;  %s3660_s30 = sshll.u32 %s5072_s7, 4  ;;  %s3661_s30 = int_to_ptr.vmem [resolvable:$true] %s3660_s30 }
0x1074   :  { %s4986_s6 = scalar_lea.vmem %s3661_s30, 512  ;;  %p4991_p11 = scmp.lt.s32.totalorder %s3661_s30, %s3661_s30 }
0x1075   :  { %p4987_p10 = scmp.ne.s32.totalorder %s3661_s30, %s4986_s6  ;;  %p4992_p12 = scmp.lt.s32.totalorder %s4986_s6, %s4986_s6 }
0x1077   :  { %p4993_p13 = por %p4992_p12, %p4991_p11 }
0x1079   :  { %p4994_p0 = pnand %p4993_p13, %p4987_p10 }
0x107b   :  { %v4886_v63 = vpop.eup %4885 }
0x107c   :  { %v4888_v5 = vpop.eup %4887  ;;  %v3276_v28 = vmul.f32 %v4886_v63, %v3274_v46  ;;  %v6644_v46 = vld [vmem:[#allocation33_spill] sm:$0xff] }
0x107d   :  { %v4890_v24 = vpop.eup %4889  ;;  %v3269_v53 = vadd.f32 1.0, %v4888_v5 }
0x107e   :  { %v3278_v21 = vadd.f32 %v3276_v28, %v6095_v0  ;;  %v3277_v54 = vmul.f32 %v4890_v24, %v3275_v36 }
0x1080   :  { %4891 = vtanh.f32 %v3278_v21  ;;  %v3279_v7 = vadd.f32 %v3277_v54, %v6642_v17 }
0x1081   :  { %4893 = vrcp.f32 %v3268_v14 }
0x1082   :  { %4895 = vtanh.f32 %v3279_v7 }
0x1083   :  { %4897 = vrcp.f32 %v3269_v53 }
0x108a   :  { %v4892_v55 = vpop.eup %4891 }
0x108b   :  { %v4894_v38 = vpop.eup %4893  ;;  %v3282_v18 = vsub.f32 %v6450_v15, %v4892_v55 }
0x108c   :  { %v4896_v60 = vpop.eup %4895 }
0x108d   :  { %v3283_v51 = vsub.f32 %v6452_v26, %v4896_v60  ;;  %v3284_v4 = vmul.f32 %v4894_v38, %v3282_v18  ;;  %v4898_v34 = vpop.eup %4897 }
0x108f   :  { %v3285_v31 = vmul.f32 %v4898_v34, %v3283_v51  ;;  %v6508_v13 = vadd.f32 %v4892_v55, %v3284_v4 }
0x1091   :  { %v6510_v0 = vadd.f32 %v4896_v60, %v3285_v31 }
0x1093   :  { %v3288_v12 = vpack.c.bf16 %v6510_v0, %v6508_v13 }
0x1095   :  { %3353 = vmatmul.mubr.bf16.vlgmr.msra.gmra.mrb[92].mxu1 %v3288_v12  ;;  %4374 = vmatmul.mubr.bf16.vlgmr.msra.gmra.mrb[76].mxu0 %v3288_v12 }
0x1096   :  { %4378 = vmatpush3.bf16.msra.mxu0 %v4751_v49  ;;  %4393 = vmatprep.mubr.bf16.mxu0 %v6133_v10 }
0x1097   :  { %4379 = vmatprep.subr.bf16.mxu0 %v4752_v35 }
0x109a   :  { %4380 = vmatpush3.bf16.msra.mxu0 %v4752_v35 }
0x109b   :  { %4381 = vmatprep.subr.bf16.mxu0 %v4753_v52 }
0x109e   :  { %4382 = vmatpush3.bf16.msra.mxu0 %v4753_v52 }
0x109f   :  { %4383 = vmatprep.subr.bf16.mxu0 %v4754_v23 }
0x10a2   :  { %4384 = vmatpush3.bf16.msra.mxu0 %v4754_v23 }
0x10a3   :  { %4385 = vmatprep.subr.bf16.mxu0 %v4755_v44 }
0x10a6   :  { %4386 = vmatpush3.bf16.msra.mxu0 %v4755_v44 }
0x10a7   :  { %4387 = vmatprep.subr.bf16.mxu0 %v4756_v1 }
0x10aa   :  { %4388 = vmatpush3.bf16.msra.mxu0 %v4756_v1 }
0x10ab   :  { %4389 = vmatprep.subr.bf16.mxu0 %v4757_v47 }
0x10ae   :  { %4390 = vmatpush3.bf16.msra.mxu0 %v4757_v47 }
0x10af   :  { %4391 = vmatprep.subr.bf16.mxu0 %v4758_v40 }
0x10b2   :  { %4392 = vmatpush3.bf16.msra.mxu0 %v4758_v40 }
0x10b5   :  { %4394 = vmatmul.mubr.bf16.vlgmr.msra.gmra.mrb[80].mxu0 %v6188_v2 }
0x10b6   :  { %4397 = vmatprep.mubr.bf16.mxu0 %v6243_v59 }
0x10bd   :  { %4398 = vmatmul.mubr.bf16.gmra.mrb[84].mxu0 %v6297_v58 }
0x10be   :  { %4401 = vmatprep.mubr.bf16.mxu0 %v6401_v37 }
0x10c5   :  { %4402 = vmatmul.mubr.bf16.gmra.mrb[88].mxu0 %v6456_v32 }
0x10c6   :  { %4405 = vmatprep.mubr.bf16.mxu0 %v3288_v12 }
0x1168   :  { %v3354_v10 = vpop.f32.mrb[92].mxu1  ;;  %v3397_v11 = vpop.f32.mrb[76].mxu0 }
0x1169   :  { %v4501_v15 = vadd.f32 %v3354_v10, %v6105_v19  ;;  %v3356_v26 = vpop.f32.mrb[93].mxu1  ;;  %v4375_v49 = vpop.f32.mrb[77].mxu0  ;;  %v3432_v30 = vadd.f32 %v6500_v27, %v3397_v11 }
0x116a   :  { %v3358_v25 = vpop.f32.mrb[94].mxu1  ;;  %v3400_v42 = vpop.f32.mrb[78].mxu0  ;;  %v4502_v37 = vadd.f32 %v3356_v26, %v6111_v29 }
0x116b   :  { %v3784_v39 = vmul.f32 -1.442695, %v4501_v15  ;;  %v4503_v2 = vadd.f32 %v3358_v25, %v6105_v19  ;;  %v3360_v22 = vpop.f32.mrb[95].mxu1  ;;  %v4376_v59 = vpop.f32.mrb[79].mxu0  ;;  %v3433_v41 = vadd.f32 %v6500_v27, %v3400_v42 }
0x116c   :  { %v4504_v32 = vadd.f32 %v3360_v22, %v6111_v29  ;;  %v3786_v56 = vmul.f32 -1.442695, %v4502_v37 }
0x116d   :  { %4899 = vpow2.f32 %v3784_v39  ;;  %v3785_v58 = vmul.f32 -1.442695, %v4503_v2 }
0x116e   :  { %v3787_v57 = vmul.f32 -1.442695, %v4504_v32 }
0x116f   :  { %4901 = vpow2.f32 %v3785_v58 }
0x1170   :  { %4903 = vpow2.f32 %v3786_v56 }
0x1177   :  { %v4900_v8 = vpop.eup %4899 }
0x1178   :  { %v3412_v33 = vadd.f32 1.0, %v4900_v8 }
0x1179   :  { %v4902_v45 = vpop.eup %4901 }
0x117a   :  { %4905 = vrcp.f32 %v3412_v33  ;;  %v3413_v48 = vadd.f32 1.0, %v4902_v45  ;;  %v4904_v19 = vpop.eup %4903 }
0x117b   :  { %4907 = vpow2.f32 %v3787_v57  ;;  %v3426_v29 = vadd.f32 1.0, %v4904_v19 }
0x117c   :  { %4909 = vrcp.f32 %v3413_v48 }
0x1184   :  { %v4906_v50 = vpop.eup %4905 }
0x1185   :  { %v4908_v16 = vpop.eup %4907  ;;  %v3434_v6 = vmul.f32 %v4906_v50, %v3432_v30 }
0x1186   :  { %v4910_v61 = vpop.eup %4909  ;;  %v3427_v5 = vadd.f32 1.0, %v4908_v16 }
0x1187   :  { %v3436_v43 = vadd.f32 %v3434_v6, %v6643_v20  ;;  %v3435_v62 = vmul.f32 %v4910_v61, %v3433_v41 }
0x1188   :  { %v4395_v9 = vpop.f32.mrb[80].mxu0 }
0x1189   :  { %4911 = vtanh.f32 %v3436_v43  ;;  %v3437_v63 = vadd.f32 %v3435_v62, %v6644_v46  ;;  %v3573_v28 = vadd.f32 %v4395_v9, %v6529_v3  ;;  %v3564_v36 = vpop.f32.mrb[81].mxu0 }
0x118a   :  { %4913 = vrcp.f32 %v3426_v29  ;;  %v3565_v27 = vadd.f32 %v6529_v3, %v3564_v36  ;;  %v4396_v24 = vpop.f32.mrb[82].mxu0 }
0x118b   :  { %4915 = vtanh.f32 %v3437_v63  ;;  %3629 = vst [vmem:[#allocation13 + $0x8] sm:$0xff] %v3573_v28  ;;  %v3576_v14 = vadd.f32 %v4396_v24, %v6529_v3  ;;  %v3567_v21 = vpop.f32.mrb[83].mxu0 }
0x118c   :  { %3627 = vst [vmem:[#allocation13] sm:$0xff] %v3565_v27  ;;  %v3568_v54 = vadd.f32 %v6529_v3, %v3567_v21  ;;  %4917 = vrcp.f32 %v3427_v5 }
0x118d   :  { %3630 = vst [vmem:[#allocation13 + $0x48] sm:$0xff] %v3576_v14 }
0x118e   :  { %3628 = vst [vmem:[#allocation13 + $0x40] sm:$0xff] %v3568_v54 }
0x1190   :  { %v4399_v17 = vpop.f32.mrb[84].mxu0 }
0x1191   :  { %v3589_v7 = vadd.f32 %v4399_v17, %v6529_v3  ;;  %v3580_v53 = vpop.f32.mrb[85].mxu0 }
0x1192   :  { %v3581_v55 = vadd.f32 %v6529_v3, %v3580_v53  ;;  %v4400_v38 = vpop.f32.mrb[86].mxu0 }
0x1193   :  { %v4912_v18 = vpop.eup %4911  ;;  %3633 = vst [vmem:[#allocation13 + $0x18] sm:$0xff] %v3589_v7  ;;  %v3592_v60 = vadd.f32 %v4400_v38, %v6529_v3  ;;  %v3583_v51 = vpop.f32.mrb[87].mxu0 }
0x1194   :  { %v4914_v4 = vpop.eup %4913  ;;  %3631 = vst [vmem:[#allocation13 + $0x10] sm:$0xff] %v3581_v55  ;;  %v3584_v34 = vadd.f32 %v6529_v3, %v3583_v51  ;;  %v3440_v31 = vsub.f32 %v6508_v13, %v4912_v18 }
0x1195   :  { %v4916_v12 = vpop.eup %4915  ;;  %3634 = vst [vmem:[#allocation13 + $0x58] sm:$0xff] %v3592_v60 }
0x1196   :  { %3632 = vst [vmem:[#allocation13 + $0x50] sm:$0xff] %v3584_v34  ;;  %v3441_v35 = vsub.f32 %v6510_v0, %v4916_v12  ;;  %v3442_v52 = vmul.f32 %v4914_v4, %v3440_v31  ;;  %v4918_v23 = vpop.eup %4917 }
0x1198   :  { %v4403_v44 = vpop.f32.mrb[88].mxu0  ;;  %v3443_v1 = vmul.f32 %v4918_v23, %v3441_v35  ;;  %v3444_v47 = vadd.f32 %v4912_v18, %v3442_v52 }
0x1199   :  { %v3605_v40 = vadd.f32 %v4403_v44, %v6529_v3  ;;  %v3596_v10 = vpop.f32.mrb[89].mxu0 }
0x119a   :  { %v3597_v11 = vadd.f32 %v6529_v3, %v3596_v10  ;;  %v4404_v15 = vpop.f32.mrb[90].mxu0  ;;  %v3445_v26 = vadd.f32 %v4916_v12, %v3443_v1  ;;  %3449 = vst [vmem:[#allocation14 + $0x10] sm:$0xff] %v3444_v47 }
0x119b   :  { %3637 = vst [vmem:[#allocation13 + $0x28] sm:$0xff] %v3605_v40  ;;  %v3608_v13 = vadd.f32 %v4404_v15, %v6529_v3  ;;  %v3599_v49 = vpop.f32.mrb[91].mxu0 }
0x119c   :  { %3635 = vst [vmem:[#allocation13 + $0x20] sm:$0xff] %v3597_v11  ;;  %v3600_v0 = vadd.f32 %v6529_v3, %v3599_v49  ;;  %v3446_v25 = vpack.c.bf16 %v3445_v26, %v3444_v47  ;;  %3450 = vst [vmem:[#allocation14 + $0x18] sm:$0xff] %v3445_v26 }
0x119d   :  { %3638 = vst [vmem:[#allocation13 + $0x68] sm:$0xff] %v3608_v13 }
0x119e   :  { %3636 = vst [vmem:[#allocation13 + $0x60] sm:$0xff] %v3600_v0  ;;  %4406 = vmatmul.mubr.bf16.gmra.mrb[92].mxu0 %v3446_v25 }
0x119f   :  { %4997 = shalt.err (!%p4994_p0)
}
0x11a0   :  { %s4998_s2 = scalar_lea.hbm %s6588_s9, 512 }
0x11a1   :  { %p4999_p1 = scmp.ne.s32.totalorder %s6588_s9, %s4998_s2  ;;  %p5002_p2 = scmp.lt.u32.totalorder %s4998_s2, %s6588_s9 }
0x11a3   :  { %p5004_p3 = pnand %p5002_p2, %p4999_p1 }
0x11a5   :  { %5007 = shalt.err (!%p5004_p3)
}
0x11a6   :  { %3666 = dma.vmem_to_hbm [thread:$0]  %s3661_s30, 512, %s6588_s9, [#allocation15], %s5047_s19, %s5047_s19, %s5048_s20  }
0x11a7   :  { %s5073_s3 = smov [#allocation13]  }
0x11a8   :  { %s3648_s10 = sshll.u32 %s5073_s3, 4  ;;  %s3649_s10 = int_to_ptr.vmem [resolvable:$true] %s3648_s10 }
0x11a9   :  { %s5008_s9 = scalar_lea.vmem %s3649_s10, 2048  ;;  %p5013_p5 = scmp.lt.s32.totalorder %s3649_s10, %s3649_s10 }
0x11aa   :  { %p5009_p4 = scmp.ne.s32.totalorder %s3649_s10, %s5008_s9  ;;  %p5014_p6 = scmp.lt.s32.totalorder %s5008_s9, %s5008_s9 }
0x11ac   :  { %p5015_p7 = por %p5014_p6, %p5013_p5 }
0x11ae   :  { %p5016_p8 = pnand %p5015_p7, %p5009_p4 }
0x1271   :  { %v4407_v42 = vpop.f32.mrb[92].mxu0 }
0x1272   :  { %v3621_v39 = vadd.f32 %v4407_v42, %v6529_v3  ;;  %v3612_v2 = vpop.f32.mrb[93].mxu0 }
0x1273   :  { %v3613_v22 = vadd.f32 %v6529_v3, %v3612_v2  ;;  %v4408_v59 = vpop.f32.mrb[94].mxu0 }
0x1274   :  { %3641 = vst [vmem:[#allocation13 + $0x38] sm:$0xff] %v3621_v39  ;;  %v3624_v58 = vadd.f32 %v4408_v59, %v6529_v3  ;;  %v3615_v37 = vpop.f32.mrb[95].mxu0 }
0x1275   :  { %3639 = vst [vmem:[#allocation13 + $0x30] sm:$0xff] %v3613_v22  ;;  %v3616_v32 = vadd.f32 %v6529_v3, %v3615_v37 }
0x1276   :  { %3642 = vst [vmem:[#allocation13 + $0x78] sm:$0xff] %v3624_v58 }
0x1277   :  { %3640 = vst [vmem:[#allocation13 + $0x70] sm:$0xff] %v3616_v32 }
0x1278   :  { %5019 = shalt.err (!%p5016_p8)
}
0x1279   :  { %s5020_s12 = scalar_lea.hbm %s6587_s8, 2048 }
0x127a   :  { %p5021_p9 = scmp.ne.s32.totalorder %s6587_s8, %s5020_s12  ;;  %p5024_p10 = scmp.lt.u32.totalorder %s5020_s12, %s6587_s8 }
0x127c   :  { %p5026_p11 = pnand %p5024_p10, %p5021_p9 }
0x127e   :  { %5029 = shalt.err (!%p5026_p11)
}
0x127f   :  { %s5074_s27 = smov 1024  }
0x1280   :  { %3654 = dma.vmem_to_hbm [thread:$0]  %s3649_s10, 2048, %s6587_s8, [#allocation9], %s5074_s27, %s5074_s27, %s5050_s1  }
0x1281   :  { %5042 = dma.done.wait [#allocation9], 2048  }
0x1282   :  { %5043 = vsyncadd [#allocation9], 4294965248 }
0x1283   :  { %5044 = dma.done.wait [#allocation15], 512  }
0x1284   :  { %5045 = vsyncadd [#allocation15], 4294966784 }
0x1285   :  { %3673 = vsyncpa [#allocation8], 1 }
0x1286   :  { %3674 = vsyncpa [#allocation11], 1 }
0x1287   :  { %3675 = vsyncpa [#allocation9], 1 }
0x1288   :  { %3676 = vsyncpa [#allocation15], 1 }
0x1289   :  { %3677 = vsyncmov [#allocation6] }
0x128c   :  { %s3678_s24 = vpop.sfrf %3677 }
0x128d   :  { %p3797_p12 = scmp.ne.s32.totalorder %s3678_s24, 0 }
0x128f   :  { %3682 = shalt.err (%p3797_p12)  }
0x1290   :  { %3684 = vsyncmov [#allocation6 + $0x1] }
0x1293   :  { %s3685_s28 = vpop.sfrf %3684 }
0x1294   :  { %p3798_p13 = scmp.ne.s32.totalorder %s3685_s28, 0 }
0x1296   :  { %3689 = shalt.err (%p3798_p13)  }
0x1297   :  { %3691 = vsyncmov [#allocation6 + $0x2] }
0x129a   :  { %s3692_s5 = vpop.sfrf %3691 }
0x129b   :  { %p3799_p0 = scmp.ne.s32.totalorder %s3692_s5, 0 }
0x129d   :  { %3696 = shalt.err (%p3799_p0)  }
0x129e   :  { %3698 = vsyncmov [#allocation6 + $0x3] }
0x12a1   :  { %s3699_s8 = vpop.sfrf %3698 }
0x12a2   :  { %p3800_p1 = scmp.ne.s32.totalorder %s3699_s8, 0 }
0x12a4   :  { %3703 = shalt.err (%p3800_p1)  }

</bundles_post_ra>
